<compile_context>
chip_gen: v5e
topology: v5e:2x2
jax: 0.10.0
libtpu: 0.0.40
codegen_flags: <defaults>
</compile_context>

<pallas_src>
import functools

import numpy as np
import jax
import jax.numpy as jnp
from jax.experimental import pallas as pl
from jax.experimental.pallas import tpu as pltpu


def _round_up(v, m):
    return ((v + m - 1) // m) * m


# ------------------------------ kernel factory --------------------------------

def _make_network_block_kernel(nb_layers, cin0, cout, H, W, Ho, Wo, G, stride,
                               has_shortcut):
    L1, L2 = G * H * W, G * Ho * Wo
    PAD1 = _round_up(W + 1, 128)          # lane-aligned halo, covers +/- (W+1)
    PAD2 = _round_up(Wo + 1, 128)
    has_sel = stride > 1

    def conv3x3(pad_ref, act, w_ref, mask_ref, Wdim, PAD, L):
        """3x3 pad-1 conv as 9 accumulating (rows,cin)@(cin,L) bf16 MXU dots."""
        C = act.shape[0]
        rows = w_ref.shape[1]
        # Zero only the halo slices (aligned, tiny); interior is overwritten below.
        pad_ref[:, :PAD] = jnp.zeros((C, PAD), jnp.float32)
        pad_ref[:, PAD + L:] = jnp.zeros((C, PAD), jnp.float32)
        pad_ref[:, PAD:PAD + L] = act
        acc = jnp.zeros((rows, L), jnp.float32)
        t = 0
        for dh in (-1, 0, 1):
            for dw in (-1, 0, 1):
                d = dh * Wdim + dw
                tap = pad_ref[:, PAD + d:PAD + d + L]            # (C, L) shifted view
                if dh != 0 or dw != 0:
                    # kill row wrap-around and cross-image reads from lane packing
                    tap = tap * mask_ref[t:t + 1, :]
                acc = acc + jnp.dot(w_ref[t], tap.astype(jnp.bfloat16),
                                    preferred_element_type=jnp.float32)
                t += 1
        return acc

    def kernel(*refs):
        it = iter(refs)
        x_ref = next(it)
        mask_a_ref = next(it)                                    # (9, L1) input-res masks
        mask_b_ref = next(it)                                    # (9, L2) output-res masks
        sel_ref = next(it) if has_sel else None                  # (L1, L2) bf16 downsample
        seg_ref = next(it)                                       # (L2, L2) per-image avg projector
        layer_refs = [tuple(next(it) for _ in range(6)) for _ in range(nb_layers)]
        o_ref = next(it)
        pad_a_ref = next(it)                                     # padded act, input res
        pad_b_ref = next(it)                                     # padded act, output res

        x_cur = x_ref[...]                                       # (cin0, L1) f32
        for i, (s1, b1, w1t, s2, b2, w2t) in enumerate(layer_refs):
            first = i == 0
            # bn1 + relu (folded eval-mode BN: per-channel scale/shift on sublanes)
            act = jnp.maximum(x_cur * s1[...] + b1[...], 0.0)

            # conv1 (3x3, pad 1) [+ fused 1x1 shortcut rows for the first layer]
            if first:
                z1 = conv3x3(pad_a_ref, act, w1t, mask_a_ref, W, PAD1, L1)
                if has_sel:
                    # exact stride-s downsample of conv1 and shortcut rows
                    z1 = jnp.dot(z1.astype(jnp.bfloat16), sel_ref[...],
                                 preferred_element_type=jnp.float32)   # (rows, L2)
            else:
                z1 = conv3x3(pad_b_ref, act, w1t, mask_b_ref, Wo, PAD2, L2)

            if first and has_shortcut:
                h, sc = z1[:cout, :], z1[cout:, :]               # conv1 / 1x1 shortcut
            else:
                h, sc = z1, x_cur                                # identity shortcut

            # bn2 + relu
            a2 = jnp.maximum(h * s2[...] + b2[...], 0.0)

            # conv2 (3x3, stride 1, pad 1)
            h2 = conv3x3(pad_b_ref, a2, w2t, mask_b_ref, Wo, PAD2, L2)

            # gather-excite gate (extent=0, no params, no mlp): per-image global
            # average via block-diagonal projector matmul (stays lane-dense), sigmoid.
            m = jnp.dot(h2, seg_ref[...], preferred_element_type=jnp.float32)
            gate = pl.reciprocal(1.0 + jnp.exp(-m), approx=True)        # sigmoid (EUP)
            x_cur = sc + h2 * gate

        o_ref[...] = x_cur.astype(o_ref.dtype)

    return kernel


# ------------------------------ wrapper / glue --------------------------------

def _fold_bn(bn, eps=1e-5):
    scale = bn["gamma"] / jnp.sqrt(bn["var"] + eps)
    shift = bn["beta"] - bn["mean"] * scale
    return scale[:, None].astype(jnp.float32), shift[:, None].astype(jnp.float32)


def _pack_taps(conv_w, convsc_w=None):
    # (Cout, Cin, 3, 3) -> (9, rows, Cin) bf16, tap-major (kh, kw).  Optionally
    # append 1x1-shortcut rows on the centre tap so conv1 + shortcut share one pass.
    cout, cin = conv_w.shape[0], conv_w.shape[1]
    w = jnp.transpose(conv_w, (2, 3, 0, 1)).reshape(9, cout, cin)
    if convsc_w is not None:
        extra = jnp.zeros((9, cout, cin), conv_w.dtype)
        extra = extra.at[4].set(convsc_w.reshape(cout, cin))     # centre tap == 1x1
        w = jnp.concatenate([w, extra], axis=1)                  # (9, 2*cout, cin)
    return w.astype(jnp.bfloat16)


def _tap_masks(G, H, W):
    # (9, G*H*W): validity of each 3x3 tap per flattened (image, h, w) position.
    L = G * H * W
    idx = np.arange(L)
    h = (idx % (H * W)) // W
    w = idx % W
    m = np.ones((9, L), np.float32)
    t = 0
    for dh in (-1, 0, 1):
        for dw in (-1, 0, 1):
            m[t] = ((h + dh >= 0) & (h + dh < H) &
                    (w + dw >= 0) & (w + dw < W)).astype(np.float32)
            t += 1
    return jnp.asarray(m)


def _stride_select(G, H, W, s):
    # Block-diagonal (G*H*W, G*Ho*Wo) 0/1 matrix: stride-s conv == stride-1 conv
    # sampled at (s*ho, s*wo).  Entries exact in bf16.
    Ho, Wo = (H - 1) // s + 1, (W - 1) // s + 1
    S = np.zeros((G * H * W, G * Ho * Wo), np.float32)
    for g in range(G):
        for ho in range(Ho):
            for wo in range(Wo):
                S[g * H * W + (ho * s) * W + wo * s, g * Ho * Wo + ho * Wo + wo] = 1.0
    return jnp.asarray(S, dtype=jnp.bfloat16)


def _seg_avg_projector(G, HWo):
    # (L2, L2) block-diagonal 1/HWo projector: one matmul yields the per-image
    # spatial mean already broadcast back over that image's columns.
    L2 = G * HWo
    img = np.arange(L2) // HWo
    P = (img[:, None] == img[None, :]).astype(np.float32) / float(HWo)
    return jnp.asarray(P)


def _choose_group(N, HWo):
    # Smallest divisor of N giving >=128 lanes (lane-dense stores), else all of N.
    for g in range(1, N + 1):
        if N % g == 0 and g * HWo >= 128:
            return g
    return N


def network_block_forward(x_nchw, layer_params, stride):
    """NetworkBlock.forward (nb_layers GE blocks) as one fused pallas_call."""
    N, cin0, H, W = x_nchw.shape
    cout = layer_params[0]["conv1_w"].shape[0]
    nb_layers = len(layer_params)
    has_shortcut = "convsc_w" in layer_params[0]
    if not has_shortcut:
        assert cin0 == cout and stride == 1   # identity shortcut needs matching shapes
    Ho, Wo = (H - 1) // stride + 1, (W - 1) // stride + 1
    G = _choose_group(N, Ho * Wo)             # images packed per grid step
    L1, L2 = G * H * W, G * Ho * Wo
    PAD1 = _round_up(W + 1, 128)
    PAD2 = _round_up(Wo + 1, 128)

    # channels -> sublanes, (image, spatial) -> lanes
    x_flat = jnp.transpose(x_nchw, (1, 0, 2, 3)).reshape(cin0, N * H * W)

    args = [x_flat, _tap_masks(G, H, W), _tap_masks(G, Ho, Wo)]
    in_specs = [
        pl.BlockSpec((cin0, L1), lambda g: (0, g)),              # x (per image group)
        pl.BlockSpec((9, L1), lambda g: (0, 0)),                 # tap masks, input res
        pl.BlockSpec((9, L2), lambda g: (0, 0)),                 # tap masks, output res
    ]
    if stride > 1:
        args.append(_stride_select(G, H, W, stride))
        in_specs.append(pl.BlockSpec((L1, L2), lambda g: (0, 0)))
    args.append(_seg_avg_projector(G, Ho * Wo))
    in_specs.append(pl.BlockSpec((L2, L2), lambda g: (0, 0)))

    for i, p in enumerate(layer_params):
        cin_i = cin0 if i == 0 else cout
        s1, b1 = _fold_bn(p["bn1"])
        s2, b2 = _fold_bn(p["bn2"])
        w1t = _pack_taps(p["conv1_w"], p.get("convsc_w") if i == 0 else None)
        w2t = _pack_taps(p["conv2_w"])
        rows = w1t.shape[1]
        args += [s1, b1, w1t, s2, b2, w2t]
        in_specs += [
            pl.BlockSpec((cin_i, 1), lambda g: (0, 0)),          # bn1 scale
            pl.BlockSpec((cin_i, 1), lambda g: (0, 0)),          # bn1 shift
            pl.BlockSpec((9, rows, cin_i), lambda g: (0, 0, 0)), # conv1 (+shortcut) taps
            pl.BlockSpec((cout, 1), lambda g: (0, 0)),           # bn2 scale
            pl.BlockSpec((cout, 1), lambda g: (0, 0)),           # bn2 shift
            pl.BlockSpec((9, cout, cout), lambda g: (0, 0, 0)),  # conv2 taps
        ]

    kernel = _make_network_block_kernel(nb_layers, cin0, cout, H, W, Ho, Wo, G,
                                        stride, has_shortcut)
    out = pl.pallas_call(
        kernel,
        out_shape=jax.ShapeDtypeStruct((cout, N * Ho * Wo), jnp.float32),
        grid=(N // G,),
        in_specs=in_specs,
        out_specs=pl.BlockSpec((cout, L2), lambda g: (0, g)),
        scratch_shapes=[
            pltpu.VMEM((cin0, L1 + 2 * PAD1), jnp.float32),      # padded act, input res
            pltpu.VMEM((cout, L2 + 2 * PAD2), jnp.float32),      # padded act, output res
        ],
        compiler_params=pltpu.CompilerParams(
            dimension_semantics=("parallel",)),
    )(*args)

    # TODO(synk): dropout path (dropRate > 0, training mode) not implemented;
    # configured dropRate = 0.0 so it is a no-op here.
    return out.reshape(cout, N, Ho, Wo).transpose(1, 0, 2, 3)


# --------------------------- deterministic params ------------------------------

def _conv_w(key, cout, cin, ksz):
    fan = ksz * ksz * cout
    return jax.random.normal(key, (cout, cin, ksz, ksz),
                             jnp.float32) * jnp.sqrt(2.0 / fan)


def _bn_p(key, c):
    k1, k2, k3 = jax.random.split(key, 3)
    return dict(
        gamma=1.0 + 0.1 * jax.random.normal(k1, (c,), jnp.float32),
        beta=0.1 * jax.random.normal(k2, (c,), jnp.float32),
        mean=0.1 * jax.random.normal(k3, (c,), jnp.float32),
        var=jnp.ones((c,), jnp.float32),
    )


def init_block_params(key, in_planes, out_planes):
    ks = jax.random.split(key, 5)
    p = dict(
        bn1=_bn_p(ks[0], in_planes),
        conv1_w=_conv_w(ks[1], out_planes, in_planes, 3),
        bn2=_bn_p(ks[2], out_planes),
        conv2_w=_conv_w(ks[3], out_planes, out_planes, 3),
    )
    if in_planes != out_planes:
        p["convsc_w"] = _conv_w(ks[4], out_planes, in_planes, 1)
    return p


# ----------------------------- pure-JAX reference ------------------------------

def _ref_conv(x, w, stride, pad):
    return jax.lax.conv_general_dilated(
        x, w, (stride, stride), ((pad, pad), (pad, pad)),
        dimension_numbers=("NCHW", "OIHW", "NCHW"),
        precision=jax.lax.Precision.HIGHEST)


def _ref_block(x, p, stride):
    def bn(z, b):
        s = b["gamma"] / jnp.sqrt(b["var"] + 1e-5)
        sh = b["beta"] - b["mean"] * s
        return z * s[None, :, None, None] + sh[None, :, None, None]

    act = jax.nn.relu(bn(x, p["bn1"]))
    h = _ref_conv(act, p["conv1_w"], stride, 1)
    h = jax.nn.relu(bn(h, p["bn2"]))
    h = _ref_conv(h, p["conv2_w"], 1, 1)
    sc = _ref_conv(act, p["convsc_w"], stride, 0) if "convsc_w" in p else x
    gate = jax.nn.sigmoid(jnp.mean(h, axis=(2, 3), keepdims=True))
    return sc + h * gate


def ref_network_block(x, params, stride):
    for i, p in enumerate(params):
        x = _ref_block(x, p, stride if i == 0 else 1)
    return x


# ------------------------------------ main -------------------------------------

if __name__ == "__main__":
    key = jax.random.PRNGKey(0)
    k_x, k_p = jax.random.split(key)

    # NetworkBlock(nb_layers=2, in_planes=4, out_planes=8, block=GEBlock,
    #              stride=2, spatial=16, extent=0, extra_params=False,
    #              mlp=False, dropRate=0.0)
    nb_layers, in_planes, out_planes, stride = 2, 4, 8, 2
    N, H = 2, 16

    x = jax.random.normal(k_x, (N, in_planes, H, H), jnp.float32)  # NCHW
    layer_keys = jax.random.split(k_p, nb_layers)
    params = [
        init_block_params(layer_keys[i],
                          in_planes if i == 0 else out_planes,
                          out_planes)
        for i in range(nb_layers)
    ]

    fwd = jax.jit(functools.partial(network_block_forward, stride=stride))
    y = fwd(x, params)
    jax.block_until_ready(y)

    assert y.shape == (N, out_planes, H // stride, H // stride), y.shape
    assert bool(jnp.all(jnp.isfinite(y)))

    # Numerical check vs a pure-JAX f32 reference (kernel matmuls run in bf16
    # with f32 accumulation, so the tolerance is scale-relative).
    y_ref = ref_network_block(x, params, stride)
    scale = float(jnp.max(jnp.abs(y_ref)))
    err = float(jnp.max(jnp.abs(y - y_ref)))
    assert err <= 2.5e-2 * max(scale, 1.0), f"mismatch vs reference: {err} (scale {scale})"

    print("KERNEL_OK")
</pallas_src>

<mosaic_0001>
module attributes {stable_mosaic.version = 11 : i64} {
  func.func @kernel(%arg0: i32, %arg1: memref<4x512xf32, #tpu.memory_space<vmem>>, %arg2: memref<9x512xf32, #tpu.memory_space<vmem>>, %arg3: memref<9x128xf32, #tpu.memory_space<vmem>>, %arg4: memref<512x128xbf16, #tpu.memory_space<vmem>>, %arg5: memref<128x128xf32, #tpu.memory_space<vmem>>, %arg6: memref<4x1xf32, #tpu.memory_space<vmem>>, %arg7: memref<4x1xf32, #tpu.memory_space<vmem>>, %arg8: memref<9x16x4xbf16, #tpu.memory_space<vmem>>, %arg9: memref<8x1xf32, #tpu.memory_space<vmem>>, %arg10: memref<8x1xf32, #tpu.memory_space<vmem>>, %arg11: memref<9x8x8xbf16, #tpu.memory_space<vmem>>, %arg12: memref<8x1xf32, #tpu.memory_space<vmem>>, %arg13: memref<8x1xf32, #tpu.memory_space<vmem>>, %arg14: memref<9x8x8xbf16, #tpu.memory_space<vmem>>, %arg15: memref<8x1xf32, #tpu.memory_space<vmem>>, %arg16: memref<8x1xf32, #tpu.memory_space<vmem>>, %arg17: memref<9x8x8xbf16, #tpu.memory_space<vmem>>, %arg18: memref<8x128xf32, #tpu.memory_space<vmem>>, %arg19: memref<4x768xf32, #tpu.memory_space<vmem>>, %arg20: memref<8x384xf32, #tpu.memory_space<vmem>>) attributes {dimension_semantics = [#tpu.dimension_semantics<parallel>], iteration_bounds = array<i64: 1>, scalar_prefetch = 0 : i64, scratch_operands = 2 : i64, tpu.core_type = #tpu.core_type<tc>, window_params = [{transform_indices = @transform_0, window_bounds = array<i64: 4, 512>}, {pipeline_mode = #tpu.pipeline_mode<synchronous>, transform_indices = @transform_1, window_bounds = array<i64: 9, 512>}, {pipeline_mode = #tpu.pipeline_mode<synchronous>, transform_indices = @transform_2, window_bounds = array<i64: 9, 128>}, {pipeline_mode = #tpu.pipeline_mode<synchronous>, transform_indices = @transform_3, window_bounds = array<i64: 512, 128>}, {pipeline_mode = #tpu.pipeline_mode<synchronous>, transform_indices = @transform_4, window_bounds = array<i64: 128, 128>}, {pipeline_mode = #tpu.pipeline_mode<synchronous>, transform_indices = @transform_5, window_bounds = array<i64: 4, 1>}, {pipeline_mode = #tpu.pipeline_mode<synchronous>, transform_indices = @transform_6, window_bounds = array<i64: 4, 1>}, {pipeline_mode = #tpu.pipeline_mode<synchronous>, transform_indices = @transform_7, window_bounds = array<i64: 9, 16, 4>}, {pipeline_mode = #tpu.pipeline_mode<synchronous>, transform_indices = @transform_8, window_bounds = array<i64: 8, 1>}, {pipeline_mode = #tpu.pipeline_mode<synchronous>, transform_indices = @transform_9, window_bounds = array<i64: 8, 1>}, {pipeline_mode = #tpu.pipeline_mode<synchronous>, transform_indices = @transform_10, window_bounds = array<i64: 9, 8, 8>}, {pipeline_mode = #tpu.pipeline_mode<synchronous>, transform_indices = @transform_11, window_bounds = array<i64: 8, 1>}, {pipeline_mode = #tpu.pipeline_mode<synchronous>, transform_indices = @transform_12, window_bounds = array<i64: 8, 1>}, {pipeline_mode = #tpu.pipeline_mode<synchronous>, transform_indices = @transform_13, window_bounds = array<i64: 9, 8, 8>}, {pipeline_mode = #tpu.pipeline_mode<synchronous>, transform_indices = @transform_14, window_bounds = array<i64: 8, 1>}, {pipeline_mode = #tpu.pipeline_mode<synchronous>, transform_indices = @transform_15, window_bounds = array<i64: 8, 1>}, {pipeline_mode = #tpu.pipeline_mode<synchronous>, transform_indices = @transform_16, window_bounds = array<i64: 9, 8, 8>}, {transform_indices = @transform_17, window_bounds = array<i64: 8, 128>}]} {
    %c0 = arith.constant 0 : index
    %c0_0 = arith.constant 0 : index
    %0 = vector.load %arg1[%c0, %c0_0] : memref<4x512xf32, #tpu.memory_space<vmem>>, vector<4x512xf32>
    %c0_1 = arith.constant 0 : index
    %c0_2 = arith.constant 0 : index
    %1 = vector.load %arg6[%c0_1, %c0_2] : memref<4x1xf32, #tpu.memory_space<vmem>>, vector<4x1xf32>
    %2 = vector.broadcast %1 : vector<4x1xf32> to vector<4x512xf32>
    %3 = arith.mulf %0, %2 : vector<4x512xf32>
    %c0_3 = arith.constant 0 : index
    %c0_4 = arith.constant 0 : index
    %4 = vector.load %arg7[%c0_3, %c0_4] : memref<4x1xf32, #tpu.memory_space<vmem>>, vector<4x1xf32>
    %5 = vector.broadcast %4 : vector<4x1xf32> to vector<4x512xf32>
    %6 = arith.addf %3, %5 : vector<4x512xf32>
    %cst = arith.constant 0.000000e+00 : f32
    %7 = vector.broadcast %cst : f32 to vector<4x512xf32>
    %8 = arith.maximumf %6, %7 : vector<4x512xf32>
    %cst_5 = arith.constant 0.000000e+00 : f32
    %9 = vector.broadcast %cst_5 : f32 to vector<4x128xf32>
    %c0_6 = arith.constant 0 : index
    %c0_7 = arith.constant 0 : index
    %10 = vector.load %arg19[%c0_6, %c0_7] : memref<4x768xf32, #tpu.memory_space<vmem>>, vector<4x128xf32>
    tpu.vector_store %arg19[%c0_6, %c0_7], %9 {strides = array<i32>} : memref<4x768xf32, #tpu.memory_space<vmem>>, vector<4x128xf32>,
    %cst_8 = arith.constant 0.000000e+00 : f32
    %11 = vector.broadcast %cst_8 : f32 to vector<4x128xf32>
    %c0_9 = arith.constant 0 : index
    %c640 = arith.constant 640 : index
    %12 = vector.load %arg19[%c0_9, %c640] : memref<4x768xf32, #tpu.memory_space<vmem>>, vector<4x128xf32>
    tpu.vector_store %arg19[%c0_9, %c640], %11 {strides = array<i32>} : memref<4x768xf32, #tpu.memory_space<vmem>>, vector<4x128xf32>,
    %c0_10 = arith.constant 0 : index
    %c128 = arith.constant 128 : index
    %13 = vector.load %arg19[%c0_10, %c128] : memref<4x768xf32, #tpu.memory_space<vmem>>, vector<4x512xf32>
    tpu.vector_store %arg19[%c0_10, %c128], %8 {strides = array<i32>} : memref<4x768xf32, #tpu.memory_space<vmem>>, vector<4x512xf32>,
    %cst_11 = arith.constant 0.000000e+00 : f32
    %14 = vector.broadcast %cst_11 : f32 to vector<16x512xf32>
    %c0_12 = arith.constant 0 : index
    %c111 = arith.constant 111 : index
    %15 = vector.load %arg19[%c0_12, %c111] : memref<4x768xf32, #tpu.memory_space<vmem>>, vector<4x512xf32>
    %c0_13 = arith.constant 0 : index
    %c0_14 = arith.constant 0 : index
    %16 = vector.load %arg2[%c0_13, %c0_14] : memref<9x512xf32, #tpu.memory_space<vmem>>, vector<1x512xf32>
    %17 = vector.broadcast %16 : vector<1x512xf32> to vector<4x512xf32>
    %18 = arith.mulf %15, %17 : vector<4x512xf32>
    %c0_15 = arith.constant 0 : index
    %c0_16 = arith.constant 0 : index
    %c0_17 = arith.constant 0 : index
    %19 = vector.load %arg8[%c0_15, %c0_16, %c0_17] : memref<9x16x4xbf16, #tpu.memory_space<vmem>>, vector<1x16x4xbf16>
    %20 = vector.shape_cast %19 : vector<1x16x4xbf16> to vector<16x4xbf16>
    %21 = arith.truncf %18 : vector<4x512xf32> to vector<4x512xbf16>
    %cst_18 = arith.constant dense<0.000000e+00> : vector<16x512xf32>
    %22 = tpu.matmul %20, %21, %cst_18 {dimension_numbers = #tpu.dot_dimension_numbers<[1], [0], [0], [1], [0, 0, 1, 1], [], []>} : vector<16x4xbf16>, vector<4x512xbf16>, vector<16x512xf32> -> vector<16x512xf32>
    %23 = arith.addf %14, %22 : vector<16x512xf32>
    %c0_19 = arith.constant 0 : index
    %c112 = arith.constant 112 : index
    %24 = vector.load %arg19[%c0_19, %c112] : memref<4x768xf32, #tpu.memory_space<vmem>>, vector<4x512xf32>
    %c1 = arith.constant 1 : index
    %c0_20 = arith.constant 0 : index
    %25 = vector.load %arg2[%c1, %c0_20] : memref<9x512xf32, #tpu.memory_space<vmem>>, vector<1x512xf32>
    %26 = vector.broadcast %25 : vector<1x512xf32> to vector<4x512xf32>
    %27 = arith.mulf %24, %26 : vector<4x512xf32>
    %c1_21 = arith.constant 1 : index
    %c0_22 = arith.constant 0 : index
    %c0_23 = arith.constant 0 : index
    %28 = vector.load %arg8[%c1_21, %c0_22, %c0_23] : memref<9x16x4xbf16, #tpu.memory_space<vmem>>, vector<1x16x4xbf16>
    %29 = vector.shape_cast %28 : vector<1x16x4xbf16> to vector<16x4xbf16>
    %30 = arith.truncf %27 : vector<4x512xf32> to vector<4x512xbf16>
    %cst_24 = arith.constant dense<0.000000e+00> : vector<16x512xf32>
    %31 = tpu.matmul %29, %30, %cst_24 {dimension_numbers = #tpu.dot_dimension_numbers<[1], [0], [0], [1], [0, 0, 1, 1], [], []>} : vector<16x4xbf16>, vector<4x512xbf16>, vector<16x512xf32> -> vector<16x512xf32>
    %32 = arith.addf %23, %31 : vector<16x512xf32>
    %c0_25 = arith.constant 0 : index
    %c113 = arith.constant 113 : index
    %33 = vector.load %arg19[%c0_25, %c113] : memref<4x768xf32, #tpu.memory_space<vmem>>, vector<4x512xf32>
    %c2 = arith.constant 2 : index
    %c0_26 = arith.constant 0 : index
    %34 = vector.load %arg2[%c2, %c0_26] : memref<9x512xf32, #tpu.memory_space<vmem>>, vector<1x512xf32>
    %35 = vector.broadcast %34 : vector<1x512xf32> to vector<4x512xf32>
    %36 = arith.mulf %33, %35 : vector<4x512xf32>
    %c2_27 = arith.constant 2 : index
    %c0_28 = arith.constant 0 : index
    %c0_29 = arith.constant 0 : index
    %37 = vector.load %arg8[%c2_27, %c0_28, %c0_29] : memref<9x16x4xbf16, #tpu.memory_space<vmem>>, vector<1x16x4xbf16>
    %38 = vector.shape_cast %37 : vector<1x16x4xbf16> to vector<16x4xbf16>
    %39 = arith.truncf %36 : vector<4x512xf32> to vector<4x512xbf16>
    %cst_30 = arith.constant dense<0.000000e+00> : vector<16x512xf32>
    %40 = tpu.matmul %38, %39, %cst_30 {dimension_numbers = #tpu.dot_dimension_numbers<[1], [0], [0], [1], [0, 0, 1, 1], [], []>} : vector<16x4xbf16>, vector<4x512xbf16>, vector<16x512xf32> -> vector<16x512xf32>
    %41 = arith.addf %32, %40 : vector<16x512xf32>
    %c0_31 = arith.constant 0 : index
    %c127 = arith.constant 127 : index
    %42 = vector.load %arg19[%c0_31, %c127] : memref<4x768xf32, #tpu.memory_space<vmem>>, vector<4x512xf32>
    %c3 = arith.constant 3 : index
    %c0_32 = arith.constant 0 : index
    %43 = vector.load %arg2[%c3, %c0_32] : memref<9x512xf32, #tpu.memory_space<vmem>>, vector<1x512xf32>
    %44 = vector.broadcast %43 : vector<1x512xf32> to vector<4x512xf32>
    %45 = arith.mulf %42, %44 : vector<4x512xf32>
    %c3_33 = arith.constant 3 : index
    %c0_34 = arith.constant 0 : index
    %c0_35 = arith.constant 0 : index
    %46 = vector.load %arg8[%c3_33, %c0_34, %c0_35] : memref<9x16x4xbf16, #tpu.memory_space<vmem>>, vector<1x16x4xbf16>
    %47 = vector.shape_cast %46 : vector<1x16x4xbf16> to vector<16x4xbf16>
    %48 = arith.truncf %45 : vector<4x512xf32> to vector<4x512xbf16>
    %cst_36 = arith.constant dense<0.000000e+00> : vector<16x512xf32>
    %49 = tpu.matmul %47, %48, %cst_36 {dimension_numbers = #tpu.dot_dimension_numbers<[1], [0], [0], [1], [0, 0, 1, 1], [], []>} : vector<16x4xbf16>, vector<4x512xbf16>, vector<16x512xf32> -> vector<16x512xf32>
    %50 = arith.addf %41, %49 : vector<16x512xf32>
    %c0_37 = arith.constant 0 : index
    %c128_38 = arith.constant 128 : index
    %51 = vector.load %arg19[%c0_37, %c128_38] : memref<4x768xf32, #tpu.memory_space<vmem>>, vector<4x512xf32>
    %c4 = arith.constant 4 : index
    %c0_39 = arith.constant 0 : index
    %c0_40 = arith.constant 0 : index
    %52 = vector.load %arg8[%c4, %c0_39, %c0_40] : memref<9x16x4xbf16, #tpu.memory_space<vmem>>, vector<1x16x4xbf16>
    %53 = vector.shape_cast %52 : vector<1x16x4xbf16> to vector<16x4xbf16>
    %54 = arith.truncf %51 : vector<4x512xf32> to vector<4x512xbf16>
    %cst_41 = arith.constant dense<0.000000e+00> : vector<16x512xf32>
    %55 = tpu.matmul %53, %54, %cst_41 {dimension_numbers = #tpu.dot_dimension_numbers<[1], [0], [0], [1], [0, 0, 1, 1], [], []>} : vector<16x4xbf16>, vector<4x512xbf16>, vector<16x512xf32> -> vector<16x512xf32>
    %56 = arith.addf %50, %55 : vector<16x512xf32>
    %c0_42 = arith.constant 0 : index
    %c129 = arith.constant 129 : index
    %57 = vector.load %arg19[%c0_42, %c129] : memref<4x768xf32, #tpu.memory_space<vmem>>, vector<4x512xf32>
    %c5 = arith.constant 5 : index
    %c0_43 = arith.constant 0 : index
    %58 = vector.load %arg2[%c5, %c0_43] : memref<9x512xf32, #tpu.memory_space<vmem>>, vector<1x512xf32>
    %59 = vector.broadcast %58 : vector<1x512xf32> to vector<4x512xf32>
    %60 = arith.mulf %57, %59 : vector<4x512xf32>
    %c5_44 = arith.constant 5 : index
    %c0_45 = arith.constant 0 : index
    %c0_46 = arith.constant 0 : index
    %61 = vector.load %arg8[%c5_44, %c0_45, %c0_46] : memref<9x16x4xbf16, #tpu.memory_space<vmem>>, vector<1x16x4xbf16>
    %62 = vector.shape_cast %61 : vector<1x16x4xbf16> to vector<16x4xbf16>
    %63 = arith.truncf %60 : vector<4x512xf32> to vector<4x512xbf16>
    %cst_47 = arith.constant dense<0.000000e+00> : vector<16x512xf32>
    %64 = tpu.matmul %62, %63, %cst_47 {dimension_numbers = #tpu.dot_dimension_numbers<[1], [0], [0], [1], [0, 0, 1, 1], [], []>} : vector<16x4xbf16>, vector<4x512xbf16>, vector<16x512xf32> -> vector<16x512xf32>
    %65 = arith.addf %56, %64 : vector<16x512xf32>
    %c0_48 = arith.constant 0 : index
    %c143 = arith.constant 143 : index
    %66 = vector.load %arg19[%c0_48, %c143] : memref<4x768xf32, #tpu.memory_space<vmem>>, vector<4x512xf32>
    %c6 = arith.constant 6 : index
    %c0_49 = arith.constant 0 : index
    %67 = vector.load %arg2[%c6, %c0_49] : memref<9x512xf32, #tpu.memory_space<vmem>>, vector<1x512xf32>
    %68 = vector.broadcast %67 : vector<1x512xf32> to vector<4x512xf32>
    %69 = arith.mulf %66, %68 : vector<4x512xf32>
    %c6_50 = arith.constant 6 : index
    %c0_51 = arith.constant 0 : index
    %c0_52 = arith.constant 0 : index
    %70 = vector.load %arg8[%c6_50, %c0_51, %c0_52] : memref<9x16x4xbf16, #tpu.memory_space<vmem>>, vector<1x16x4xbf16>
    %71 = vector.shape_cast %70 : vector<1x16x4xbf16> to vector<16x4xbf16>
    %72 = arith.truncf %69 : vector<4x512xf32> to vector<4x512xbf16>
    %cst_53 = arith.constant dense<0.000000e+00> : vector<16x512xf32>
    %73 = tpu.matmul %71, %72, %cst_53 {dimension_numbers = #tpu.dot_dimension_numbers<[1], [0], [0], [1], [0, 0, 1, 1], [], []>} : vector<16x4xbf16>, vector<4x512xbf16>, vector<16x512xf32> -> vector<16x512xf32>
    %74 = arith.addf %65, %73 : vector<16x512xf32>
    %c0_54 = arith.constant 0 : index
    %c144 = arith.constant 144 : index
    %75 = vector.load %arg19[%c0_54, %c144] : memref<4x768xf32, #tpu.memory_space<vmem>>, vector<4x512xf32>
    %c7 = arith.constant 7 : index
    %c0_55 = arith.constant 0 : index
    %76 = vector.load %arg2[%c7, %c0_55] : memref<9x512xf32, #tpu.memory_space<vmem>>, vector<1x512xf32>
    %77 = vector.broadcast %76 : vector<1x512xf32> to vector<4x512xf32>
    %78 = arith.mulf %75, %77 : vector<4x512xf32>
    %c7_56 = arith.constant 7 : index
    %c0_57 = arith.constant 0 : index
    %c0_58 = arith.constant 0 : index
    %79 = vector.load %arg8[%c7_56, %c0_57, %c0_58] : memref<9x16x4xbf16, #tpu.memory_space<vmem>>, vector<1x16x4xbf16>
    %80 = vector.shape_cast %79 : vector<1x16x4xbf16> to vector<16x4xbf16>
    %81 = arith.truncf %78 : vector<4x512xf32> to vector<4x512xbf16>
    %cst_59 = arith.constant dense<0.000000e+00> : vector<16x512xf32>
    %82 = tpu.matmul %80, %81, %cst_59 {dimension_numbers = #tpu.dot_dimension_numbers<[1], [0], [0], [1], [0, 0, 1, 1], [], []>} : vector<16x4xbf16>, vector<4x512xbf16>, vector<16x512xf32> -> vector<16x512xf32>
    %83 = arith.addf %74, %82 : vector<16x512xf32>
    %c0_60 = arith.constant 0 : index
    %c145 = arith.constant 145 : index
    %84 = vector.load %arg19[%c0_60, %c145] : memref<4x768xf32, #tpu.memory_space<vmem>>, vector<4x512xf32>
    %c8 = arith.constant 8 : index
    %c0_61 = arith.constant 0 : index
    %85 = vector.load %arg2[%c8, %c0_61] : memref<9x512xf32, #tpu.memory_space<vmem>>, vector<1x512xf32>
    %86 = vector.broadcast %85 : vector<1x512xf32> to vector<4x512xf32>
    %87 = arith.mulf %84, %86 : vector<4x512xf32>
    %c8_62 = arith.constant 8 : index
    %c0_63 = arith.constant 0 : index
    %c0_64 = arith.constant 0 : index
    %88 = vector.load %arg8[%c8_62, %c0_63, %c0_64] : memref<9x16x4xbf16, #tpu.memory_space<vmem>>, vector<1x16x4xbf16>
    %89 = vector.shape_cast %88 : vector<1x16x4xbf16> to vector<16x4xbf16>
    %90 = arith.truncf %87 : vector<4x512xf32> to vector<4x512xbf16>
    %cst_65 = arith.constant dense<0.000000e+00> : vector<16x512xf32>
    %91 = tpu.matmul %89, %90, %cst_65 {dimension_numbers = #tpu.dot_dimension_numbers<[1], [0], [0], [1], [0, 0, 1, 1], [], []>} : vector<16x4xbf16>, vector<4x512xbf16>, vector<16x512xf32> -> vector<16x512xf32>
    %92 = arith.addf %83, %91 : vector<16x512xf32>
    %93 = arith.truncf %92 : vector<16x512xf32> to vector<16x512xbf16>
    %c0_66 = arith.constant 0 : index
    %c0_67 = arith.constant 0 : index
    %94 = vector.load %arg4[%c0_66, %c0_67] : memref<512x128xbf16, #tpu.memory_space<vmem>>, vector<512x128xbf16>
    %cst_68 = arith.constant dense<0.000000e+00> : vector<16x128xf32>
    %95 = tpu.matmul %93, %94, %cst_68 {dimension_numbers = #tpu.dot_dimension_numbers<[1], [0], [0], [1], [0, 0, 1, 1], [], []>} : vector<16x512xbf16>, vector<512x128xbf16>, vector<16x128xf32> -> vector<16x128xf32>
    %96 = vector.extract_strided_slice %95 {offsets = [0, 0], sizes = [8, 128], strides = [1, 1]} : vector<16x128xf32> to vector<8x128xf32>
    %97 = vector.extract_strided_slice %95 {offsets = [8, 0], sizes = [8, 128], strides = [1, 1]} : vector<16x128xf32> to vector<8x128xf32>
    %c0_69 = arith.constant 0 : index
    %c0_70 = arith.constant 0 : index
    %98 = vector.load %arg9[%c0_69, %c0_70] : memref<8x1xf32, #tpu.memory_space<vmem>>, vector<8x1xf32>
    %99 = vector.broadcast %98 : vector<8x1xf32> to vector<8x128xf32>
    %100 = arith.mulf %96, %99 : vector<8x128xf32>
    %c0_71 = arith.constant 0 : index
    %c0_72 = arith.constant 0 : index
    %101 = vector.load %arg10[%c0_71, %c0_72] : memref<8x1xf32, #tpu.memory_space<vmem>>, vector<8x1xf32>
    %102 = vector.broadcast %101 : vector<8x1xf32> to vector<8x128xf32>
    %103 = arith.addf %100, %102 : vector<8x128xf32>
    %cst_73 = arith.constant 0.000000e+00 : f32
    %104 = vector.broadcast %cst_73 : f32 to vector<8x128xf32>
    %105 = arith.maximumf %103, %104 : vector<8x128xf32>
    %cst_74 = arith.constant 0.000000e+00 : f32
    %106 = vector.broadcast %cst_74 : f32 to vector<8x128xf32>
    %c0_75 = arith.constant 0 : index
    %c0_76 = arith.constant 0 : index
    %107 = vector.load %arg20[%c0_75, %c0_76] : memref<8x384xf32, #tpu.memory_space<vmem>>, vector<8x128xf32>
    tpu.vector_store %arg20[%c0_75, %c0_76], %106 {strides = array<i32>} : memref<8x384xf32, #tpu.memory_space<vmem>>, vector<8x128xf32>,
    %cst_77 = arith.constant 0.000000e+00 : f32
    %108 = vector.broadcast %cst_77 : f32 to vector<8x128xf32>
    %c0_78 = arith.constant 0 : index
    %c256 = arith.constant 256 : index
    %109 = vector.load %arg20[%c0_78, %c256] : memref<8x384xf32, #tpu.memory_space<vmem>>, vector<8x128xf32>
    tpu.vector_store %arg20[%c0_78, %c256], %108 {strides = array<i32>} : memref<8x384xf32, #tpu.memory_space<vmem>>, vector<8x128xf32>,
    %c0_79 = arith.constant 0 : index
    %c128_80 = arith.constant 128 : index
    %110 = vector.load %arg20[%c0_79, %c128_80] : memref<8x384xf32, #tpu.memory_space<vmem>>, vector<8x128xf32>
    tpu.vector_store %arg20[%c0_79, %c128_80], %105 {strides = array<i32>} : memref<8x384xf32, #tpu.memory_space<vmem>>, vector<8x128xf32>,
    %cst_81 = arith.constant 0.000000e+00 : f32
    %111 = vector.broadcast %cst_81 : f32 to vector<8x128xf32>
    %c0_82 = arith.constant 0 : index
    %c119 = arith.constant 119 : index
    %112 = vector.load %arg20[%c0_82, %c119] : memref<8x384xf32, #tpu.memory_space<vmem>>, vector<8x128xf32>
    %c0_83 = arith.constant 0 : index
    %c0_84 = arith.constant 0 : index
    %113 = vector.load %arg3[%c0_83, %c0_84] : memref<9x128xf32, #tpu.memory_space<vmem>>, vector<1x128xf32>
    %114 = vector.broadcast %113 : vector<1x128xf32> to vector<8x128xf32>
    %115 = arith.mulf %112, %114 : vector<8x128xf32>
    %c0_85 = arith.constant 0 : index
    %c0_86 = arith.constant 0 : index
    %c0_87 = arith.constant 0 : index
    %116 = vector.load %arg11[%c0_85, %c0_86, %c0_87] : memref<9x8x8xbf16, #tpu.memory_space<vmem>>, vector<1x8x8xbf16>
    %117 = vector.shape_cast %116 : vector<1x8x8xbf16> to vector<8x8xbf16>
    %118 = arith.truncf %115 : vector<8x128xf32> to vector<8x128xbf16>
    %cst_88 = arith.constant dense<0.000000e+00> : vector<8x128xf32>
    %119 = tpu.matmul %117, %118, %cst_88 {dimension_numbers = #tpu.dot_dimension_numbers<[1], [0], [0], [1], [0, 0, 1, 1], [], []>} : vector<8x8xbf16>, vector<8x128xbf16>, vector<8x128xf32> -> vector<8x128xf32>
    %120 = arith.addf %111, %119 : vector<8x128xf32>
    %c0_89 = arith.constant 0 : index
    %c120 = arith.constant 120 : index
    %121 = vector.load %arg20[%c0_89, %c120] : memref<8x384xf32, #tpu.memory_space<vmem>>, vector<8x128xf32>
    %c1_90 = arith.constant 1 : index
    %c0_91 = arith.constant 0 : index
    %122 = vector.load %arg3[%c1_90, %c0_91] : memref<9x128xf32, #tpu.memory_space<vmem>>, vector<1x128xf32>
    %123 = vector.broadcast %122 : vector<1x128xf32> to vector<8x128xf32>
    %124 = arith.mulf %121, %123 : vector<8x128xf32>
    %c1_92 = arith.constant 1 : index
    %c0_93 = arith.constant 0 : index
    %c0_94 = arith.constant 0 : index
    %125 = vector.load %arg11[%c1_92, %c0_93, %c0_94] : memref<9x8x8xbf16, #tpu.memory_space<vmem>>, vector<1x8x8xbf16>
    %126 = vector.shape_cast %125 : vector<1x8x8xbf16> to vector<8x8xbf16>
    %127 = arith.truncf %124 : vector<8x128xf32> to vector<8x128xbf16>
    %cst_95 = arith.constant dense<0.000000e+00> : vector<8x128xf32>
    %128 = tpu.matmul %126, %127, %cst_95 {dimension_numbers = #tpu.dot_dimension_numbers<[1], [0], [0], [1], [0, 0, 1, 1], [], []>} : vector<8x8xbf16>, vector<8x128xbf16>, vector<8x128xf32> -> vector<8x128xf32>
    %129 = arith.addf %120, %128 : vector<8x128xf32>
    %c0_96 = arith.constant 0 : index
    %c121 = arith.constant 121 : index
    %130 = vector.load %arg20[%c0_96, %c121] : memref<8x384xf32, #tpu.memory_space<vmem>>, vector<8x128xf32>
    %c2_97 = arith.constant 2 : index
    %c0_98 = arith.constant 0 : index
    %131 = vector.load %arg3[%c2_97, %c0_98] : memref<9x128xf32, #tpu.memory_space<vmem>>, vector<1x128xf32>
    %132 = vector.broadcast %131 : vector<1x128xf32> to vector<8x128xf32>
    %133 = arith.mulf %130, %132 : vector<8x128xf32>
    %c2_99 = arith.constant 2 : index
    %c0_100 = arith.constant 0 : index
    %c0_101 = arith.constant 0 : index
    %134 = vector.load %arg11[%c2_99, %c0_100, %c0_101] : memref<9x8x8xbf16, #tpu.memory_space<vmem>>, vector<1x8x8xbf16>
    %135 = vector.shape_cast %134 : vector<1x8x8xbf16> to vector<8x8xbf16>
    %136 = arith.truncf %133 : vector<8x128xf32> to vector<8x128xbf16>
    %cst_102 = arith.constant dense<0.000000e+00> : vector<8x128xf32>
    %137 = tpu.matmul %135, %136, %cst_102 {dimension_numbers = #tpu.dot_dimension_numbers<[1], [0], [0], [1], [0, 0, 1, 1], [], []>} : vector<8x8xbf16>, vector<8x128xbf16>, vector<8x128xf32> -> vector<8x128xf32>
    %138 = arith.addf %129, %137 : vector<8x128xf32>
    %c0_103 = arith.constant 0 : index
    %c127_104 = arith.constant 127 : index
    %139 = vector.load %arg20[%c0_103, %c127_104] : memref<8x384xf32, #tpu.memory_space<vmem>>, vector<8x128xf32>
    %c3_105 = arith.constant 3 : index
    %c0_106 = arith.constant 0 : index
    %140 = vector.load %arg3[%c3_105, %c0_106] : memref<9x128xf32, #tpu.memory_space<vmem>>, vector<1x128xf32>
    %141 = vector.broadcast %140 : vector<1x128xf32> to vector<8x128xf32>
    %142 = arith.mulf %139, %141 : vector<8x128xf32>
    %c3_107 = arith.constant 3 : index
    %c0_108 = arith.constant 0 : index
    %c0_109 = arith.constant 0 : index
    %143 = vector.load %arg11[%c3_107, %c0_108, %c0_109] : memref<9x8x8xbf16, #tpu.memory_space<vmem>>, vector<1x8x8xbf16>
    %144 = vector.shape_cast %143 : vector<1x8x8xbf16> to vector<8x8xbf16>
    %145 = arith.truncf %142 : vector<8x128xf32> to vector<8x128xbf16>
    %cst_110 = arith.constant dense<0.000000e+00> : vector<8x128xf32>
    %146 = tpu.matmul %144, %145, %cst_110 {dimension_numbers = #tpu.dot_dimension_numbers<[1], [0], [0], [1], [0, 0, 1, 1], [], []>} : vector<8x8xbf16>, vector<8x128xbf16>, vector<8x128xf32> -> vector<8x128xf32>
    %147 = arith.addf %138, %146 : vector<8x128xf32>
    %c0_111 = arith.constant 0 : index
    %c128_112 = arith.constant 128 : index
    %148 = vector.load %arg20[%c0_111, %c128_112] : memref<8x384xf32, #tpu.memory_space<vmem>>, vector<8x128xf32>
    %c4_113 = arith.constant 4 : index
    %c0_114 = arith.constant 0 : index
    %c0_115 = arith.constant 0 : index
    %149 = vector.load %arg11[%c4_113, %c0_114, %c0_115] : memref<9x8x8xbf16, #tpu.memory_space<vmem>>, vector<1x8x8xbf16>
    %150 = vector.shape_cast %149 : vector<1x8x8xbf16> to vector<8x8xbf16>
    %151 = arith.truncf %148 : vector<8x128xf32> to vector<8x128xbf16>
    %cst_116 = arith.constant dense<0.000000e+00> : vector<8x128xf32>
    %152 = tpu.matmul %150, %151, %cst_116 {dimension_numbers = #tpu.dot_dimension_numbers<[1], [0], [0], [1], [0, 0, 1, 1], [], []>} : vector<8x8xbf16>, vector<8x128xbf16>, vector<8x128xf32> -> vector<8x128xf32>
    %153 = arith.addf %147, %152 : vector<8x128xf32>
    %c0_117 = arith.constant 0 : index
    %c129_118 = arith.constant 129 : index
    %154 = vector.load %arg20[%c0_117, %c129_118] : memref<8x384xf32, #tpu.memory_space<vmem>>, vector<8x128xf32>
    %c5_119 = arith.constant 5 : index
    %c0_120 = arith.constant 0 : index
    %155 = vector.load %arg3[%c5_119, %c0_120] : memref<9x128xf32, #tpu.memory_space<vmem>>, vector<1x128xf32>
    %156 = vector.broadcast %155 : vector<1x128xf32> to vector<8x128xf32>
    %157 = arith.mulf %154, %156 : vector<8x128xf32>
    %c5_121 = arith.constant 5 : index
    %c0_122 = arith.constant 0 : index
    %c0_123 = arith.constant 0 : index
    %158 = vector.load %arg11[%c5_121, %c0_122, %c0_123] : memref<9x8x8xbf16, #tpu.memory_space<vmem>>, vector<1x8x8xbf16>
    %159 = vector.shape_cast %158 : vector<1x8x8xbf16> to vector<8x8xbf16>
    %160 = arith.truncf %157 : vector<8x128xf32> to vector<8x128xbf16>
    %cst_124 = arith.constant dense<0.000000e+00> : vector<8x128xf32>
    %161 = tpu.matmul %159, %160, %cst_124 {dimension_numbers = #tpu.dot_dimension_numbers<[1], [0], [0], [1], [0, 0, 1, 1], [], []>} : vector<8x8xbf16>, vector<8x128xbf16>, vector<8x128xf32> -> vector<8x128xf32>
    %162 = arith.addf %153, %161 : vector<8x128xf32>
    %c0_125 = arith.constant 0 : index
    %c135 = arith.constant 135 : index
    %163 = vector.load %arg20[%c0_125, %c135] : memref<8x384xf32, #tpu.memory_space<vmem>>, vector<8x128xf32>
    %c6_126 = arith.constant 6 : index
    %c0_127 = arith.constant 0 : index
    %164 = vector.load %arg3[%c6_126, %c0_127] : memref<9x128xf32, #tpu.memory_space<vmem>>, vector<1x128xf32>
    %165 = vector.broadcast %164 : vector<1x128xf32> to vector<8x128xf32>
    %166 = arith.mulf %163, %165 : vector<8x128xf32>
    %c6_128 = arith.constant 6 : index
    %c0_129 = arith.constant 0 : index
    %c0_130 = arith.constant 0 : index
    %167 = vector.load %arg11[%c6_128, %c0_129, %c0_130] : memref<9x8x8xbf16, #tpu.memory_space<vmem>>, vector<1x8x8xbf16>
    %168 = vector.shape_cast %167 : vector<1x8x8xbf16> to vector<8x8xbf16>
    %169 = arith.truncf %166 : vector<8x128xf32> to vector<8x128xbf16>
    %cst_131 = arith.constant dense<0.000000e+00> : vector<8x128xf32>
    %170 = tpu.matmul %168, %169, %cst_131 {dimension_numbers = #tpu.dot_dimension_numbers<[1], [0], [0], [1], [0, 0, 1, 1], [], []>} : vector<8x8xbf16>, vector<8x128xbf16>, vector<8x128xf32> -> vector<8x128xf32>
    %171 = arith.addf %162, %170 : vector<8x128xf32>
    %c0_132 = arith.constant 0 : index
    %c136 = arith.constant 136 : index
    %172 = vector.load %arg20[%c0_132, %c136] : memref<8x384xf32, #tpu.memory_space<vmem>>, vector<8x128xf32>
    %c7_133 = arith.constant 7 : index
    %c0_134 = arith.constant 0 : index
    %173 = vector.load %arg3[%c7_133, %c0_134] : memref<9x128xf32, #tpu.memory_space<vmem>>, vector<1x128xf32>
    %174 = vector.broadcast %173 : vector<1x128xf32> to vector<8x128xf32>
    %175 = arith.mulf %172, %174 : vector<8x128xf32>
    %c7_135 = arith.constant 7 : index
    %c0_136 = arith.constant 0 : index
    %c0_137 = arith.constant 0 : index
    %176 = vector.load %arg11[%c7_135, %c0_136, %c0_137] : memref<9x8x8xbf16, #tpu.memory_space<vmem>>, vector<1x8x8xbf16>
    %177 = vector.shape_cast %176 : vector<1x8x8xbf16> to vector<8x8xbf16>
    %178 = arith.truncf %175 : vector<8x128xf32> to vector<8x128xbf16>
    %cst_138 = arith.constant dense<0.000000e+00> : vector<8x128xf32>
    %179 = tpu.matmul %177, %178, %cst_138 {dimension_numbers = #tpu.dot_dimension_numbers<[1], [0], [0], [1], [0, 0, 1, 1], [], []>} : vector<8x8xbf16>, vector<8x128xbf16>, vector<8x128xf32> -> vector<8x128xf32>
    %180 = arith.addf %171, %179 : vector<8x128xf32>
    %c0_139 = arith.constant 0 : index
    %c137 = arith.constant 137 : index
    %181 = vector.load %arg20[%c0_139, %c137] : memref<8x384xf32, #tpu.memory_space<vmem>>, vector<8x128xf32>
    %c8_140 = arith.constant 8 : index
    %c0_141 = arith.constant 0 : index
    %182 = vector.load %arg3[%c8_140, %c0_141] : memref<9x128xf32, #tpu.memory_space<vmem>>, vector<1x128xf32>
    %183 = vector.broadcast %182 : vector<1x128xf32> to vector<8x128xf32>
    %184 = arith.mulf %181, %183 : vector<8x128xf32>
    %c8_142 = arith.constant 8 : index
    %c0_143 = arith.constant 0 : index
    %c0_144 = arith.constant 0 : index
    %185 = vector.load %arg11[%c8_142, %c0_143, %c0_144] : memref<9x8x8xbf16, #tpu.memory_space<vmem>>, vector<1x8x8xbf16>
    %186 = vector.shape_cast %185 : vector<1x8x8xbf16> to vector<8x8xbf16>
    %187 = arith.truncf %184 : vector<8x128xf32> to vector<8x128xbf16>
    %cst_145 = arith.constant dense<0.000000e+00> : vector<8x128xf32>
    %188 = tpu.matmul %186, %187, %cst_145 {dimension_numbers = #tpu.dot_dimension_numbers<[1], [0], [0], [1], [0, 0, 1, 1], [], []>} : vector<8x8xbf16>, vector<8x128xbf16>, vector<8x128xf32> -> vector<8x128xf32>
    %189 = arith.addf %180, %188 : vector<8x128xf32>
    %c0_146 = arith.constant 0 : index
    %c0_147 = arith.constant 0 : index
    %190 = vector.load %arg5[%c0_146, %c0_147] : memref<128x128xf32, #tpu.memory_space<vmem>>, vector<128x128xf32>
    %cst_148 = arith.constant dense<0.000000e+00> : vector<8x128xf32>
    %191 = tpu.matmul %189, %190, %cst_148 {dimension_numbers = #tpu.dot_dimension_numbers<[1], [0], [0], [1], [0, 0, 1, 1], [], []>} : vector<8x128xf32>, vector<128x128xf32>, vector<8x128xf32> -> vector<8x128xf32>
    %cst_149 = arith.constant 0.000000e+00 : f32
    %192 = vector.broadcast %cst_149 : f32 to vector<8x128xf32>
    %193 = arith.subf %192, %191 : vector<8x128xf32>
    %194 = math.exp %193 : vector<8x128xf32>
    %cst_150 = arith.constant 1.000000e+00 : f32
    %195 = vector.broadcast %cst_150 : f32 to vector<8x128xf32>
    %196 = arith.addf %195, %194 : vector<8x128xf32>
    %197 = tpu.reciprocal %196 {approx = true} : vector<8x128xf32> -> vector<8x128xf32>
    %198 = arith.mulf %189, %197 : vector<8x128xf32>
    %199 = arith.addf %97, %198 : vector<8x128xf32>
    %c0_151 = arith.constant 0 : index
    %c0_152 = arith.constant 0 : index
    %200 = vector.load %arg12[%c0_151, %c0_152] : memref<8x1xf32, #tpu.memory_space<vmem>>, vector<8x1xf32>
    %201 = vector.broadcast %200 : vector<8x1xf32> to vector<8x128xf32>
    %202 = arith.mulf %199, %201 : vector<8x128xf32>
    %c0_153 = arith.constant 0 : index
    %c0_154 = arith.constant 0 : index
    %203 = vector.load %arg13[%c0_153, %c0_154] : memref<8x1xf32, #tpu.memory_space<vmem>>, vector<8x1xf32>
    %204 = vector.broadcast %203 : vector<8x1xf32> to vector<8x128xf32>
    %205 = arith.addf %202, %204 : vector<8x128xf32>
    %cst_155 = arith.constant 0.000000e+00 : f32
    %206 = vector.broadcast %cst_155 : f32 to vector<8x128xf32>
    %207 = arith.maximumf %205, %206 : vector<8x128xf32>
    %cst_156 = arith.constant 0.000000e+00 : f32
    %208 = vector.broadcast %cst_156 : f32 to vector<8x128xf32>
    %c0_157 = arith.constant 0 : index
    %c0_158 = arith.constant 0 : index
    %209 = vector.load %arg20[%c0_157, %c0_158] : memref<8x384xf32, #tpu.memory_space<vmem>>, vector<8x128xf32>
    tpu.vector_store %arg20[%c0_157, %c0_158], %208 {strides = array<i32>} : memref<8x384xf32, #tpu.memory_space<vmem>>, vector<8x128xf32>,
    %cst_159 = arith.constant 0.000000e+00 : f32
    %210 = vector.broadcast %cst_159 : f32 to vector<8x128xf32>
    %c0_160 = arith.constant 0 : index
    %c256_161 = arith.constant 256 : index
    %211 = vector.load %arg20[%c0_160, %c256_161] : memref<8x384xf32, #tpu.memory_space<vmem>>, vector<8x128xf32>
    tpu.vector_store %arg20[%c0_160, %c256_161], %210 {strides = array<i32>} : memref<8x384xf32, #tpu.memory_space<vmem>>, vector<8x128xf32>,
    %c0_162 = arith.constant 0 : index
    %c128_163 = arith.constant 128 : index
    %212 = vector.load %arg20[%c0_162, %c128_163] : memref<8x384xf32, #tpu.memory_space<vmem>>, vector<8x128xf32>
    tpu.vector_store %arg20[%c0_162, %c128_163], %207 {strides = array<i32>} : memref<8x384xf32, #tpu.memory_space<vmem>>, vector<8x128xf32>,
    %cst_164 = arith.constant 0.000000e+00 : f32
    %213 = vector.broadcast %cst_164 : f32 to vector<8x128xf32>
    %c0_165 = arith.constant 0 : index
    %c119_166 = arith.constant 119 : index
    %214 = vector.load %arg20[%c0_165, %c119_166] : memref<8x384xf32, #tpu.memory_space<vmem>>, vector<8x128xf32>
    %c0_167 = arith.constant 0 : index
    %c0_168 = arith.constant 0 : index
    %215 = vector.load %arg3[%c0_167, %c0_168] : memref<9x128xf32, #tpu.memory_space<vmem>>, vector<1x128xf32>
    %216 = vector.broadcast %215 : vector<1x128xf32> to vector<8x128xf32>
    %217 = arith.mulf %214, %216 : vector<8x128xf32>
    %c0_169 = arith.constant 0 : index
    %c0_170 = arith.constant 0 : index
    %c0_171 = arith.constant 0 : index
    %218 = vector.load %arg14[%c0_169, %c0_170, %c0_171] : memref<9x8x8xbf16, #tpu.memory_space<vmem>>, vector<1x8x8xbf16>
    %219 = vector.shape_cast %218 : vector<1x8x8xbf16> to vector<8x8xbf16>
    %220 = arith.truncf %217 : vector<8x128xf32> to vector<8x128xbf16>
    %cst_172 = arith.constant dense<0.000000e+00> : vector<8x128xf32>
    %221 = tpu.matmul %219, %220, %cst_172 {dimension_numbers = #tpu.dot_dimension_numbers<[1], [0], [0], [1], [0, 0, 1, 1], [], []>} : vector<8x8xbf16>, vector<8x128xbf16>, vector<8x128xf32> -> vector<8x128xf32>
    %222 = arith.addf %213, %221 : vector<8x128xf32>
    %c0_173 = arith.constant 0 : index
    %c120_174 = arith.constant 120 : index
    %223 = vector.load %arg20[%c0_173, %c120_174] : memref<8x384xf32, #tpu.memory_space<vmem>>, vector<8x128xf32>
    %c1_175 = arith.constant 1 : index
    %c0_176 = arith.constant 0 : index
    %224 = vector.load %arg3[%c1_175, %c0_176] : memref<9x128xf32, #tpu.memory_space<vmem>>, vector<1x128xf32>
    %225 = vector.broadcast %224 : vector<1x128xf32> to vector<8x128xf32>
    %226 = arith.mulf %223, %225 : vector<8x128xf32>
    %c1_177 = arith.constant 1 : index
    %c0_178 = arith.constant 0 : index
    %c0_179 = arith.constant 0 : index
    %227 = vector.load %arg14[%c1_177, %c0_178, %c0_179] : memref<9x8x8xbf16, #tpu.memory_space<vmem>>, vector<1x8x8xbf16>
    %228 = vector.shape_cast %227 : vector<1x8x8xbf16> to vector<8x8xbf16>
    %229 = arith.truncf %226 : vector<8x128xf32> to vector<8x128xbf16>
    %cst_180 = arith.constant dense<0.000000e+00> : vector<8x128xf32>
    %230 = tpu.matmul %228, %229, %cst_180 {dimension_numbers = #tpu.dot_dimension_numbers<[1], [0], [0], [1], [0, 0, 1, 1], [], []>} : vector<8x8xbf16>, vector<8x128xbf16>, vector<8x128xf32> -> vector<8x128xf32>
    %231 = arith.addf %222, %230 : vector<8x128xf32>
    %c0_181 = arith.constant 0 : index
    %c121_182 = arith.constant 121 : index
    %232 = vector.load %arg20[%c0_181, %c121_182] : memref<8x384xf32, #tpu.memory_space<vmem>>, vector<8x128xf32>
    %c2_183 = arith.constant 2 : index
    %c0_184 = arith.constant 0 : index
    %233 = vector.load %arg3[%c2_183, %c0_184] : memref<9x128xf32, #tpu.memory_space<vmem>>, vector<1x128xf32>
    %234 = vector.broadcast %233 : vector<1x128xf32> to vector<8x128xf32>
    %235 = arith.mulf %232, %234 : vector<8x128xf32>
    %c2_185 = arith.constant 2 : index
    %c0_186 = arith.constant 0 : index
    %c0_187 = arith.constant 0 : index
    %236 = vector.load %arg14[%c2_185, %c0_186, %c0_187] : memref<9x8x8xbf16, #tpu.memory_space<vmem>>, vector<1x8x8xbf16>
    %237 = vector.shape_cast %236 : vector<1x8x8xbf16> to vector<8x8xbf16>
    %238 = arith.truncf %235 : vector<8x128xf32> to vector<8x128xbf16>
    %cst_188 = arith.constant dense<0.000000e+00> : vector<8x128xf32>
    %239 = tpu.matmul %237, %238, %cst_188 {dimension_numbers = #tpu.dot_dimension_numbers<[1], [0], [0], [1], [0, 0, 1, 1], [], []>} : vector<8x8xbf16>, vector<8x128xbf16>, vector<8x128xf32> -> vector<8x128xf32>
    %240 = arith.addf %231, %239 : vector<8x128xf32>
    %c0_189 = arith.constant 0 : index
    %c127_190 = arith.constant 127 : index
    %241 = vector.load %arg20[%c0_189, %c127_190] : memref<8x384xf32, #tpu.memory_space<vmem>>, vector<8x128xf32>
    %c3_191 = arith.constant 3 : index
    %c0_192 = arith.constant 0 : index
    %242 = vector.load %arg3[%c3_191, %c0_192] : memref<9x128xf32, #tpu.memory_space<vmem>>, vector<1x128xf32>
    %243 = vector.broadcast %242 : vector<1x128xf32> to vector<8x128xf32>
    %244 = arith.mulf %241, %243 : vector<8x128xf32>
    %c3_193 = arith.constant 3 : index
    %c0_194 = arith.constant 0 : index
    %c0_195 = arith.constant 0 : index
    %245 = vector.load %arg14[%c3_193, %c0_194, %c0_195] : memref<9x8x8xbf16, #tpu.memory_space<vmem>>, vector<1x8x8xbf16>
    %246 = vector.shape_cast %245 : vector<1x8x8xbf16> to vector<8x8xbf16>
    %247 = arith.truncf %244 : vector<8x128xf32> to vector<8x128xbf16>
    %cst_196 = arith.constant dense<0.000000e+00> : vector<8x128xf32>
    %248 = tpu.matmul %246, %247, %cst_196 {dimension_numbers = #tpu.dot_dimension_numbers<[1], [0], [0], [1], [0, 0, 1, 1], [], []>} : vector<8x8xbf16>, vector<8x128xbf16>, vector<8x128xf32> -> vector<8x128xf32>
    %249 = arith.addf %240, %248 : vector<8x128xf32>
    %c0_197 = arith.constant 0 : index
    %c128_198 = arith.constant 128 : index
    %250 = vector.load %arg20[%c0_197, %c128_198] : memref<8x384xf32, #tpu.memory_space<vmem>>, vector<8x128xf32>
    %c4_199 = arith.constant 4 : index
    %c0_200 = arith.constant 0 : index
    %c0_201 = arith.constant 0 : index
    %251 = vector.load %arg14[%c4_199, %c0_200, %c0_201] : memref<9x8x8xbf16, #tpu.memory_space<vmem>>, vector<1x8x8xbf16>
    %252 = vector.shape_cast %251 : vector<1x8x8xbf16> to vector<8x8xbf16>
    %253 = arith.truncf %250 : vector<8x128xf32> to vector<8x128xbf16>
    %cst_202 = arith.constant dense<0.000000e+00> : vector<8x128xf32>
    %254 = tpu.matmul %252, %253, %cst_202 {dimension_numbers = #tpu.dot_dimension_numbers<[1], [0], [0], [1], [0, 0, 1, 1], [], []>} : vector<8x8xbf16>, vector<8x128xbf16>, vector<8x128xf32> -> vector<8x128xf32>
    %255 = arith.addf %249, %254 : vector<8x128xf32>
    %c0_203 = arith.constant 0 : index
    %c129_204 = arith.constant 129 : index
    %256 = vector.load %arg20[%c0_203, %c129_204] : memref<8x384xf32, #tpu.memory_space<vmem>>, vector<8x128xf32>
    %c5_205 = arith.constant 5 : index
    %c0_206 = arith.constant 0 : index
    %257 = vector.load %arg3[%c5_205, %c0_206] : memref<9x128xf32, #tpu.memory_space<vmem>>, vector<1x128xf32>
    %258 = vector.broadcast %257 : vector<1x128xf32> to vector<8x128xf32>
    %259 = arith.mulf %256, %258 : vector<8x128xf32>
    %c5_207 = arith.constant 5 : index
    %c0_208 = arith.constant 0 : index
    %c0_209 = arith.constant 0 : index
    %260 = vector.load %arg14[%c5_207, %c0_208, %c0_209] : memref<9x8x8xbf16, #tpu.memory_space<vmem>>, vector<1x8x8xbf16>
    %261 = vector.shape_cast %260 : vector<1x8x8xbf16> to vector<8x8xbf16>
    %262 = arith.truncf %259 : vector<8x128xf32> to vector<8x128xbf16>
    %cst_210 = arith.constant dense<0.000000e+00> : vector<8x128xf32>
    %263 = tpu.matmul %261, %262, %cst_210 {dimension_numbers = #tpu.dot_dimension_numbers<[1], [0], [0], [1], [0, 0, 1, 1], [], []>} : vector<8x8xbf16>, vector<8x128xbf16>, vector<8x128xf32> -> vector<8x128xf32>
    %264 = arith.addf %255, %263 : vector<8x128xf32>
    %c0_211 = arith.constant 0 : index
    %c135_212 = arith.constant 135 : index
    %265 = vector.load %arg20[%c0_211, %c135_212] : memref<8x384xf32, #tpu.memory_space<vmem>>, vector<8x128xf32>
    %c6_213 = arith.constant 6 : index
    %c0_214 = arith.constant 0 : index
    %266 = vector.load %arg3[%c6_213, %c0_214] : memref<9x128xf32, #tpu.memory_space<vmem>>, vector<1x128xf32>
    %267 = vector.broadcast %266 : vector<1x128xf32> to vector<8x128xf32>
    %268 = arith.mulf %265, %267 : vector<8x128xf32>
    %c6_215 = arith.constant 6 : index
    %c0_216 = arith.constant 0 : index
    %c0_217 = arith.constant 0 : index
    %269 = vector.load %arg14[%c6_215, %c0_216, %c0_217] : memref<9x8x8xbf16, #tpu.memory_space<vmem>>, vector<1x8x8xbf16>
    %270 = vector.shape_cast %269 : vector<1x8x8xbf16> to vector<8x8xbf16>
    %271 = arith.truncf %268 : vector<8x128xf32> to vector<8x128xbf16>
    %cst_218 = arith.constant dense<0.000000e+00> : vector<8x128xf32>
    %272 = tpu.matmul %270, %271, %cst_218 {dimension_numbers = #tpu.dot_dimension_numbers<[1], [0], [0], [1], [0, 0, 1, 1], [], []>} : vector<8x8xbf16>, vector<8x128xbf16>, vector<8x128xf32> -> vector<8x128xf32>
    %273 = arith.addf %264, %272 : vector<8x128xf32>
    %c0_219 = arith.constant 0 : index
    %c136_220 = arith.constant 136 : index
    %274 = vector.load %arg20[%c0_219, %c136_220] : memref<8x384xf32, #tpu.memory_space<vmem>>, vector<8x128xf32>
    %c7_221 = arith.constant 7 : index
    %c0_222 = arith.constant 0 : index
    %275 = vector.load %arg3[%c7_221, %c0_222] : memref<9x128xf32, #tpu.memory_space<vmem>>, vector<1x128xf32>
    %276 = vector.broadcast %275 : vector<1x128xf32> to vector<8x128xf32>
    %277 = arith.mulf %274, %276 : vector<8x128xf32>
    %c7_223 = arith.constant 7 : index
    %c0_224 = arith.constant 0 : index
    %c0_225 = arith.constant 0 : index
    %278 = vector.load %arg14[%c7_223, %c0_224, %c0_225] : memref<9x8x8xbf16, #tpu.memory_space<vmem>>, vector<1x8x8xbf16>
    %279 = vector.shape_cast %278 : vector<1x8x8xbf16> to vector<8x8xbf16>
    %280 = arith.truncf %277 : vector<8x128xf32> to vector<8x128xbf16>
    %cst_226 = arith.constant dense<0.000000e+00> : vector<8x128xf32>
    %281 = tpu.matmul %279, %280, %cst_226 {dimension_numbers = #tpu.dot_dimension_numbers<[1], [0], [0], [1], [0, 0, 1, 1], [], []>} : vector<8x8xbf16>, vector<8x128xbf16>, vector<8x128xf32> -> vector<8x128xf32>
    %282 = arith.addf %273, %281 : vector<8x128xf32>
    %c0_227 = arith.constant 0 : index
    %c137_228 = arith.constant 137 : index
    %283 = vector.load %arg20[%c0_227, %c137_228] : memref<8x384xf32, #tpu.memory_space<vmem>>, vector<8x128xf32>
    %c8_229 = arith.constant 8 : index
    %c0_230 = arith.constant 0 : index
    %284 = vector.load %arg3[%c8_229, %c0_230] : memref<9x128xf32, #tpu.memory_space<vmem>>, vector<1x128xf32>
    %285 = vector.broadcast %284 : vector<1x128xf32> to vector<8x128xf32>
    %286 = arith.mulf %283, %285 : vector<8x128xf32>
    %c8_231 = arith.constant 8 : index
    %c0_232 = arith.constant 0 : index
    %c0_233 = arith.constant 0 : index
    %287 = vector.load %arg14[%c8_231, %c0_232, %c0_233] : memref<9x8x8xbf16, #tpu.memory_space<vmem>>, vector<1x8x8xbf16>
    %288 = vector.shape_cast %287 : vector<1x8x8xbf16> to vector<8x8xbf16>
    %289 = arith.truncf %286 : vector<8x128xf32> to vector<8x128xbf16>
    %cst_234 = arith.constant dense<0.000000e+00> : vector<8x128xf32>
    %290 = tpu.matmul %288, %289, %cst_234 {dimension_numbers = #tpu.dot_dimension_numbers<[1], [0], [0], [1], [0, 0, 1, 1], [], []>} : vector<8x8xbf16>, vector<8x128xbf16>, vector<8x128xf32> -> vector<8x128xf32>
    %291 = arith.addf %282, %290 : vector<8x128xf32>
    %c0_235 = arith.constant 0 : index
    %c0_236 = arith.constant 0 : index
    %292 = vector.load %arg15[%c0_235, %c0_236] : memref<8x1xf32, #tpu.memory_space<vmem>>, vector<8x1xf32>
    %293 = vector.broadcast %292 : vector<8x1xf32> to vector<8x128xf32>
    %294 = arith.mulf %291, %293 : vector<8x128xf32>
    %c0_237 = arith.constant 0 : index
    %c0_238 = arith.constant 0 : index
    %295 = vector.load %arg16[%c0_237, %c0_238] : memref<8x1xf32, #tpu.memory_space<vmem>>, vector<8x1xf32>
    %296 = vector.broadcast %295 : vector<8x1xf32> to vector<8x128xf32>
    %297 = arith.addf %294, %296 : vector<8x128xf32>
    %cst_239 = arith.constant 0.000000e+00 : f32
    %298 = vector.broadcast %cst_239 : f32 to vector<8x128xf32>
    %299 = arith.maximumf %297, %298 : vector<8x128xf32>
    %cst_240 = arith.constant 0.000000e+00 : f32
    %300 = vector.broadcast %cst_240 : f32 to vector<8x128xf32>
    %c0_241 = arith.constant 0 : index
    %c0_242 = arith.constant 0 : index
    %301 = vector.load %arg20[%c0_241, %c0_242] : memref<8x384xf32, #tpu.memory_space<vmem>>, vector<8x128xf32>
    tpu.vector_store %arg20[%c0_241, %c0_242], %300 {strides = array<i32>} : memref<8x384xf32, #tpu.memory_space<vmem>>, vector<8x128xf32>,
    %cst_243 = arith.constant 0.000000e+00 : f32
    %302 = vector.broadcast %cst_243 : f32 to vector<8x128xf32>
    %c0_244 = arith.constant 0 : index
    %c256_245 = arith.constant 256 : index
    %303 = vector.load %arg20[%c0_244, %c256_245] : memref<8x384xf32, #tpu.memory_space<vmem>>, vector<8x128xf32>
    tpu.vector_store %arg20[%c0_244, %c256_245], %302 {strides = array<i32>} : memref<8x384xf32, #tpu.memory_space<vmem>>, vector<8x128xf32>,
    %c0_246 = arith.constant 0 : index
    %c128_247 = arith.constant 128 : index
    %304 = vector.load %arg20[%c0_246, %c128_247] : memref<8x384xf32, #tpu.memory_space<vmem>>, vector<8x128xf32>
    tpu.vector_store %arg20[%c0_246, %c128_247], %299 {strides = array<i32>} : memref<8x384xf32, #tpu.memory_space<vmem>>, vector<8x128xf32>,
    %cst_248 = arith.constant 0.000000e+00 : f32
    %305 = vector.broadcast %cst_248 : f32 to vector<8x128xf32>
    %c0_249 = arith.constant 0 : index
    %c119_250 = arith.constant 119 : index
    %306 = vector.load %arg20[%c0_249, %c119_250] : memref<8x384xf32, #tpu.memory_space<vmem>>, vector<8x128xf32>
    %c0_251 = arith.constant 0 : index
    %c0_252 = arith.constant 0 : index
    %307 = vector.load %arg3[%c0_251, %c0_252] : memref<9x128xf32, #tpu.memory_space<vmem>>, vector<1x128xf32>
    %308 = vector.broadcast %307 : vector<1x128xf32> to vector<8x128xf32>
    %309 = arith.mulf %306, %308 : vector<8x128xf32>
    %c0_253 = arith.constant 0 : index
    %c0_254 = arith.constant 0 : index
    %c0_255 = arith.constant 0 : index
    %310 = vector.load %arg17[%c0_253, %c0_254, %c0_255] : memref<9x8x8xbf16, #tpu.memory_space<vmem>>, vector<1x8x8xbf16>
    %311 = vector.shape_cast %310 : vector<1x8x8xbf16> to vector<8x8xbf16>
    %312 = arith.truncf %309 : vector<8x128xf32> to vector<8x128xbf16>
    %cst_256 = arith.constant dense<0.000000e+00> : vector<8x128xf32>
    %313 = tpu.matmul %311, %312, %cst_256 {dimension_numbers = #tpu.dot_dimension_numbers<[1], [0], [0], [1], [0, 0, 1, 1], [], []>} : vector<8x8xbf16>, vector<8x128xbf16>, vector<8x128xf32> -> vector<8x128xf32>
    %314 = arith.addf %305, %313 : vector<8x128xf32>
    %c0_257 = arith.constant 0 : index
    %c120_258 = arith.constant 120 : index
    %315 = vector.load %arg20[%c0_257, %c120_258] : memref<8x384xf32, #tpu.memory_space<vmem>>, vector<8x128xf32>
    %c1_259 = arith.constant 1 : index
    %c0_260 = arith.constant 0 : index
    %316 = vector.load %arg3[%c1_259, %c0_260] : memref<9x128xf32, #tpu.memory_space<vmem>>, vector<1x128xf32>
    %317 = vector.broadcast %316 : vector<1x128xf32> to vector<8x128xf32>
    %318 = arith.mulf %315, %317 : vector<8x128xf32>
    %c1_261 = arith.constant 1 : index
    %c0_262 = arith.constant 0 : index
    %c0_263 = arith.constant 0 : index
    %319 = vector.load %arg17[%c1_261, %c0_262, %c0_263] : memref<9x8x8xbf16, #tpu.memory_space<vmem>>, vector<1x8x8xbf16>
    %320 = vector.shape_cast %319 : vector<1x8x8xbf16> to vector<8x8xbf16>
    %321 = arith.truncf %318 : vector<8x128xf32> to vector<8x128xbf16>
    %cst_264 = arith.constant dense<0.000000e+00> : vector<8x128xf32>
    %322 = tpu.matmul %320, %321, %cst_264 {dimension_numbers = #tpu.dot_dimension_numbers<[1], [0], [0], [1], [0, 0, 1, 1], [], []>} : vector<8x8xbf16>, vector<8x128xbf16>, vector<8x128xf32> -> vector<8x128xf32>
    %323 = arith.addf %314, %322 : vector<8x128xf32>
    %c0_265 = arith.constant 0 : index
    %c121_266 = arith.constant 121 : index
    %324 = vector.load %arg20[%c0_265, %c121_266] : memref<8x384xf32, #tpu.memory_space<vmem>>, vector<8x128xf32>
    %c2_267 = arith.constant 2 : index
    %c0_268 = arith.constant 0 : index
    %325 = vector.load %arg3[%c2_267, %c0_268] : memref<9x128xf32, #tpu.memory_space<vmem>>, vector<1x128xf32>
    %326 = vector.broadcast %325 : vector<1x128xf32> to vector<8x128xf32>
    %327 = arith.mulf %324, %326 : vector<8x128xf32>
    %c2_269 = arith.constant 2 : index
    %c0_270 = arith.constant 0 : index
    %c0_271 = arith.constant 0 : index
    %328 = vector.load %arg17[%c2_269, %c0_270, %c0_271] : memref<9x8x8xbf16, #tpu.memory_space<vmem>>, vector<1x8x8xbf16>
    %329 = vector.shape_cast %328 : vector<1x8x8xbf16> to vector<8x8xbf16>
    %330 = arith.truncf %327 : vector<8x128xf32> to vector<8x128xbf16>
    %cst_272 = arith.constant dense<0.000000e+00> : vector<8x128xf32>
    %331 = tpu.matmul %329, %330, %cst_272 {dimension_numbers = #tpu.dot_dimension_numbers<[1], [0], [0], [1], [0, 0, 1, 1], [], []>} : vector<8x8xbf16>, vector<8x128xbf16>, vector<8x128xf32> -> vector<8x128xf32>
    %332 = arith.addf %323, %331 : vector<8x128xf32>
    %c0_273 = arith.constant 0 : index
    %c127_274 = arith.constant 127 : index
    %333 = vector.load %arg20[%c0_273, %c127_274] : memref<8x384xf32, #tpu.memory_space<vmem>>, vector<8x128xf32>
    %c3_275 = arith.constant 3 : index
    %c0_276 = arith.constant 0 : index
    %334 = vector.load %arg3[%c3_275, %c0_276] : memref<9x128xf32, #tpu.memory_space<vmem>>, vector<1x128xf32>
    %335 = vector.broadcast %334 : vector<1x128xf32> to vector<8x128xf32>
    %336 = arith.mulf %333, %335 : vector<8x128xf32>
    %c3_277 = arith.constant 3 : index
    %c0_278 = arith.constant 0 : index
    %c0_279 = arith.constant 0 : index
    %337 = vector.load %arg17[%c3_277, %c0_278, %c0_279] : memref<9x8x8xbf16, #tpu.memory_space<vmem>>, vector<1x8x8xbf16>
    %338 = vector.shape_cast %337 : vector<1x8x8xbf16> to vector<8x8xbf16>
    %339 = arith.truncf %336 : vector<8x128xf32> to vector<8x128xbf16>
    %cst_280 = arith.constant dense<0.000000e+00> : vector<8x128xf32>
    %340 = tpu.matmul %338, %339, %cst_280 {dimension_numbers = #tpu.dot_dimension_numbers<[1], [0], [0], [1], [0, 0, 1, 1], [], []>} : vector<8x8xbf16>, vector<8x128xbf16>, vector<8x128xf32> -> vector<8x128xf32>
    %341 = arith.addf %332, %340 : vector<8x128xf32>
    %c0_281 = arith.constant 0 : index
    %c128_282 = arith.constant 128 : index
    %342 = vector.load %arg20[%c0_281, %c128_282] : memref<8x384xf32, #tpu.memory_space<vmem>>, vector<8x128xf32>
    %c4_283 = arith.constant 4 : index
    %c0_284 = arith.constant 0 : index
    %c0_285 = arith.constant 0 : index
    %343 = vector.load %arg17[%c4_283, %c0_284, %c0_285] : memref<9x8x8xbf16, #tpu.memory_space<vmem>>, vector<1x8x8xbf16>
    %344 = vector.shape_cast %343 : vector<1x8x8xbf16> to vector<8x8xbf16>
    %345 = arith.truncf %342 : vector<8x128xf32> to vector<8x128xbf16>
    %cst_286 = arith.constant dense<0.000000e+00> : vector<8x128xf32>
    %346 = tpu.matmul %344, %345, %cst_286 {dimension_numbers = #tpu.dot_dimension_numbers<[1], [0], [0], [1], [0, 0, 1, 1], [], []>} : vector<8x8xbf16>, vector<8x128xbf16>, vector<8x128xf32> -> vector<8x128xf32>
    %347 = arith.addf %341, %346 : vector<8x128xf32>
    %c0_287 = arith.constant 0 : index
    %c129_288 = arith.constant 129 : index
    %348 = vector.load %arg20[%c0_287, %c129_288] : memref<8x384xf32, #tpu.memory_space<vmem>>, vector<8x128xf32>
    %c5_289 = arith.constant 5 : index
    %c0_290 = arith.constant 0 : index
    %349 = vector.load %arg3[%c5_289, %c0_290] : memref<9x128xf32, #tpu.memory_space<vmem>>, vector<1x128xf32>
    %350 = vector.broadcast %349 : vector<1x128xf32> to vector<8x128xf32>
    %351 = arith.mulf %348, %350 : vector<8x128xf32>
    %c5_291 = arith.constant 5 : index
    %c0_292 = arith.constant 0 : index
    %c0_293 = arith.constant 0 : index
    %352 = vector.load %arg17[%c5_291, %c0_292, %c0_293] : memref<9x8x8xbf16, #tpu.memory_space<vmem>>, vector<1x8x8xbf16>
    %353 = vector.shape_cast %352 : vector<1x8x8xbf16> to vector<8x8xbf16>
    %354 = arith.truncf %351 : vector<8x128xf32> to vector<8x128xbf16>
    %cst_294 = arith.constant dense<0.000000e+00> : vector<8x128xf32>
    %355 = tpu.matmul %353, %354, %cst_294 {dimension_numbers = #tpu.dot_dimension_numbers<[1], [0], [0], [1], [0, 0, 1, 1], [], []>} : vector<8x8xbf16>, vector<8x128xbf16>, vector<8x128xf32> -> vector<8x128xf32>
    %356 = arith.addf %347, %355 : vector<8x128xf32>
    %c0_295 = arith.constant 0 : index
    %c135_296 = arith.constant 135 : index
    %357 = vector.load %arg20[%c0_295, %c135_296] : memref<8x384xf32, #tpu.memory_space<vmem>>, vector<8x128xf32>
    %c6_297 = arith.constant 6 : index
    %c0_298 = arith.constant 0 : index
    %358 = vector.load %arg3[%c6_297, %c0_298] : memref<9x128xf32, #tpu.memory_space<vmem>>, vector<1x128xf32>
    %359 = vector.broadcast %358 : vector<1x128xf32> to vector<8x128xf32>
    %360 = arith.mulf %357, %359 : vector<8x128xf32>
    %c6_299 = arith.constant 6 : index
    %c0_300 = arith.constant 0 : index
    %c0_301 = arith.constant 0 : index
    %361 = vector.load %arg17[%c6_299, %c0_300, %c0_301] : memref<9x8x8xbf16, #tpu.memory_space<vmem>>, vector<1x8x8xbf16>
    %362 = vector.shape_cast %361 : vector<1x8x8xbf16> to vector<8x8xbf16>
    %363 = arith.truncf %360 : vector<8x128xf32> to vector<8x128xbf16>
    %cst_302 = arith.constant dense<0.000000e+00> : vector<8x128xf32>
    %364 = tpu.matmul %362, %363, %cst_302 {dimension_numbers = #tpu.dot_dimension_numbers<[1], [0], [0], [1], [0, 0, 1, 1], [], []>} : vector<8x8xbf16>, vector<8x128xbf16>, vector<8x128xf32> -> vector<8x128xf32>
    %365 = arith.addf %356, %364 : vector<8x128xf32>
    %c0_303 = arith.constant 0 : index
    %c136_304 = arith.constant 136 : index
    %366 = vector.load %arg20[%c0_303, %c136_304] : memref<8x384xf32, #tpu.memory_space<vmem>>, vector<8x128xf32>
    %c7_305 = arith.constant 7 : index
    %c0_306 = arith.constant 0 : index
    %367 = vector.load %arg3[%c7_305, %c0_306] : memref<9x128xf32, #tpu.memory_space<vmem>>, vector<1x128xf32>
    %368 = vector.broadcast %367 : vector<1x128xf32> to vector<8x128xf32>
    %369 = arith.mulf %366, %368 : vector<8x128xf32>
    %c7_307 = arith.constant 7 : index
    %c0_308 = arith.constant 0 : index
    %c0_309 = arith.constant 0 : index
    %370 = vector.load %arg17[%c7_307, %c0_308, %c0_309] : memref<9x8x8xbf16, #tpu.memory_space<vmem>>, vector<1x8x8xbf16>
    %371 = vector.shape_cast %370 : vector<1x8x8xbf16> to vector<8x8xbf16>
    %372 = arith.truncf %369 : vector<8x128xf32> to vector<8x128xbf16>
    %cst_310 = arith.constant dense<0.000000e+00> : vector<8x128xf32>
    %373 = tpu.matmul %371, %372, %cst_310 {dimension_numbers = #tpu.dot_dimension_numbers<[1], [0], [0], [1], [0, 0, 1, 1], [], []>} : vector<8x8xbf16>, vector<8x128xbf16>, vector<8x128xf32> -> vector<8x128xf32>
    %374 = arith.addf %365, %373 : vector<8x128xf32>
    %c0_311 = arith.constant 0 : index
    %c137_312 = arith.constant 137 : index
    %375 = vector.load %arg20[%c0_311, %c137_312] : memref<8x384xf32, #tpu.memory_space<vmem>>, vector<8x128xf32>
    %c8_313 = arith.constant 8 : index
    %c0_314 = arith.constant 0 : index
    %376 = vector.load %arg3[%c8_313, %c0_314] : memref<9x128xf32, #tpu.memory_space<vmem>>, vector<1x128xf32>
    %377 = vector.broadcast %376 : vector<1x128xf32> to vector<8x128xf32>
    %378 = arith.mulf %375, %377 : vector<8x128xf32>
    %c8_315 = arith.constant 8 : index
    %c0_316 = arith.constant 0 : index
    %c0_317 = arith.constant 0 : index
    %379 = vector.load %arg17[%c8_315, %c0_316, %c0_317] : memref<9x8x8xbf16, #tpu.memory_space<vmem>>, vector<1x8x8xbf16>
    %380 = vector.shape_cast %379 : vector<1x8x8xbf16> to vector<8x8xbf16>
    %381 = arith.truncf %378 : vector<8x128xf32> to vector<8x128xbf16>
    %cst_318 = arith.constant dense<0.000000e+00> : vector<8x128xf32>
    %382 = tpu.matmul %380, %381, %cst_318 {dimension_numbers = #tpu.dot_dimension_numbers<[1], [0], [0], [1], [0, 0, 1, 1], [], []>} : vector<8x8xbf16>, vector<8x128xbf16>, vector<8x128xf32> -> vector<8x128xf32>
    %383 = arith.addf %374, %382 : vector<8x128xf32>
    %c0_319 = arith.constant 0 : index
    %c0_320 = arith.constant 0 : index
    %384 = vector.load %arg5[%c0_319, %c0_320] : memref<128x128xf32, #tpu.memory_space<vmem>>, vector<128x128xf32>
    %cst_321 = arith.constant dense<0.000000e+00> : vector<8x128xf32>
    %385 = tpu.matmul %383, %384, %cst_321 {dimension_numbers = #tpu.dot_dimension_numbers<[1], [0], [0], [1], [0, 0, 1, 1], [], []>} : vector<8x128xf32>, vector<128x128xf32>, vector<8x128xf32> -> vector<8x128xf32>
    %cst_322 = arith.constant 0.000000e+00 : f32
    %386 = vector.broadcast %cst_322 : f32 to vector<8x128xf32>
    %387 = arith.subf %386, %385 : vector<8x128xf32>
    %388 = math.exp %387 : vector<8x128xf32>
    %cst_323 = arith.constant 1.000000e+00 : f32
    %389 = vector.broadcast %cst_323 : f32 to vector<8x128xf32>
    %390 = arith.addf %389, %388 : vector<8x128xf32>
    %391 = tpu.reciprocal %390 {approx = true} : vector<8x128xf32> -> vector<8x128xf32>
    %392 = arith.mulf %383, %391 : vector<8x128xf32>
    %393 = arith.addf %199, %392 : vector<8x128xf32>
    %c0_324 = arith.constant 0 : index
    %c0_325 = arith.constant 0 : index
    %394 = vector.load %arg18[%c0_324, %c0_325] : memref<8x128xf32, #tpu.memory_space<vmem>>, vector<8x128xf32>
    tpu.vector_store %arg18[%c0_324, %c0_325], %393 {strides = array<i32>} : memref<8x128xf32, #tpu.memory_space<vmem>>, vector<8x128xf32>,
    return
  }
  func.func @transform_0(%arg0: i32) -> (i32, i32) {
    %c0_i32 = arith.constant 0 : i32
    %c0_i32_0 = arith.constant 0 : i32
    return %c0_i32, %arg0 : i32, i32
  }
  func.func @transform_1(%arg0: i32) -> (i32, i32) {
    %c0_i32 = arith.constant 0 : i32
    %c0_i32_0 = arith.constant 0 : i32
    %c0_i32_1 = arith.constant 0 : i32
    return %c0_i32, %c0_i32_0 : i32, i32
  }
  func.func @transform_2(%arg0: i32) -> (i32, i32) {
    %c0_i32 = arith.constant 0 : i32
    %c0_i32_0 = arith.constant 0 : i32
    %c0_i32_1 = arith.constant 0 : i32
    return %c0_i32, %c0_i32_0 : i32, i32
  }
  func.func @transform_3(%arg0: i32) -> (i32, i32) {
    %c0_i32 = arith.constant 0 : i32
    %c0_i32_0 = arith.constant 0 : i32
    %c0_i32_1 = arith.constant 0 : i32
    return %c0_i32, %c0_i32_0 : i32, i32
  }
  func.func @transform_4(%arg0: i32) -> (i32, i32) {
    %c0_i32 = arith.constant 0 : i32
    %c0_i32_0 = arith.constant 0 : i32
    %c0_i32_1 = arith.constant 0 : i32
    return %c0_i32, %c0_i32_0 : i32, i32
  }
  func.func @transform_5(%arg0: i32) -> (i32, i32) {
    %c0_i32 = arith.constant 0 : i32
    %c0_i32_0 = arith.constant 0 : i32
    %c0_i32_1 = arith.constant 0 : i32
    return %c0_i32, %c0_i32_0 : i32, i32
  }
  func.func @transform_6(%arg0: i32) -> (i32, i32) {
    %c0_i32 = arith.constant 0 : i32
    %c0_i32_0 = arith.constant 0 : i32
    %c0_i32_1 = arith.constant 0 : i32
    return %c0_i32, %c0_i32_0 : i32, i32
  }
  func.func @transform_7(%arg0: i32) -> (i32, i32, i32) {
    %c0_i32 = arith.constant 0 : i32
    %c0_i32_0 = arith.constant 0 : i32
    %c0_i32_1 = arith.constant 0 : i32
    %c0_i32_2 = arith.constant 0 : i32
    return %c0_i32, %c0_i32_0, %c0_i32_1 : i32, i32, i32
  }
  func.func @transform_8(%arg0: i32) -> (i32, i32) {
    %c0_i32 = arith.constant 0 : i32
    %c0_i32_0 = arith.constant 0 : i32
    %c0_i32_1 = arith.constant 0 : i32
    return %c0_i32, %c0_i32_0 : i32, i32
  }
  func.func @transform_9(%arg0: i32) -> (i32, i32) {
    %c0_i32 = arith.constant 0 : i32
    %c0_i32_0 = arith.constant 0 : i32
    %c0_i32_1 = arith.constant 0 : i32
    return %c0_i32, %c0_i32_0 : i32, i32
  }
  func.func @transform_10(%arg0: i32) -> (i32, i32, i32) {
    %c0_i32 = arith.constant 0 : i32
    %c0_i32_0 = arith.constant 0 : i32
    %c0_i32_1 = arith.constant 0 : i32
    %c0_i32_2 = arith.constant 0 : i32
    return %c0_i32, %c0_i32_0, %c0_i32_1 : i32, i32, i32
  }
  func.func @transform_11(%arg0: i32) -> (i32, i32) {
    %c0_i32 = arith.constant 0 : i32
    %c0_i32_0 = arith.constant 0 : i32
    %c0_i32_1 = arith.constant 0 : i32
    return %c0_i32, %c0_i32_0 : i32, i32
  }
  func.func @transform_12(%arg0: i32) -> (i32, i32) {
    %c0_i32 = arith.constant 0 : i32
    %c0_i32_0 = arith.constant 0 : i32
    %c0_i32_1 = arith.constant 0 : i32
    return %c0_i32, %c0_i32_0 : i32, i32
  }
  func.func @transform_13(%arg0: i32) -> (i32, i32, i32) {
    %c0_i32 = arith.constant 0 : i32
    %c0_i32_0 = arith.constant 0 : i32
    %c0_i32_1 = arith.constant 0 : i32
    %c0_i32_2 = arith.constant 0 : i32
    return %c0_i32, %c0_i32_0, %c0_i32_1 : i32, i32, i32
  }
  func.func @transform_14(%arg0: i32) -> (i32, i32) {
    %c0_i32 = arith.constant 0 : i32
    %c0_i32_0 = arith.constant 0 : i32
    %c0_i32_1 = arith.constant 0 : i32
    return %c0_i32, %c0_i32_0 : i32, i32
  }
  func.func @transform_15(%arg0: i32) -> (i32, i32) {
    %c0_i32 = arith.constant 0 : i32
    %c0_i32_0 = arith.constant 0 : i32
    %c0_i32_1 = arith.constant 0 : i32
    return %c0_i32, %c0_i32_0 : i32, i32
  }
  func.func @transform_16(%arg0: i32) -> (i32, i32, i32) {
    %c0_i32 = arith.constant 0 : i32
    %c0_i32_0 = arith.constant 0 : i32
    %c0_i32_1 = arith.constant 0 : i32
    %c0_i32_2 = arith.constant 0 : i32
    return %c0_i32, %c0_i32_0, %c0_i32_1 : i32, i32, i32
  }
  func.func @transform_17(%arg0: i32) -> (i32, i32) {
    %c0_i32 = arith.constant 0 : i32
    %c0_i32_0 = arith.constant 0 : i32
    return %c0_i32, %arg0 : i32, i32
  }
}

</mosaic_0001>

<bundles_post_ra>
// kernel: network_block_forward.1
= control target key start
LH: loop header
LB: loop body
LE: loop exit
PB: predicated region body
PF: predicated region fallthrough
CT: control target
= control target key end

     0   :  { %v3303_v0 = vmov 0   ;;  %vm100_vm0 = vcmask 1043456   ;;  %s3306_s24 = smov 113   ;;  %s3307_s25 = smov 127   ;;  %v3308_v35 = vmov 0.0   ;;  %vm109_vm1 = vcmask 908288   ;;  %s4457_s5 = inlined_call_operand.vmem [shape: f32[4,1], index: 5, kind: input, shape index: {}]   ;;  %s4458_s1 = inlined_call_operand.vmem [shape: f32[9,512], index: 1, kind: input, shape index: {}]   ;;  %s4459_s6 = inlined_call_operand.vmem [shape: f32[4,1], index: 6, kind: input, shape index: {}]   ;;  %s4460_s0 = inlined_call_operand.vmem [shape: f32[4,512], index: 0, kind: input, shape index: {}]   ;;  %s4461_s7 = inlined_call_operand.vmem [shape: bf16[9,16,4], index: 7, kind: input, shape index: {}]   ;;  %s4462_s3 = inlined_call_operand.vmem [shape: bf16[512,128], index: 3, kind: input, shape index: {}]   ;;  %s4463_s2 = inlined_call_operand.vmem [shape: f32[9,128], index: 2, kind: input, shape index: {}]   ;;  %s4464_s8 = inlined_call_operand.vmem [shape: f32[8,1], index: 8, kind: input, shape index: {}]   ;;  %s4465_s9 = inlined_call_operand.vmem [shape: f32[8,1], index: 9, kind: input, shape index: {}]   ;;  %s4466_s12 = inlined_call_operand.vmem [shape: f32[8,1], index: 12, kind: input, shape index: {}]   ;;  %s4467_s11 = inlined_call_operand.vmem [shape: f32[8,1], index: 11, kind: input, shape index: {}]   ;;  %s4468_s10 = inlined_call_operand.vmem [shape: bf16[9,8,8], index: 10, kind: input, shape index: {}]   ;;  %s4469_s4 = inlined_call_operand.vmem [shape: f32[128,128], index: 4, kind: input, shape index: {}]   ;;  %s4470_s15 = inlined_call_operand.vmem [shape: f32[8,1], index: 15, kind: input, shape index: {}]   ;;  %s4471_s14 = inlined_call_operand.vmem [shape: f32[8,1], index: 14, kind: input, shape index: {}]   ;;  %s4472_s13 = inlined_call_operand.vmem [shape: bf16[9,8,8], index: 13, kind: input, shape index: {}]   ;;  %s4473_s16 = inlined_call_operand.vmem [shape: bf16[9,8,8], index: 16, kind: input, shape index: {}]   ;;  %s4474_s17 = inlined_call_operand.vmem [shape: f32[8,128], index: 17, kind: output, shape index: {}]  }
   0x1   :  { %4476 = sst [smem:[#allocation4_spill]] %s4457_s5  ;;  %3268 = vset.pattern.permute.xlu0 %v3303_v0  ;;  %3269 = vset.pattern.permute.xlu1 %v3303_v0  ;;  %v71_v10 = vld [vmem:[%s4459_s6] sm:$0xf]  ;;  %s3305_s6 = smov 112   ;;  %85 = vst [vmem:[#allocation2] sm:$0xf] %v3308_v35 }
   0x2   :  { %4477 = sst [smem:[#allocation5_spill]] %s4458_s1  ;;  %3270 = vset.pattern.permute.xlu2 %v3303_v0  ;;  %s3304_s1 = smov 111   ;;  %86 = vst [vmem:[#allocation2 + $0x14] sm:$0xf] %v3308_v35  ;;  %v3309_v36 = vmov 839922192  }
   0x3   :  { %s4478_s26 = sld [smem:[#allocation4_spill]]  ;;  %v65_v37 = vunpack.c.l.s4 %v3309_v36  ;;  %v57_v41 = vld [vmem:[%s4460_s0] sm:$0xff]  ;;  %v58_v42 = vld [vmem:[%s4460_s0 + $0x8] sm:$0xff]  ;;  %vm164_vm2 = vcmask 916480   ;;  %vm414_vm3 = vcmask 924672   ;;  %vm574_vm4 = vcmask 1039360  }
   0x4   :  { %s4479_s29 = sld [smem:[#allocation5_spill]]  ;;  %s3310_s0 = smov 16   ;;  %vm220_vm5 = vcmask 130048   ;;  %vm229_vm6 = vcmask 1041408   ;;  %vm225_vm7 = vcmask 31744   ;;  %vm318_vm8 = vcmask 138240  }
   0x5   :  { %v66_v39 = vunpack.c.0.s8 %v65_v37  ;;  %s3311_s19 = smov 17   ;;  %s3312_s20 = smov 1   ;;  %vm470_vm9 = vcmask 121856   ;;  %vm630_vm10 = vcmask 7168   ;;  %vm1892_vm11 = vcmask 56320  }
   0x6   :  { %s3313_s23 = smov 15   ;;  %s3314_s22 = smov 121   ;;  %vm1825_vm12 = vcmask 64512   ;;  %vm2035_vm13 = vcmask 990208   ;;  %vm1853_vm14 = vcmask 72704   ;;  %vm2115_vm15 = vcmask 973824  }
   0x7   :  { %s3316_s5 = smov 7   ;;  %s3317_s30 = smov 119  }
   0x9   :  { %v59_v1 = vld [vmem:[%s4478_s26] sm:$0xf] }
   0xa   :  { %v92_v2 = vld [vmem:[%s4479_s29] ss:$8 sm:$0xf]  ;;  %62 = vperm.xlu0 %3268, %v59_v1   ;;  %v2936_v5 = vld [vmem:[%s4479_s29 + $0x1] ss:$8 sm:$0xf] }
   0xb   :  { %v94_v3 = vperm.slane %v92_v2, 0  ;;  %v95_v4 = vperm.slane %v92_v2, 1  ;;  %v151_v7 = vperm.slane %v2936_v5, 1  ;;  %v2955_v8 = vld [vmem:[%s4479_s29 + $0x2] ss:$8 sm:$0xf] }
   0xc   :  { %v401_v11 = vperm.slane %v2955_v8, 1  ;;  %v96_v12 = vperm.slane %v92_v2, 2  ;;  %v97_v13 = vperm.slane %v92_v2, 3  ;;  %v150_v14 = vperm.slane %v2936_v5, 0 }
   0xd   :  { %v98_v6 = vrot.slane %v95_v4, 4  ;;  %v154_v15 = vrot.slane %v151_v7, 4  ;;  %v153_v17 = vperm.slane %v2936_v5, 3  ;;  %v400_v18 = vperm.slane %v2955_v8, 0 }
   0xe   :  { %v99_v16 = vrot.slane %v97_v13, 4  ;;  %v404_v19 = vrot.slane %v401_v11, 4  ;;  %v403_v22 = vperm.slane %v2955_v8, 3  ;;  %v152_v23 = vperm.slane %v2936_v5, 2 }
   0xf   :  { %v101_v9 = vsel %vm100_vm0, %v94_v3, %v98_v6  ;;  %v156_v21 = vsel %vm100_vm0, %v150_v14, %v154_v15  ;;  %v155_v24 = vrot.slane %v153_v17, 4  ;;  %v402_v26 = vperm.slane %v2955_v8, 2  ;;  %v3435_v28 = vld [vmem:[%s4479_s29 + $0x3] ss:$8 sm:$0xf] }
  0x10   :  { %103 = vrot.lane.b32.xlu1 %v101_v9, %s3304_s1  ;;  %v102_v20 = vsel %vm100_vm0, %v96_v12, %v99_v16  ;;  %v406_v25 = vsel %vm100_vm0, %v400_v18, %v404_v19  ;;  %v405_v27 = vrot.slane %v403_v22, 4  ;;  %v561_v31 = vperm.slane %v3435_v28, 1 }
  0x11   :  { %105 = vrot.lane.b32.xlu2 %v102_v20, %s3304_s1  ;;  %v157_v29 = vsel %vm100_vm0, %v152_v23, %v155_v24  ;;  %v560_v32 = vperm.slane %v3435_v28, 0 }
  0x12   :  { %74 = vperm.xlu0 %3268, %v71_v10   ;;  %v407_v30 = vsel %vm100_vm0, %v402_v26, %v405_v27  ;;  %v564_v33 = vrot.slane %v561_v31, 4  ;;  %v563_v27 = vperm.slane %v3435_v28, 3 }
  0x14   :  { %v566_v34 = vsel %vm100_vm0, %v560_v32, %v564_v33 }
  0x18   :  { %158 = vrot.lane.b32.xlu1 %v156_v21, %s3305_s6 }
  0x19   :  { %160 = vrot.lane.b32.xlu2 %v157_v29, %s3305_s6 }
  0x1a   :  { %408 = vrot.lane.b32.xlu0 %v406_v25, %s3306_s24 }
  0x20   :  { %410 = vrot.lane.b32.xlu1 %v407_v30, %s3306_s24 }
  0x28   :  { %568 = vrot.lane.b32.xlu1 %v566_v34, %s3307_s25 }
  0x6b   :  { %v106_v48 = vpop.permute.xlu2 %105 }
  0x6c   :  { %v108_v54 = vrot.slane %v106_v48, 4 }
  0x73   :  { %v161_v57 = vpop.permute.xlu2 %160 }
  0x74   :  { %v163_v1 = vrot.slane %v161_v57, 4 }
  0x7c   :  { %v63_v38 = vpop.permute.xlu0 %62 }
  0x7d   :  { %v67_v40 = vperm.slane %v63_v38, %v66_v39 }
  0x7f   :  { %v69_v45 = vmul.f32 %v67_v40, %v57_v41  ;;  %v70_v46 = vmul.f32 %v67_v40, %v58_v42  ;;  %v562_v40 = vperm.slane %v3435_v28, 2  ;;  %v565_v41 = vrot.slane %v563_v27, 4 }
  0x82   :  { %v104_v43 = vpop.permute.xlu1 %103 }
  0x83   :  { %v107_v53 = vrot.slane %v104_v43, 4 }
  0x84   :  { %v75_v44 = vpop.permute.xlu0 %74 }
  0x85   :  { %v79_v47 = vperm.slane %v75_v44, %v66_v39  ;;  %v111_v56 = vsel %vm100_vm0, %v107_v53, %v108_v54  ;;  %v110_v59 = vsel %vm109_vm1, %v107_v53, %v104_v43  ;;  %v2987_v43 = vld [vmem:[%s4479_s29 + $0x5] ss:$8 sm:$0xf]  ;;  %v567_v44 = vsel %vm100_vm0, %v562_v40, %v565_v41  ;;  %v3020_v41 = vld [vmem:[%s4479_s29 + $0x20] ss:$8 sm:$0xf] }
  0x86   :  { %v112_v58 = vsel %vm109_vm1, %v111_v56, %v106_v48  ;;  %v829_v48 = vperm.slane %v2987_v43, 3  ;;  %v828_v28 = vperm.slane %v2987_v43, 2  ;;  %v827_v53 = vperm.slane %v2987_v43, 1 }
  0x87   :  { %v81_v49 = vadd.f32 %v79_v47, %v69_v45  ;;  %v82_v50 = vadd.f32 %v79_v47, %v70_v46 }
  0x89   :  { %v3452_v51 = vmax.f32 %v81_v49, 0.0  ;;  %v3454_v52 = vmax.f32 %v82_v50, 0.0  ;;  %v831_v50 = vrot.slane %v829_v48, 4 }
  0x8a   :  { %v159_v55 = vpop.permute.xlu1 %158 }
  0x8b   :  { %87 = vst [vmem:[#allocation2 + $0x4] sm:$0xff] %v3452_v51  ;;  %v162_v0 = vrot.slane %v159_v55, 4 }
  0x8c   :  { %88 = vst [vmem:[#allocation2 + $0xc] sm:$0xff] %v3454_v52  ;;  %v409_v7 = vpop.permute.xlu0 %408 }
  0x8d   :  { %v166_v5 = vsel %vm100_vm0, %v162_v0, %v163_v1  ;;  %v165_v6 = vsel %vm164_vm2, %v162_v0, %v159_v55  ;;  %v412_v11 = vrot.slane %v409_v7, 4 }
  0x8e   :  { %v167_v8 = vsel %vm164_vm2, %v166_v5, %v161_v57 }
  0x8f   :  { %v415_v21 = vsel %vm414_vm3, %v412_v11, %v409_v7 }
  0x92   :  { %v89_v60 = vld [vmem:[#allocation2] sm:$0xff]  ;;  %v411_v4 = vpop.permute.xlu1 %410 }
  0x93   :  { %v3461_v61 = vld [vmem:[#allocation2 + $0x8] sm:$0xff]  ;;  %v91_v62 = vld [vmem:[#allocation2 + $0x10] sm:$0xf]  ;;  %v116_v63 = vmul.f32 %v110_v59, %v89_v60  ;;  %v171_v9 = vmul.f32 %v165_v6, %v89_v60  ;;  %v413_v12 = vrot.slane %v411_v4, 4  ;;  %v421_v24 = vmul.f32 %v415_v21, %v89_v60 }
  0x94   :  { %v117_v2 = vmul.f32 %v112_v58, %v3461_v61  ;;  %v118_v3 = vmul.f32 %v108_v54, %v91_v62  ;;  %v146_v10 = vld [vmem:[#allocation2 + $0x10] sm:$0xf]  ;;  %v172_v16 = vmul.f32 %v167_v8, %v3461_v61  ;;  %v833_v58 = vsel %vm100_vm0, %v828_v28, %v831_v50  ;;  %v2998_v62 = vld [vmem:[%s4479_s29 + $0x6] ss:$8 sm:$0xf] }
  0x95   :  { %124 = vst [vmem:[#allocation1] ss:$2 sm:$0xff] %v116_v63  ;;  %v173_v19 = vmul.f32 %v163_v1, %v146_v10  ;;  %v416_v20 = vsel %vm100_vm0, %v412_v11, %v413_v12  ;;  %v396_v25 = vld [vmem:[#allocation2 + $0x10] sm:$0xf]  ;;  %v826_v59 = vperm.slane %v2987_v43, 0  ;;  %v989_v11 = vperm.slane %v2998_v62, 3 }
  0x96   :  { %126 = vst [vmem:[#allocation1 + $0x10] ss:$2 sm:$0xff] %v117_v2  ;;  %v417_v23 = vsel %vm414_vm3, %v416_v20, %v411_v4  ;;  %v423_v34 = vmul.f32 %v413_v12, %v396_v25  ;;  %v987_v2 = vperm.slane %v2998_v62, 1  ;;  %v986_v4 = vperm.slane %v2998_v62, 0 }
  0x97   :  { %128 = vst [vmem:[#allocation1 + $0x20] ss:$2 sm:$0xff] %v118_v3  ;;  %v422_v31 = vmul.f32 %v417_v23, %v3461_v61  ;;  %v556_v23 = vld [vmem:[#allocation2 + $0x10] sm:$0xf]  ;;  %v1309_v28 = vperm.slane %v3020_v41, 3 }
  0x98   :  { %v990_v5 = vrot.slane %v987_v2, 4 }
  0x9a   :  { %v3476_v22 = vpop.permute.xlu1 %568  ;;  %v992_v8 = vsel %vm100_vm0, %v986_v4, %v990_v5 }
  0x9b   :  { %v572_v26 = vrot.slane %v3476_v22, 4 }
  0x9c   :  { %v3467_v13 = vld.sshfl [vmem:[#allocation1] sm:$0xff pattern:$0x75316420]  ;;  %v3469_v14 = vld.sshfl [vmem:[#allocation1 + $0x8] sm:$0xff pattern:$0x75316420] }
  0x9d   :  { %180 = vst [vmem:[#allocation1] ss:$2 sm:$0xff] %v171_v9  ;;  %v131_v15 = vld.sshfl [vmem:[#allocation1 + $0x10] sm:$0xff pattern:$0x75316420]  ;;  %v575_v39 = vsel %vm574_vm4, %v572_v26, %v3476_v22  ;;  %v140_v6 = vpack.c.bf16 %v3469_v14, %v3469_v14  ;;  %v139_v7 = vpack.c.bf16 %v3467_v13, %v3467_v13  ;;  %v991_v14 = vrot.slane %v989_v11, 4 }
  0x9e   :  { %v132_v17 = vld.sshfl [vmem:[#allocation1 + $0x18] sm:$0xff pattern:$0x75316420]  ;;  %v3472_v18 = vld.sshfl [vmem:[#allocation1 + $0x20] sm:$0xff pattern:$0x75316420]  ;;  %v581_v42 = vmul.f32 %v575_v39, %v89_v60  ;;  %v141_v56 = vpack.c.bf16 %v131_v15, %v131_v15 }
  0x9f   :  { %182 = vst [vmem:[#allocation1 + $0x10] ss:$2 sm:$0xff] %v172_v16  ;;  %v142_v49 = vpack.c.bf16 %v132_v17, %v132_v17  ;;  %v830_v60 = vrot.slane %v827_v53, 4  ;;  %v143_v1 = vpack.c.bf16 %v3472_v18, %v3472_v18  ;;  %v988_v17 = vperm.slane %v2998_v62, 2 }
  0xa0   :  { %184 = vst [vmem:[#allocation1 + $0x20] ss:$2 sm:$0xff] %v173_v19  ;;  %v1311_v62 = vrot.slane %v1309_v28, 4 }
  0xa1   :  { %v832_v0 = vsel %vm100_vm0, %v826_v59, %v830_v60  ;;  %v993_v13 = vsel %vm100_vm0, %v988_v17, %v991_v14  ;;  %v1308_v60 = vperm.slane %v3020_v41, 2 }
  0xa4   :  { %v186_v29 = vld.sshfl [vmem:[#allocation1 + $0x8] sm:$0xff pattern:$0x75316420]  ;;  %v185_v30 = vld.sshfl [vmem:[#allocation1] sm:$0xff pattern:$0x75316420] }
  0xa5   :  { %v196_v32 = vpack.c.bf16 %v186_v29, %v186_v29  ;;  %v195_v33 = vpack.c.bf16 %v185_v30, %v185_v30  ;;  %430 = vst [vmem:[#allocation1] ss:$2 sm:$0xff] %v421_v24 }
  0xa6   :  { %v188_v35 = vld.sshfl [vmem:[#allocation1 + $0x18] sm:$0xff pattern:$0x75316420]  ;;  %v187_v36 = vld.sshfl [vmem:[#allocation1 + $0x10] sm:$0xff pattern:$0x75316420] }
  0xa7   :  { %v189_v37 = vld.sshfl [vmem:[#allocation1 + $0x20] sm:$0xff pattern:$0x75316420]  ;;  %v198_v38 = vpack.c.bf16 %v188_v35, %v188_v35  ;;  %212 = vrot.lane.b32.xlu0 %v196_v32, %s3310_s0  ;;  %210 = vrot.lane.b32.xlu2 %v195_v33, %s3310_s0  ;;  %432 = vst [vmem:[#allocation1 + $0x10] ss:$2 sm:$0xff] %v422_v31  ;;  %v197_v47 = vpack.c.bf16 %v187_v36, %v187_v36 }
  0xa8   :  { %434 = vst [vmem:[#allocation1 + $0x20] ss:$2 sm:$0xff] %v423_v34  ;;  %v199_v57 = vpack.c.bf16 %v189_v37, %v189_v37  ;;  %v3009_v31 = vld [vmem:[%s4479_s29 + $0x7] ss:$8 sm:$0xf] }
  0xa9   :  { %216 = vrot.lane.b32.xlu1 %v198_v38, %s3310_s0  ;;  %v1149_v34 = vperm.slane %v3009_v31, 3  ;;  %v1147_v35 = vperm.slane %v3009_v31, 1  ;;  %v1148_v40 = vperm.slane %v3009_v31, 2 }
  0xac   :  { %v436_v45 = vld.sshfl [vmem:[#allocation1 + $0x8] sm:$0xff pattern:$0x75316420]  ;;  %v435_v46 = vld.sshfl [vmem:[#allocation1] sm:$0xff pattern:$0x75316420] }
  0xad   :  { %590 = vst [vmem:[#allocation1] ss:$2 sm:$0xff] %v581_v42  ;;  %v446_v16 = vpack.c.bf16 %v436_v45, %v436_v45  ;;  %v445_v18 = vpack.c.bf16 %v435_v46, %v435_v46  ;;  %v1146_v45 = vperm.slane %v3009_v31, 0  ;;  %v1150_v46 = vrot.slane %v1147_v35, 4 }
  0xae   :  { %v437_v63 = vld.sshfl [vmem:[#allocation1 + $0x10] sm:$0xff pattern:$0x75316420]  ;;  %v438_v10 = vld.sshfl [vmem:[#allocation1 + $0x18] sm:$0xff pattern:$0x75316420] }
  0xaf   :  { %214 = vrot.lane.b32.xlu0 %v197_v47, %s3310_s0  ;;  %570 = vrot.lane.b32.xlu2 %v567_v44, %s3307_s25  ;;  %v447_v3 = vpack.c.bf16 %v437_v63, %v437_v63  ;;  %v439_v9 = vld.sshfl [vmem:[#allocation1 + $0x20] sm:$0xff pattern:$0x75316420]  ;;  %v448_v15 = vpack.c.bf16 %v438_v10, %v438_v10  ;;  %v1151_v44 = vrot.slane %v1149_v34, 4  ;;  %v3211_v47 = vld [vmem:[%s4461_s7 + $0x8] sm:$0xff] }
  0xb0   :  { %v449_v12 = vpack.c.bf16 %v439_v9, %v439_v9 }
  0xb1   :  { %314 = vrot.lane.b32.xlu1 %v142_v49, %s3311_s19  ;;  %v1153_v53 = vsel %vm100_vm0, %v1148_v40, %v1151_v44 }
  0xb4   :  { %v3497_v54 = vld.sshfl [vmem:[#allocation1] sm:$0xff pattern:$0x75316420]  ;;  %v3499_v55 = vld.sshfl [vmem:[#allocation1 + $0x8] sm:$0xff pattern:$0x75316420] }
  0xb5   :  { %721 = vst [vmem:[#allocation1] ss:$2 sm:$0xff] %v3452_v51  ;;  %v605_v50 = vpack.c.bf16 %v3497_v54, %v3497_v54  ;;  %v606_v9 = vpack.c.bf16 %v3499_v55, %v3499_v55 }
  0xb7   :  { %312 = vrot.lane.b32.xlu0 %v141_v56, %s3311_s19  ;;  %218 = vrot.lane.b32.xlu2 %v199_v57, %s3310_s0  ;;  %v1152_v56 = vsel %vm100_vm0, %v1146_v45, %v1150_v46  ;;  %v1307_v57 = vperm.slane %v3020_v41, 1 }
  0xb9   :  { %836 = vrot.lane.b32.xlu1 %v833_v58, %s3312_s20  ;;  %v1310_v4 = vrot.slane %v1307_v57, 4 }
  0xbf   :  { %834 = vrot.lane.b32.xlu0 %v832_v0, %s3312_s20  ;;  %316 = vrot.lane.b32.xlu2 %v143_v1, %s3311_s19 }
  0xc1   :  { %464 = vrot.lane.b32.xlu1 %v447_v3, %s3313_s23  ;;  %v1306_v3 = vperm.slane %v3020_v41, 0 }
  0xc7   :  { %310 = vrot.lane.b32.xlu0 %v140_v6, %s3311_s19  ;;  %308 = vrot.lane.b32.xlu2 %v139_v7, %s3311_s19  ;;  %v1313_v7 = vsel %vm100_vm0, %v1308_v60, %v1311_v62 }
  0xc9   :  { %994 = vrot.lane.b32.xlu1 %v992_v8, %s3313_s23  ;;  %v1312_v8 = vsel %vm100_vm0, %v1306_v3, %v1310_v4 }
  0xcf   :  { %468 = vrot.lane.b32.xlu0 %v449_v12, %s3313_s23  ;;  %466 = vrot.lane.b32.xlu2 %v448_v15, %s3313_s23  ;;  %v822_v15 = vld [vmem:[#allocation2 + $0x14] sm:$0xf] }
  0xd1   :  { %462 = vrot.lane.b32.xlu1 %v446_v16, %s3313_s23 }
  0xd7   :  { %460 = vrot.lane.b32.xlu0 %v445_v18, %s3313_s23  ;;  %996 = vrot.lane.b32.xlu2 %v993_v13, %s3313_s23  ;;  %s3319_s23 = smov 8  }
 0x101   :  { %v211_v19 = vpop.permute.xlu2 %210 }
 0x109   :  { %v571_v20 = vpop.permute.xlu2 %570 }
 0x10a   :  { %v573_v21 = vrot.slane %v571_v20, 4 }
 0x10c   :  { %v576_v24 = vsel %vm100_vm0, %v572_v26, %v573_v21  ;;  %v583_v25 = vmul.f32 %v573_v21, %v556_v23 }
 0x10d   :  { %v577_v27 = vsel %vm574_vm4, %v576_v24, %v571_v20  ;;  %v982_v20 = vld [vmem:[#allocation2 + $0x14] sm:$0xf]  ;;  %v3572_v24 = vld.sshfl [vmem:[#allocation1] sm:$0xff pattern:$0x75316420] }
 0x10e   :  { %v582_v29 = vmul.f32 %v577_v27, %v3461_v61  ;;  %594 = vst [vmem:[#allocation1 + $0x20] ss:$2 sm:$0xff] %v583_v25 }
 0x110   :  { %592 = vst [vmem:[#allocation1 + $0x10] ss:$2 sm:$0xff] %v582_v29 }
 0x111   :  { %v219_v30 = vpop.permute.xlu2 %218 }
 0x115   :  { %v599_v32 = vld.sshfl [vmem:[#allocation1 + $0x20] sm:$0xff pattern:$0x75316420] }
 0x116   :  { %v609_v33 = vpack.c.bf16 %v599_v32, %v599_v32 }
 0x117   :  { %v598_v22 = vld.sshfl [vmem:[#allocation1 + $0x18] sm:$0xff pattern:$0x75316420]  ;;  %v597_v36 = vld.sshfl [vmem:[#allocation1 + $0x10] sm:$0xff pattern:$0x75316420] }
 0x118   :  { %628 = vrot.lane.b32.xlu1 %v609_v33, %s3312_s20  ;;  %v608_v26 = vpack.c.bf16 %v598_v22, %v598_v22  ;;  %v607_v37 = vpack.c.bf16 %v597_v36, %v597_v36  ;;  %723 = vst [vmem:[#allocation1 + $0x10] ss:$2 sm:$0xff] %v3454_v52 }
 0x119   :  { %v213_v61 = vpop.permute.xlu0 %212  ;;  %v317_v38 = vpop.permute.xlu2 %316 }
 0x11a   :  { %626 = vrot.lane.b32.xlu0 %v608_v26, %s3312_s20  ;;  %624 = vrot.lane.b32.xlu2 %v607_v37, %s3312_s20  ;;  %v221_v39 = vsel %vm220_vm5, %v211_v19, %v213_v61 }
 0x11b   :  { %v217_v42 = vpop.permute.xlu1 %216  ;;  %v231_v43 = vsel %vm229_vm6, %v221_v39, 0 }
 0x11c   :  { %249 = vmatpush.bf16.msra.mxu2 %v231_v43  ;;  %v224_v48 = vsel %vm220_vm5, %v217_v42, %v219_v30  ;;  %v3577_v30 = vld.sshfl [vmem:[#allocation1 + $0x8] sm:$0xff pattern:$0x75316420] }
 0x11d   :  { %v240_v49 = vsel %vm229_vm6, %v224_v48, 0 }
 0x11e   :  { %291 = vmatpush.bf16.msra.mxu3 %v240_v49 }
 0x11f   :  { %2943 = vmatmul.msk.bf16.vlgmr.msra.gmra.mxu2 %vm225_vm7, %v3211_v47  ;;  %v3582_v35 = vld.sshfl [vmem:[#allocation1 + $0x10] sm:$0xff pattern:$0x75316420]  ;;  %v3584_v22 = vld.sshfl [vmem:[#allocation1 + $0x18] sm:$0xff pattern:$0x75316420] }
 0x120   :  { %620 = vrot.lane.b32.xlu1 %v605_v50, %s3312_s20 }
 0x121   :  { %v215_v58 = vpop.permute.xlu0 %214  ;;  %v3550_v59 = vpop.permute.xlu2 %308  ;;  %2946 = vmatmul.msk.bf16.vlgmr.msra.gmra.mxu3 %vm225_vm7, %v3211_v47 }
 0x122   :  { %1156 = vrot.lane.b32.xlu0 %v1153_v53, %s3310_s0  ;;  %1154 = vrot.lane.b32.xlu2 %v1152_v56, %s3310_s0  ;;  %v222_v54 = vsel %vm220_vm5, %v213_v61, %v215_v58  ;;  %v223_v63 = vsel %vm220_vm5, %v215_v58, %v217_v42 }
 0x123   :  { %v315_v0 = vpop.permute.xlu1 %314  ;;  %v234_v1 = vsel %vm229_vm6, %v222_v54, 0  ;;  %v237_v2 = vsel %vm229_vm6, %v223_v63, 0 }
 0x124   :  { %263 = vmatpush.bf16.msra.mxu1 %v234_v1  ;;  %277 = vmatpush.bf16.msrb.mxu2 %v237_v2  ;;  %v322_v5 = vsel %vm318_vm8, %v315_v0, %v317_v38 }
 0x125   :  { %v336_v6 = vsel %vm229_vm6, %v322_v5, 0 }
 0x126   :  { %387 = vmatpush.bf16.msrb.mxu3 %v336_v6 }
 0x127   :  { %2944 = vmatmul.msk.bf16.vlgmr.msra.gmra.mxu1 %vm225_vm7, %v3211_v47 }
 0x128   :  { %1316 = vrot.lane.b32.xlu1 %v1313_v7, %s3311_s19 }
 0x129   :  { %v313_v10 = vpop.permute.xlu0 %312  ;;  %v467_v11 = vpop.permute.xlu2 %466 }
 0x12a   :  { %v321_v12 = vsel %vm318_vm8, %v313_v10, %v315_v0  ;;  %1314 = vrot.lane.b32.xlu0 %v1312_v8, %s3311_s19  ;;  %622 = vrot.lane.b32.xlu2 %v606_v9, %s3312_s20 }
 0x12b   :  { %v837_v16 = vpop.permute.xlu1 %836  ;;  %v333_v17 = vsel %vm229_vm6, %v321_v12, 0 }
 0x12c   :  { %v839_v14 = vrot.slane %v837_v16, 4  ;;  %373 = vmatpush.bf16.msra.mxu2 %v333_v17 }
 0x12e   :  { %v849_v13 = vmul.f32 %v839_v14, %v822_v15  ;;  %v3210_v15 = vld [vmem:[%s4461_s7] sm:$0xff] }
 0x12f   :  { %2945 = vmatmul.msk.bf16.vlgmr.msrb.gmra.mxu2 %vm225_vm7, %v3211_v47 }
 0x130   :  { %860 = vst [vmem:[#allocation1 + $0x20] ss:$2 sm:$0xff] %v849_v13 }
 0x131   :  { %v835_v55 = vpop.permute.xlu0 %834  ;;  %v997_v18 = vpop.permute.xlu2 %996  ;;  %2954 = vmatmul.msk.bf16.vlgmr.msrb.gmra.mxu3 %vm225_vm7, %v3210_v15 }
 0x132   :  { %v838_v19 = vrot.slane %v835_v55, 4  ;;  %v999_v23 = vrot.slane %v997_v18, 4 }
 0x133   :  { %v465_v21 = vpop.permute.xlu1 %464 }
 0x134   :  { %v473_v25 = vsel %vm470_vm9, %v465_v21, %v467_v11  ;;  %v841_v27 = vsel %vm630_vm10, %v838_v19, %v835_v55  ;;  %v842_v29 = vsel %vm100_vm0, %v838_v19, %v839_v14  ;;  %v1009_v34 = vmul.f32 %v999_v23, %v982_v20  ;;  %v3212_v14 = vld [vmem:[%s4461_s7 + $0x10] sm:$0xff] }
 0x135   :  { %v485_v31 = vsel %vm229_vm6, %v473_v25, 0  ;;  %v843_v32 = vsel %vm630_vm10, %v842_v29, %v837_v16  ;;  %v847_v33 = vmul.f32 %v841_v27, %v3452_v51 }
 0x136   :  { %v848_v36 = vmul.f32 %v843_v32, %v3454_v52  ;;  %525 = vmatpush.bf16.msrb.mxu2 %v485_v31  ;;  %v3213_v31 = vld [vmem:[%s4461_s7 + $0x18] sm:$0xff] }
 0x137   :  { %856 = vst [vmem:[#allocation1] ss:$2 sm:$0xff] %v847_v33  ;;  %v865_v26 = vld.sshfl [vmem:[#allocation1 + $0x20] sm:$0xff pattern:$0x75316420]  ;;  %v734_v33 = vpack.c.bf16 %v3582_v35, %v3582_v35  ;;  %v732_v35 = vpack.c.bf16 %v3572_v24, %v3572_v24 }
 0x138   :  { %858 = vst [vmem:[#allocation1 + $0x10] ss:$2 sm:$0xff] %v848_v36  ;;  %v875_v37 = vpack.c.bf16 %v865_v26, %v865_v26 }
 0x139   :  { %v311_v61 = vpop.permute.xlu0 %310  ;;  %1020 = vst [vmem:[#allocation1 + $0x20] ss:$2 sm:$0xff] %v1009_v34 }
 0x13a   :  { %v319_v38 = vsel %vm318_vm8, %v3550_v59, %v311_v61  ;;  %v320_v39 = vsel %vm318_vm8, %v311_v61, %v313_v10  ;;  %894 = vrot.lane.b32.xlu1 %v875_v37, %s3307_s25 }
 0x13b   :  { %v995_v40 = vpop.permute.xlu1 %994  ;;  %v327_v41 = vsel %vm229_vm6, %v319_v38, 0  ;;  %v330_v42 = vsel %vm229_vm6, %v320_v39, 0  ;;  %v751_v38 = vsel %vm229_vm6, %v734_v33, 0 }
 0x13c   :  { %v998_v43 = vrot.slane %v995_v40, 4  ;;  %345 = vmatpush.bf16.msra.mxu0 %v327_v41  ;;  %359 = vmatpush.bf16.msrb.mxu1 %v330_v42  ;;  %v1142_v42 = vld [vmem:[#allocation2 + $0x14] sm:$0xf] }
 0x13e   :  { %v1001_v44 = vsel %vm470_vm9, %v998_v43, %v995_v40  ;;  %v1002_v45 = vsel %vm100_vm0, %v998_v43, %v999_v23  ;;  %v862_v46 = vld.sshfl [vmem:[#allocation1 + $0x8] sm:$0xff pattern:$0x75316420]  ;;  %v861_v47 = vld.sshfl [vmem:[#allocation1] sm:$0xff pattern:$0x75316420] }
 0x13f   :  { %v1007_v48 = vmul.f32 %v1001_v44, %v3452_v51  ;;  %v1003_v49 = vsel %vm470_vm9, %v1002_v45, %v997_v18  ;;  %v864_v28 = vld.sshfl [vmem:[#allocation1 + $0x18] sm:$0xff pattern:$0x75316420]  ;;  %v863_v50 = vld.sshfl [vmem:[#allocation1 + $0x10] sm:$0xff pattern:$0x75316420]  ;;  %v872_v0 = vpack.c.bf16 %v862_v46, %v862_v46  ;;  %v871_v1 = vpack.c.bf16 %v861_v47, %v861_v47  ;;  %2951 = vmatmul.msk.bf16.vlgmr.msra.gmra.mxu0 %vm225_vm7, %v3210_v15 }
 0x140   :  { %v1008_v53 = vmul.f32 %v1003_v49, %v3454_v52  ;;  %v874_v56 = vpack.c.bf16 %v864_v28, %v864_v28  ;;  %v873_v57 = vpack.c.bf16 %v863_v50, %v863_v50  ;;  %v1025_v7 = vld.sshfl [vmem:[#allocation1 + $0x20] sm:$0xff pattern:$0x75316420]  ;;  %2952 = vmatmul.msk.bf16.vlgmr.msrb.gmra.mxu1 %vm225_vm7, %v3210_v15  ;;  %2953 = vmatmul.msk.bf16.vlgmr.msra.gmra.mxu2 %vm225_vm7, %v3210_v15  ;;  %v745_v45 = vsel %vm229_vm6, %v732_v35, 0  ;;  %v1302_v28 = vld [vmem:[#allocation2 + $0x14] sm:$0xf] }
 0x141   :  { %v469_v58 = vpop.permute.xlu0 %468  ;;  %1016 = vst [vmem:[#allocation1] ss:$2 sm:$0xff] %v1007_v48  ;;  %v1035_v9 = vpack.c.bf16 %v1025_v7, %v1025_v7  ;;  %v3214_v48 = vld [vmem:[%s4461_s7 + $0x20] sm:$0xff] }
 0x142   :  { %v474_v59 = vsel %vm470_vm9, %v467_v11, %v469_v58  ;;  %892 = vrot.lane.b32.xlu0 %v874_v56, %s3307_s25  ;;  %890 = vrot.lane.b32.xlu2 %v873_v57, %s3307_s25  ;;  %1018 = vst [vmem:[#allocation1 + $0x10] ss:$2 sm:$0xff] %v1008_v53 }
 0x143   :  { %v488_v60 = vsel %vm229_vm6, %v474_v59, 0  ;;  %v463_v62 = vpop.permute.xlu1 %462 }
 0x144   :  { %v472_v54 = vsel %vm470_vm9, %v463_v62, %v465_v21  ;;  %539 = vmatpush.bf16.msra.mxu3 %v488_v60  ;;  %v733_v21 = vpack.c.bf16 %v3577_v30, %v3577_v30  ;;  %v735_v30 = vpack.c.bf16 %v3584_v22, %v3584_v22 }
 0x145   :  { %v482_v63 = vsel %vm229_vm6, %v472_v54, 0 }
 0x146   :  { %511 = vmatpush.bf16.msra.mxu1 %v482_v63  ;;  %v748_v29 = vsel %vm229_vm6, %v733_v21, 0  ;;  %v754_v39 = vsel %vm229_vm6, %v735_v30, 0 }
 0x147   :  { %2965 = vmatmul.msk.bf16.vlgmr.msra.gmra.mxu3 %vm225_vm7, %v3212_v14 }
 0x148   :  { %v1021_v10 = vld.sshfl [vmem:[#allocation1] sm:$0xff pattern:$0x75316420]  ;;  %v1022_v16 = vld.sshfl [vmem:[#allocation1 + $0x8] sm:$0xff pattern:$0x75316420] }
 0x149   :  { %v461_v2 = vpop.permute.xlu0 %460  ;;  %v1023_v3 = vld.sshfl [vmem:[#allocation1 + $0x10] sm:$0xff pattern:$0x75316420]  ;;  %v1024_v8 = vld.sshfl [vmem:[#allocation1 + $0x18] sm:$0xff pattern:$0x75316420]  ;;  %v1031_v12 = vpack.c.bf16 %v1021_v10, %v1021_v10  ;;  %v1032_v17 = vpack.c.bf16 %v1022_v16, %v1022_v16 }
 0x14a   :  { %888 = vrot.lane.b32.xlu0 %v872_v0, %s3307_s25  ;;  %886 = vrot.lane.b32.xlu2 %v871_v1, %s3307_s25  ;;  %v1033_v4 = vpack.c.bf16 %v1023_v3, %v1023_v3  ;;  %v471_v5 = vsel %vm470_vm9, %v461_v2, %v463_v62  ;;  %v1034_v11 = vpack.c.bf16 %v1024_v8, %v1024_v8 }
 0x14b   :  { %v479_v6 = vsel %vm229_vm6, %v471_v5, 0 }
 0x14c   :  { %1050 = vrot.lane.b32.xlu1 %v1033_v4, %s3306_s24  ;;  %497 = vmatpush.bf16.msrb.mxu0 %v479_v6 }
 0x14f   :  { %2962 = vmatmul.msk.bf16.vlgmr.msrb.gmra.mxu0 %vm225_vm7, %v3212_v14 }
 0x150   :  { %2963 = vmatmul.msk.bf16.vlgmr.msra.gmra.mxu1 %vm225_vm7, %v3212_v14  ;;  %2964 = vmatmul.msk.bf16.vlgmr.msrb.gmra.mxu2 %vm225_vm7, %v3212_v14 }
 0x152   :  { %1054 = vrot.lane.b32.xlu0 %v1035_v9, %s3306_s24  ;;  %1052 = vrot.lane.b32.xlu2 %v1034_v11, %s3306_s24 }
 0x154   :  { %1046 = vrot.lane.b32.xlu1 %v1031_v12, %s3306_s24 }
 0x15a   :  { %1048 = vrot.lane.b32.xlu2 %v1032_v17, %s3306_s24  ;;  %s3318_s24 = smov 9  }
 0x174   :  { %v625_v13 = vpop.permute.xlu2 %624 }
 0x17c   :  { %v1155_v55 = vpop.permute.xlu2 %1154 }
 0x17d   :  { %v1158_v18 = vrot.slane %v1155_v55, 4 }
 0x17f   :  { %v1161_v19 = vsel %vm220_vm5, %v1158_v18, %v1155_v55 }
 0x180   :  { %v1167_v20 = vmul.f32 %v1161_v19, %v3452_v51 }
 0x182   :  { %1176 = vst [vmem:[#allocation1] ss:$2 sm:$0xff] %v1167_v20 }
 0x184   :  { %v623_v23 = vpop.permute.xlu2 %622 }
 0x185   :  { %v632_v25 = vsel %vm630_vm10, %v623_v23, %v625_v13 }
 0x186   :  { %v642_v27 = vsel %vm229_vm6, %v632_v25, 0 }
 0x187   :  { %671 = vmatpush.bf16.msrb.mxu1 %v642_v27 }
 0x189   :  { %v1182_v3 = vld.sshfl [vmem:[#allocation1 + $0x8] sm:$0xff pattern:$0x75316420]  ;;  %v1181_v8 = vld.sshfl [vmem:[#allocation1] sm:$0xff pattern:$0x75316420] }
 0x18a   :  { %v629_v32 = vpop.permute.xlu1 %628  ;;  %2974 = vmatmul.msk.bf16.vlgmr.msrb.gmra.mxu1 %vm225_vm7, %v3213_v31  ;;  %v1192_v10 = vpack.c.bf16 %v1182_v3, %v1182_v3  ;;  %v1191_v11 = vpack.c.bf16 %v1181_v8, %v1181_v8 }
 0x18b   :  { %777 = vmatpush.bf16.msra.mxu1 %v748_v29  ;;  %v3215_v29 = vld [vmem:[%s4461_s7 + $0x28] sm:$0xff] }
 0x18c   :  { %v627_v34 = vpop.permute.xlu0 %626 }
 0x18d   :  { %v633_v36 = vsel %vm630_vm10, %v625_v13, %v627_v34  ;;  %v634_v26 = vsel %vm630_vm10, %v627_v34, %v629_v32 }
 0x18e   :  { %v645_v37 = vsel %vm229_vm6, %v633_v36, 0  ;;  %v648_v61 = vsel %vm229_vm6, %v634_v26, 0 }
 0x18f   :  { %685 = vmatpush.bf16.msra.mxu2 %v645_v37  ;;  %699 = vmatpush.bf16.msrb.mxu3 %v648_v61 }
 0x192   :  { %v621_v22 = vpop.permute.xlu1 %620  ;;  %2975 = vmatmul.msk.bf16.vlgmr.msra.gmra.mxu2 %vm225_vm7, %v3213_v31  ;;  %2976 = vmatmul.msk.bf16.vlgmr.msrb.gmra.mxu3 %vm225_vm7, %v3213_v31 }
 0x193   :  { %791 = vmatpush.bf16.msrb.mxu2 %v751_v38  ;;  %805 = vmatpush.bf16.msra.mxu3 %v754_v39  ;;  %v631_v40 = vsel %vm630_vm10, %v621_v22, %v623_v23 }
 0x194   :  { %v639_v41 = vsel %vm229_vm6, %v631_v40, 0  ;;  %v1157_v43 = vpop.permute.xlu0 %1156 }
 0x195   :  { %v1159_v44 = vrot.slane %v1157_v43, 4  ;;  %657 = vmatpush.bf16.msra.mxu0 %v639_v41 }
 0x197   :  { %v1162_v46 = vsel %vm100_vm0, %v1158_v18, %v1159_v44  ;;  %v1169_v47 = vmul.f32 %v1159_v44, %v1142_v42 }
 0x198   :  { %v1163_v24 = vsel %vm220_vm5, %v1162_v46, %v1157_v43  ;;  %2973 = vmatmul.msk.bf16.vlgmr.msra.gmra.mxu0 %vm225_vm7, %v3213_v31  ;;  %v3216_v46 = vld [vmem:[%s4461_s7 + $0x30] sm:$0xff] }
 0x199   :  { %763 = vmatpush.bf16.msrb.mxu0 %v745_v45  ;;  %v1168_v49 = vmul.f32 %v1163_v24, %v3454_v52  ;;  %1180 = vst [vmem:[#allocation1 + $0x20] ss:$2 sm:$0xff] %v1169_v47 }
 0x19a   :  { %v1317_v50 = vpop.permute.xlu1 %1316  ;;  %2984 = vmatmul.msk.bf16.vlgmr.msra.gmra.mxu1 %vm225_vm7, %v3214_v48 }
 0x19b   :  { %1178 = vst [vmem:[#allocation1 + $0x10] ss:$2 sm:$0xff] %v1168_v49  ;;  %v1319_v53 = vrot.slane %v1317_v50, 4 }
 0x19c   :  { %v1315_v56 = vpop.permute.xlu0 %1314  ;;  %v891_v63 = vpop.permute.xlu2 %890 }
 0x19d   :  { %v1329_v57 = vmul.f32 %v1319_v53, %v1302_v28  ;;  %v1318_v58 = vrot.slane %v1315_v56, 4 }
 0x19f   :  { %v1321_v59 = vsel %vm318_vm8, %v1318_v58, %v1315_v56  ;;  %v1322_v60 = vsel %vm100_vm0, %v1318_v58, %v1319_v53 }
 0x1a0   :  { %v1323_v62 = vsel %vm318_vm8, %v1322_v60, %v1317_v50  ;;  %v1327_v54 = vmul.f32 %v1321_v59, %v3452_v51  ;;  %v1185_v0 = vld.sshfl [vmem:[#allocation1 + $0x20] sm:$0xff pattern:$0x75316420] }
 0x1a1   :  { %v1328_v1 = vmul.f32 %v1323_v62, %v3454_v52  ;;  %v1195_v2 = vpack.c.bf16 %v1185_v0, %v1185_v0  ;;  %1340 = vst [vmem:[#allocation1 + $0x20] ss:$2 sm:$0xff] %v1329_v57 }
 0x1a2   :  { %v1184_v4 = vld.sshfl [vmem:[#allocation1 + $0x18] sm:$0xff pattern:$0x75316420]  ;;  %v1183_v5 = vld.sshfl [vmem:[#allocation1 + $0x10] sm:$0xff pattern:$0x75316420]  ;;  %2985 = vmatmul.msk.bf16.vlgmr.msrb.gmra.mxu2 %vm225_vm7, %v3214_v48  ;;  %2986 = vmatmul.msk.bf16.vlgmr.msra.gmra.mxu3 %vm225_vm7, %v3214_v48  ;;  %v251_v14 = vpop.f32.mrf.mxu2 }
 0x1a3   :  { %1214 = vrot.lane.b32.xlu2 %v1195_v2, %s3305_s6  ;;  %v1194_v6 = vpack.c.bf16 %v1184_v4, %v1184_v4  ;;  %v1193_v7 = vpack.c.bf16 %v1183_v5, %v1183_v5  ;;  %1338 = vst [vmem:[#allocation1 + $0x10] ss:$2 sm:$0xff] %v1328_v1 }
 0x1a4   :  { %1336 = vst [vmem:[#allocation1] ss:$2 sm:$0xff] %v1327_v54  ;;  %v887_v51 = vpop.permute.xlu2 %886  ;;  %v293_v43 = vpop.f32.mrf.mxu3 }
 0x1a5   :  { %1212 = vrot.lane.b32.xlu1 %v1194_v6, %s3305_s6  ;;  %1210 = vrot.lane.b32.xlu0 %v1193_v7, %s3305_s6  ;;  %v3709_v49 = vpop.f32.mrf.mxu1 }
 0x1a8   :  { %2983 = vmatmul.msk.bf16.vlgmr.msrb.gmra.mxu0 %vm225_vm7, %v3214_v48  ;;  %v1345_v12 = vld.sshfl [vmem:[#allocation1 + $0x20] sm:$0xff pattern:$0x75316420] }
 0x1a9   :  { %v1355_v13 = vpack.c.bf16 %v1345_v12, %v1345_v12 }
 0x1aa   :  { %v1343_v52 = vld.sshfl [vmem:[#allocation1 + $0x10] sm:$0xff pattern:$0x75316420]  ;;  %v1344_v16 = vld.sshfl [vmem:[#allocation1 + $0x18] sm:$0xff pattern:$0x75316420]  ;;  %v3689_v30 = vpop.f32.mrf.mxu2 }
 0x1ab   :  { %v1353_v9 = vpack.c.bf16 %v1343_v52, %v1343_v52  ;;  %v1341_v15 = vld.sshfl [vmem:[#allocation1] sm:$0xff pattern:$0x75316420]  ;;  %v1354_v20 = vpack.c.bf16 %v1344_v16, %v1344_v16  ;;  %v1342_v31 = vld.sshfl [vmem:[#allocation1 + $0x8] sm:$0xff pattern:$0x75316420] }
 0x1ac   :  { %v895_v17 = vpop.permute.xlu1 %894  ;;  %v1351_v55 = vpack.c.bf16 %v1341_v15, %v1341_v15  ;;  %v1053_v18 = vpop.permute.xlu2 %1052  ;;  %v1352_v33 = vpack.c.bf16 %v1342_v31, %v1342_v31 }
 0x1ad   :  { %1370 = vrot.lane.b32.xlu2 %v1353_v9, %s3304_s1  ;;  %1208 = vrot.lane.b32.xlu1 %v1192_v10, %s3305_s6  ;;  %v3715_v50 = vpop.f32.mrf.mxu3  ;;  %v267_v56 = vpop.f32.mrf.mxu1 }
 0x1ae   :  { %1206 = vrot.lane.b32.xlu0 %v1191_v11, %s3305_s6 }
 0x1b2   :  { %v279_v47 = vpop.f32.mrf.mxu2 }
 0x1b4   :  { %v893_v19 = vpop.permute.xlu0 %892  ;;  %v1049_v26 = vpop.permute.xlu2 %1048 }
 0x1b5   :  { %v899_v21 = vsel %vm574_vm4, %v891_v63, %v893_v19  ;;  %v900_v23 = vsel %vm574_vm4, %v893_v19, %v895_v17  ;;  %1374 = vrot.lane.b32.xlu1 %v1355_v13, %s3304_s1  ;;  %1366 = vrot.lane.b32.xlu2 %v1351_v55, %s3304_s1  ;;  %v389_v59 = vpop.f32.mrf.mxu3 }
 0x1b6   :  { %v911_v25 = vsel %vm229_vm6, %v899_v21, 0  ;;  %v914_v27 = vsel %vm229_vm6, %v900_v23, 0  ;;  %1372 = vrot.lane.b32.xlu0 %v1354_v20, %s3304_s1  ;;  %v390_v62 = vadd.f32 %v389_v59, %v293_v43  ;;  %v3218_v59 = vld [vmem:[%s4461_s7 + $0x40] sm:$0xff] }
 0x1b7   :  { %951 = vmatpush.bf16.msra.mxu2 %v911_v25  ;;  %965 = vmatpush.bf16.msrb.mxu3 %v914_v27 }
 0x1ba   :  { %2996 = vmatmul.msk.bf16.vlgmr.msra.gmra.mxu2 %vm225_vm7, %v3215_v29  ;;  %2997 = vmatmul.msk.bf16.vlgmr.msrb.gmra.mxu3 %vm225_vm7, %v3215_v29  ;;  %v3713_v28 = vpop.f32.mrf.mxu2 }
 0x1bc   :  { %v889_v32 = vpop.permute.xlu0 %888  ;;  %v347_v53 = vpop.f32.mrf.mxu0 }
 0x1bd   :  { %v897_v34 = vsel %vm574_vm4, %v887_v51, %v889_v32  ;;  %v898_v36 = vsel %vm574_vm4, %v889_v32, %v891_v63  ;;  %v348_v57 = vadd.f32 %v347_v53, %v251_v14  ;;  %v3721_v63 = vpop.f32.mrf.mxu1  ;;  %v3725_v1 = vpop.f32.mrf.mxu3 }
 0x1be   :  { %v905_v37 = vsel %vm229_vm6, %v897_v34, 0  ;;  %v908_v61 = vsel %vm229_vm6, %v898_v36, 0  ;;  %v1051_v38 = vpop.permute.xlu1 %1050  ;;  %1368 = vrot.lane.b32.xlu0 %v1352_v33, %s3304_s1  ;;  %v3217_v34 = vld [vmem:[%s4461_s7 + $0x38] sm:$0xff] }
 0x1bf   :  { %v1058_v39 = vsel %vm414_vm3, %v1049_v26, %v1051_v38  ;;  %v1059_v35 = vsel %vm414_vm3, %v1051_v38, %v1053_v18  ;;  %923 = vmatpush.bf16.msra.mxu0 %v905_v37  ;;  %937 = vmatpush.bf16.msrb.mxu1 %v908_v61 }
 0x1c0   :  { %v1068_v22 = vsel %vm229_vm6, %v1058_v39, 0  ;;  %v1071_v40 = vsel %vm229_vm6, %v1059_v35, 0 }
 0x1c1   :  { %1111 = vmatpush.bf16.msrb.mxu2 %v1071_v40 }
 0x1c2   :  { %2994 = vmatmul.msk.bf16.vlgmr.msra.gmra.mxu0 %vm225_vm7, %v3215_v29  ;;  %2995 = vmatmul.msk.bf16.vlgmr.msrb.gmra.mxu1 %vm225_vm7, %v3215_v29 }
 0x1c3   :  { %1097 = vmatpush.bf16.msra.mxu1 %v1068_v22  ;;  %v375_v58 = vpop.f32.mrf.mxu2 }
 0x1c4   :  { %v1055_v41 = vpop.permute.xlu0 %1054  ;;  %v376_v60 = vadd.f32 %v375_v58, %v279_v47  ;;  %v3719_v54 = vpop.f32.mrf.mxu0 }
 0x1c5   :  { %v1060_v42 = vsel %vm414_vm3, %v1053_v18, %v1055_v41  ;;  %v363_v2 = vpop.f32.mrf.mxu1 }
 0x1c6   :  { %v1074_v44 = vsel %vm229_vm6, %v1060_v42, 0  ;;  %v1047_v45 = vpop.permute.xlu1 %1046  ;;  %v364_v4 = vadd.f32 %v363_v2, %v267_v56 }
 0x1c7   :  { %v1057_v24 = vsel %vm414_vm3, %v1047_v45, %v1049_v26  ;;  %1125 = vmatpush.bf16.msra.mxu3 %v1074_v44 }
 0x1c8   :  { %v1065_v48 = vsel %vm229_vm6, %v1057_v24, 0 }
 0x1c9   :  { %1083 = vmatpush.bf16.msrb.mxu0 %v1065_v48 }
 0x1ca   :  { %3007 = vmatmul.msk.bf16.vlgmr.msrb.gmra.mxu2 %vm225_vm7, %v3216_v46  ;;  %3008 = vmatmul.msk.bf16.vlgmr.msra.gmra.mxu3 %vm225_vm7, %v3216_v46  ;;  %v541_v7 = vpop.f32.mrf.mxu3 }
 0x1cb   :  { %v3723_v0 = vpop.f32.mrf.mxu2  ;;  %v549_v51 = vadd.f32 %v541_v7, %v390_v62  ;;  %v3250_v7 = vld [vmem:[%s4462_s3 + $0xf8] sm:$0xff] }
 0x1cc   :  { %v499_v3 = vpop.f32.mrf.mxu0 }
 0x1cd   :  { %v546_v5 = vadd.f32 %v499_v3, %v348_v57  ;;  %v3727_v52 = vpop.f32.mrf.mxu1 }
 0x1d2   :  { %3005 = vmatmul.msk.bf16.vlgmr.msrb.gmra.mxu0 %vm225_vm7, %v3216_v46  ;;  %3006 = vmatmul.msk.bf16.vlgmr.msra.gmra.mxu1 %vm225_vm7, %v3216_v46  ;;  %v3735_v16 = vpop.f32.mrf.mxu3 }
 0x1d3   :  { %v527_v6 = vpop.f32.mrf.mxu2 }
 0x1d4   :  { %v548_v8 = vadd.f32 %v527_v6, %v376_v60  ;;  %v3731_v12 = vpop.f32.mrf.mxu0  ;;  %v3242_v6 = vld [vmem:[%s4462_s3 + $0xb8] sm:$0xff] }
 0x1d5   :  { %v515_v9 = vpop.f32.mrf.mxu1 }
 0x1d6   :  { %v551_v10 = vadd.f32 %v515_v9, %v364_v4 }
 0x1db   :  { %v3733_v15 = vpop.f32.mrf.mxu2 }
 0x1fd   :  { %v1215_v18 = vpop.permute.xlu2 %1214 }
 0x207   :  { %v3729_v11 = vpop.f32.mrf.mxu1  ;;  %v1371_v43 = vpop.permute.xlu2 %1370 }
 0x20f   :  { %v675_v17 = vpop.f32.mrf.mxu1  ;;  %v1367_v60 = vpop.permute.xlu2 %1366 }
 0x210   :  { %v3737_v14 = vadd.f32 %v675_v17, %v551_v10 }
 0x215   :  { %v659_v13 = vpop.f32.mrf.mxu0  ;;  %v687_v55 = vpop.f32.mrf.mxu2 }
 0x216   :  { %v706_v19 = vadd.f32 %v659_v13, %v546_v5  ;;  %v708_v20 = vadd.f32 %v687_v55, %v548_v8  ;;  %v701_v21 = vpop.f32.mrf.mxu3 }
 0x217   :  { %v1213_v23 = vpop.permute.xlu1 %1212  ;;  %v1211_v25 = vpop.permute.xlu0 %1210  ;;  %v709_v27 = vadd.f32 %v701_v21, %v549_v51  ;;  %v3234_v21 = vld [vmem:[%s4462_s3 + $0x78] sm:$0xff] }
 0x218   :  { %v1220_v29 = vsel %vm164_vm2, %v1213_v23, %v1215_v18  ;;  %v1219_v31 = vsel %vm164_vm2, %v1211_v25, %v1213_v23  ;;  %v3787_v8 = vpop.f32.mrf.mxu1  ;;  %v3241_v23 = vld [vmem:[%s4462_s3 + $0xb0] sm:$0xff] }
 0x219   :  { %v1234_v32 = vsel %vm229_vm6, %v1220_v29, 0  ;;  %v1231_v33 = vsel %vm229_vm6, %v1219_v31, 0  ;;  %v3225_v31 = vld [vmem:[%s4462_s3 + $0x30] sm:$0xff] }
 0x21a   :  { %1271 = vmatpush.bf16.msra.mxu2 %v1231_v33  ;;  %1285 = vmatpush.bf16.msrb.mxu3 %v1234_v32  ;;  %v3233_v32 = vld [vmem:[%s4462_s3 + $0x70] sm:$0xff]  ;;  %v3240_v33 = vld [vmem:[%s4462_s3 + $0xa8] sm:$0xff] }
 0x21d   :  { %v3746_v36 = vpop.f32.mrf.mxu0  ;;  %3018 = vmatmul.msk.bf16.vlgmr.msra.gmra.mxu2 %vm225_vm7, %v3217_v34  ;;  %3019 = vmatmul.msk.bf16.vlgmr.msrb.gmra.mxu3 %vm225_vm7, %v3217_v34  ;;  %v3750_v26 = vpop.f32.mrf.mxu2 }
 0x21e   :  { %v3752_v37 = vpop.f32.mrf.mxu3 }
 0x21f   :  { %v1209_v61 = vpop.permute.xlu1 %1208 }
 0x220   :  { %v1218_v38 = vsel %vm164_vm2, %v1209_v61, %v1211_v25  ;;  %v1207_v39 = vpop.permute.xlu0 %1206  ;;  %v3793_v10 = vpop.f32.mrf.mxu1  ;;  %v3249_v25 = vld [vmem:[%s4462_s3 + $0xf0] sm:$0xff] }
 0x221   :  { %v1228_v35 = vsel %vm229_vm6, %v1218_v38, 0  ;;  %v1217_v22 = vsel %vm164_vm2, %v1207_v39, %v1209_v61  ;;  %v3224_v39 = vld [vmem:[%s4462_s3 + $0x28] sm:$0xff] }
 0x222   :  { %v1225_v40 = vsel %vm229_vm6, %v1217_v22, 0  ;;  %1257 = vmatpush.bf16.msrb.mxu1 %v1228_v35  ;;  %v3232_v35 = vld [vmem:[%s4462_s3 + $0x68] sm:$0xff]  ;;  %v3239_v22 = vld [vmem:[%s4462_s3 + $0xa0] sm:$0xff] }
 0x223   :  { %1243 = vmatpush.bf16.msra.mxu0 %v1225_v40  ;;  %v3247_v40 = vld [vmem:[%s4462_s3 + $0xe0] sm:$0xff] }
 0x225   :  { %v765_v41 = vpop.f32.mrf.mxu0  ;;  %3017 = vmatmul.msk.bf16.vlgmr.msrb.gmra.mxu1 %vm225_vm7, %v3217_v34  ;;  %v793_v42 = vpop.f32.mrf.mxu2 }
 0x226   :  { %v3759_v44 = vadd.f32 %v765_v41, %v706_v19  ;;  %3016 = vmatmul.msk.bf16.vlgmr.msra.gmra.mxu0 %vm225_vm7, %v3217_v34  ;;  %v3762_v45 = vadd.f32 %v793_v42, %v708_v20  ;;  %v807_v46 = vpop.f32.mrf.mxu3  ;;  %v3226_v20 = vld [vmem:[%s4462_s3 + $0x38] sm:$0xff]  ;;  %v3248_v34 = vld [vmem:[%s4462_s3 + $0xe8] sm:$0xff]  ;;  %v3223_v41 = vld [vmem:[%s4462_s3 + $0x20] sm:$0xff] }
 0x227   :  { %v1375_v47 = vpop.permute.xlu1 %1374  ;;  %v3764_v24 = vadd.f32 %v807_v46, %v709_v27  ;;  %v3231_v42 = vld [vmem:[%s4462_s3 + $0x60] sm:$0xff]  ;;  %v3246_v46 = vld [vmem:[%s4462_s3 + $0xd8] sm:$0xff] }
 0x228   :  { %v1373_v48 = vpop.permute.xlu0 %1372 }
 0x229   :  { %v1379_v53 = vsel %vm109_vm1, %v1371_v43, %v1373_v48  ;;  %v1380_v56 = vsel %vm109_vm1, %v1373_v48, %v1375_v47 }
 0x22a   :  { %v1391_v57 = vsel %vm229_vm6, %v1379_v53, 0  ;;  %v1394_v58 = vsel %vm229_vm6, %v1380_v56, 0 }
 0x22b   :  { %1431 = vmatpush.bf16.msrb.mxu2 %v1391_v57  ;;  %1445 = vmatpush.bf16.msra.mxu3 %v1394_v58  ;;  %v3222_v57 = vld [vmem:[%s4462_s3 + $0x18] sm:$0xff] }
 0x22c   :  { %v3230_v58 = vld [vmem:[%s4462_s3 + $0x58] sm:$0xff] }
 0x22d   :  { %v3789_v51 = vpop.f32.mrf.mxu2  ;;  %v3795_v17 = vpop.f32.mrf.mxu0 }
 0x22e   :  { %3029 = vmatmul.msk.bf16.vlgmr.msrb.gmra.mxu2 %vm225_vm7, %v3218_v59  ;;  %3030 = vmatmul.msk.bf16.vlgmr.msra.gmra.mxu3 %vm225_vm7, %v3218_v59  ;;  %v3791_v9 = vpop.f32.mrf.mxu3 }
 0x22f   :  { %1748 = vmatpush.bf16.msra.mxu2 %v3242_v6  ;;  %1762 = vmatpush.bf16.msrb.mxu3 %v3250_v7 }
 0x230   :  { %v1369_v62 = vpop.permute.xlu0 %1368 }
 0x231   :  { %v1377_v2 = vsel %vm109_vm1, %v1367_v60, %v1369_v62  ;;  %v1378_v3 = vsel %vm109_vm1, %v1369_v62, %v1371_v43  ;;  %v3238_v43 = vld [vmem:[%s4462_s3 + $0x98] sm:$0xff]  ;;  %v3245_v60 = vld [vmem:[%s4462_s3 + $0xd0] sm:$0xff]  ;;  %vm2075_vm1 = vcmask 982016  }
 0x232   :  { %v1385_v4 = vsel %vm229_vm6, %v1377_v2, 0  ;;  %v1388_v5 = vsel %vm229_vm6, %v1378_v3, 0  ;;  %v3221_v62 = vld [vmem:[%s4462_s3 + $0x10] sm:$0xff]  ;;  %v3236_v3 = vld [vmem:[%s4462_s3 + $0x88] sm:$0xff] }
 0x233   :  { %1403 = vmatpush.bf16.msrb.mxu0 %v1385_v4  ;;  %1417 = vmatpush.bf16.msra.mxu1 %v1388_v5  ;;  %v3229_v2 = vld [vmem:[%s4462_s3 + $0x50] sm:$0xff]  ;;  %v3244_v4 = vld [vmem:[%s4462_s3 + $0xc8] sm:$0xff]  ;;  %v1776_v5 = vld [vmem:[%s4464_s8] sm:$0xff] }
 0x234   :  { %1749 = vmatpush.bf16.msra.mxu2 %v3241_v23  ;;  %1763 = vmatpush.bf16.msrb.mxu3 %v3249_v25 }
 0x235   :  { %1779 = vperm.xlu1 %3269, %v1776_v5  }
 0x236   :  { %3027 = vmatmul.msk.bf16.vlgmr.msrb.gmra.mxu0 %vm225_vm7, %v3218_v59  ;;  %3028 = vmatmul.msk.bf16.vlgmr.msra.gmra.mxu1 %vm225_vm7, %v3218_v59  ;;  %v3237_v59 = vld [vmem:[%s4462_s3 + $0x90] sm:$0xff] }
 0x237   :  { %1720 = vmatpush.bf16.msra.mxu0 %v3226_v20  ;;  %1734 = vmatpush.bf16.msrb.mxu1 %v3234_v21  ;;  %v3220_v20 = vld [vmem:[%s4462_s3 + $0x8] sm:$0xff] }
 0x238   :  { %1750 = vmatpush.bf16.msra.mxu2 %v3240_v33  ;;  %1764 = vmatpush.bf16.msrb.mxu3 %v3248_v34  ;;  %v3228_v21 = vld [vmem:[%s4462_s3 + $0x48] sm:$0xff]  ;;  %v3219_v33 = vld [vmem:[%s4462_s3] sm:$0xff] }
 0x239   :  { %v3227_v34 = vld [vmem:[%s4462_s3 + $0x40] sm:$0xff] }
 0x23b   :  { %1721 = vmatpush.bf16.msra.mxu0 %v3225_v31  ;;  %1735 = vmatpush.bf16.msrb.mxu1 %v3233_v32  ;;  %v3235_v31 = vld [vmem:[%s4462_s3 + $0x80] sm:$0xff] }
 0x23c   :  { %1751 = vmatpush.bf16.msra.mxu2 %v3239_v22  ;;  %1765 = vmatpush.bf16.msrb.mxu3 %v3247_v40  ;;  %v3243_v32 = vld [vmem:[%s4462_s3 + $0xc0] sm:$0xff]  ;;  %s3315_s3 = smov 120  }
 0x23d   :  { %v3797_v13 = vpop.f32.mrf.mxu2  ;;  %v3799_v55 = vpop.f32.mrf.mxu3  ;;  %v3271_v22 = vld [vmem:[%s4463_s2 + $0x2] ss:$0 sm:$0xff]  ;;  %v3272_v40 = vld [vmem:[%s4463_s2 + $0x1] ss:$0 sm:$0xff] }
 0x23e   :  { %1877 = vrot.lane.b32.xlu1 %v3271_v22, %s3314_s22  ;;  %1810 = vrot.lane.b32.xlu0 %v3272_v40, %s3315_s3 }
 0x23f   :  { %v3801_v18 = vpop.f32.mrf.mxu1  ;;  %v3803_v19 = vpop.f32.mrf.mxu0  ;;  %1722 = vmatpush.bf16.msra.mxu0 %v3224_v39  ;;  %1736 = vmatpush.bf16.msrb.mxu1 %v3232_v35 }
 0x240   :  { %1752 = vmatpush.bf16.msra.mxu2 %v3238_v43  ;;  %1766 = vmatpush.bf16.msrb.mxu3 %v3246_v46  ;;  %v378_v46 = vadd.f32 %v3723_v0, %v3713_v28 }
 0x242   :  { %v552_v0 = vadd.f32 %v3733_v15, %v378_v46  ;;  %v3275_v15 = vld [vmem:[%s4463_s2 + $0x8] ss:$0 sm:$0xff] }
 0x243   :  { %1723 = vmatpush.bf16.msra.mxu0 %v3223_v41  ;;  %1737 = vmatpush.bf16.msrb.mxu1 %v3231_v42  ;;  %v1783_v42 = vld [vmem:[%s4465_s9] sm:$0xff] }
 0x244   :  { %1753 = vmatpush.bf16.msra.mxu2 %v3237_v59  ;;  %1767 = vmatpush.bf16.msrb.mxu3 %v3245_v60  ;;  %v3274_v59 = vld [vmem:[%s4463_s2] ss:$0 sm:$0xff]  ;;  %v362_v60 = vadd.f32 %v3721_v63, %v3709_v49 }
 0x245   :  { %v3817_v27 = vpop.f32.mrf.mxu2  ;;  %v3819_v29 = vpop.f32.mrf.mxu3  ;;  %1786 = vperm.xlu2 %3270, %v1783_v42  }
 0x246   :  { %1799 = vrot.lane.b32.xlu0 %v3274_v59, %s3317_s30  ;;  %v547_v49 = vadd.f32 %v3727_v52, %v362_v60  ;;  %v3278_v52 = vld [vmem:[%s4463_s2 + $0x7] ss:$0 sm:$0xff] }
 0x247   :  { %v3833_v61 = vpop.f32.mrf.mxu1  ;;  %v3835_v38 = vpop.f32.mrf.mxu0  ;;  %1724 = vmatpush.bf16.msra.mxu0 %v3222_v57  ;;  %1738 = vmatpush.bf16.msrb.mxu1 %v3230_v58  ;;  %v392_v57 = vadd.f32 %v3725_v1, %v3715_v50  ;;  %v3273_v58 = vld [vmem:[%s4463_s2 + $0x6] ss:$0 sm:$0xff]  ;;  %v350_v50 = vadd.f32 %v3719_v54, %v3689_v30  ;;  %v712_v30 = vadd.f32 %v3750_v26, %v552_v0 }
 0x248   :  { %1754 = vmatpush.bf16.msra.mxu2 %v3236_v3  ;;  %1768 = vmatpush.bf16.msrb.mxu3 %v3244_v4  ;;  %v707_v5 = vadd.f32 %v3729_v11, %v547_v49 }
 0x249   :  { %v553_v1 = vadd.f32 %v3735_v16, %v392_v57  ;;  %2020 = vrot.lane.b32.xlu1 %v3273_v58, %s3316_s5  ;;  %v550_v4 = vadd.f32 %v3731_v12, %v350_v50  ;;  %v3276_v16 = vld [vmem:[%s4463_s2 + $0x5] ss:$0 sm:$0xff] }
 0x24a   :  { %v813_v11 = vadd.f32 %v3787_v8, %v707_v5  ;;  %v972_v8 = vadd.f32 %v3803_v19, %v3759_v44 }
 0x24b   :  { %1725 = vmatpush.bf16.msra.mxu0 %v3221_v62  ;;  %1739 = vmatpush.bf16.msrb.mxu1 %v3229_v2  ;;  %v3277_v62 = vld [vmem:[%s4463_s2 + $0x3] ss:$0 sm:$0xff]  ;;  %v713_v54 = vadd.f32 %v3752_v37, %v553_v1  ;;  %v710_v12 = vadd.f32 %v3746_v36, %v550_v4  ;;  %v818_v37 = vadd.f32 %v3789_v51, %v712_v30 }
 0x24c   :  { %1755 = vmatpush.bf16.msra.mxu2 %v3235_v31  ;;  %1769 = vmatpush.bf16.msrb.mxu3 %v3243_v32  ;;  %v817_v32 = vadd.f32 %v3793_v10, %v3737_v14  ;;  %v974_v51 = vadd.f32 %v3797_v13, %v3762_v45  ;;  %v973_v14 = vadd.f32 %v3801_v18, %v813_v11 }
 0x24d   :  { %v3861_v47 = vpop.f32.mrf.mxu2  ;;  %v3863_v48 = vpop.f32.mrf.mxu3  ;;  %1917 = vrot.lane.b32.xlu2 %v3277_v62, %s3307_s25  ;;  %v816_v31 = vadd.f32 %v3795_v17, %v710_v12 }
 0x24e   :  { %1981 = vrot.lane.b32.xlu0 %v3276_v16, %s3312_s20  ;;  %v977_v22 = vadd.f32 %v3833_v61, %v817_v32  ;;  %v1134_v40 = vadd.f32 %v3861_v47, %v974_v51 }
 0x24f   :  { %v3865_v53 = vpop.f32.mrf.mxu1  ;;  %v3867_v56 = vpop.f32.mrf.mxu0  ;;  %1726 = vmatpush.bf16.msra.mxu0 %v3220_v20  ;;  %1740 = vmatpush.bf16.msrb.mxu1 %v3228_v21  ;;  %v819_v21 = vadd.f32 %v3791_v9, %v713_v54  ;;  %v975_v9 = vadd.f32 %v3799_v55, %v3764_v24  ;;  %v976_v10 = vadd.f32 %v3835_v38, %v816_v31 }
 0x250   :  { %v1132_v55 = vadd.f32 %v3867_v56, %v972_v8 }
 0x251   :  { %2100 = vrot.lane.b32.xlu1 %v3275_v15, %s3318_s24  ;;  %v979_v17 = vadd.f32 %v3819_v29, %v819_v21  ;;  %v1135_v45 = vadd.f32 %v3863_v48, %v975_v9 }
 0x253   :  { %1727 = vmatpush.bf16.msra.mxu0 %v3219_v33  ;;  %1741 = vmatpush.bf16.msrb.mxu1 %v3227_v34  ;;  %v978_v34 = vadd.f32 %v3817_v27, %v818_v37  ;;  %v1133_v27 = vadd.f32 %v3865_v53, %v973_v14 }
 0x255   :  { %v3896_v6 = vpop.f32.mrf.mxu2  ;;  %v3898_v7 = vpop.f32.mrf.mxu3  ;;  %2060 = vrot.lane.b32.xlu2 %v3278_v52, %s3319_s23 }
 0x256   :  { %v1138_v13 = vadd.f32 %v3896_v6, %v978_v34  ;;  %v1139_v24 = vadd.f32 %v3898_v7, %v979_v17 }
 0x257   :  { %v3906_v23 = vpop.f32.mrf.mxu1  ;;  %v3908_v25 = vpop.f32.mrf.mxu0 }
 0x258   :  { %v1136_v44 = vadd.f32 %v3908_v25, %v976_v10  ;;  %v1137_v18 = vadd.f32 %v3906_v23, %v977_v22 }
 0x29f   :  { %v1787_v15 = vpop.permute.xlu2 %1786 }
 0x2a0   :  { %v3922_v39 = vpop.f32.mrf.mxu2  ;;  %v3924_v35 = vpop.f32.mrf.mxu3 }
 0x2a1   :  { %v1294_v19 = vadd.f32 %v3922_v39, %v1134_v40  ;;  %v1295_v29 = vadd.f32 %v3924_v35, %v1135_v45 }
 0x2a2   :  { %v3932_v41 = vpop.f32.mrf.mxu1 }
 0x2a3   :  { %v3939_v43 = vpop.f32.mrf.mxu0  ;;  %v1293_v48 = vadd.f32 %v3932_v41, %v1133_v27 }
 0x2a4   :  { %v1292_v47 = vadd.f32 %v3939_v43, %v1132_v55 }
 0x2a7   :  { %v1780_v41 = vpop.permute.xlu1 %1779  ;;  %v1918_v21 = vpop.permute.xlu2 %1917 }
 0x2a8   :  { %v1275_v2 = vpop.f32.mrf.mxu2  ;;  %v1289_v28 = vpop.f32.mrf.mxu3  ;;  %v1920_v14 = vmul.f32 0.0, %v1918_v21 }
 0x2a9   :  { %v1298_v61 = vadd.f32 %v1275_v2, %v1138_v13  ;;  %v1299_v38 = vadd.f32 %v1289_v28, %v1139_v24 }
 0x2aa   :  { %v1261_v3 = vpop.f32.mrf.mxu1  ;;  %v1924_v40 = vpack.c.bf16 %v1920_v14, %v1920_v14 }
 0x2ab   :  { %v1247_v63 = vpop.f32.mrf.mxu0  ;;  %v1297_v7 = vadd.f32 %v1261_v3, %v1137_v18 }
 0x2ac   :  { %v1296_v6 = vadd.f32 %v1247_v63, %v1136_v44 }
 0x2af   :  { %v2061_v45 = vpop.permute.xlu2 %2060 }
 0x2b0   :  { %v1878_v50 = vpop.permute.xlu1 %1877  ;;  %v1811_v0 = vpop.permute.xlu0 %1810  ;;  %v2064_v13 = vmul.f32 0.0, %v2061_v45 }
 0x2b1   :  { %v1433_v20 = vpop.f32.mrf.mxu2  ;;  %v1447_v26 = vpop.f32.mrf.mxu3  ;;  %v1880_v1 = vmul.f32 0.0, %v1878_v50  ;;  %v1813_v3 = vmul.f32 0.0, %v1811_v0 }
 0x2b2   :  { %v1454_v46 = vadd.f32 %v1433_v20, %v1294_v19  ;;  %v1455_v53 = vadd.f32 %v1447_v26, %v1295_v29  ;;  %v2068_v27 = vpack.c.bf16 %v2064_v13, %v2064_v13  ;;  %v4102_v13 = vld [vmem:[%s4469_s4 + $0x78] sm:$0xff] }
 0x2b3   :  { %v1405_v33 = vpop.f32.mrf.mxu0  ;;  %v1419_v36 = vpop.f32.mrf.mxu1  ;;  %v1884_v49 = vpack.c.bf16 %v1880_v1, %v1880_v1  ;;  %v1817_v63 = vpack.c.bf16 %v1813_v3, %v1813_v3  ;;  %v3159_v1 = vld [vmem:[%s4468_s10 + $0x4] sm:$0xf] }
 0x2b4   :  { %v1452_v58 = vadd.f32 %v1405_v33, %v1292_v47  ;;  %v1453_v23 = vadd.f32 %v1419_v36, %v1293_v48 }
 0x2b5   :  { %1888 = vrot.lane.b32.xlu1 %v1884_v49, %s3316_s5  ;;  %1821 = vrot.lane.b32.xlu2 %v1817_v63, %s3319_s23 }
 0x2b8   :  { %v1800_v51 = vpop.permute.xlu0 %1799 }
 0x2b9   :  { %v1435_v42 = vpop.f32.mrf.mxu2  ;;  %v1449_v56 = vpop.f32.mrf.mxu3  ;;  %v1802_v17 = vmul.f32 0.0, %v1800_v51 }
 0x2ba   :  { %v1458_v57 = vadd.f32 %v1435_v42, %v1298_v61  ;;  %v1459_v25 = vadd.f32 %v1449_v56, %v1299_v38 }
 0x2bb   :  { %v1407_v59 = vpop.f32.mrf.mxu0  ;;  %v1421_v39 = vpop.f32.mrf.mxu1  ;;  %v1805_v10 = vpack.c.bf16 %v1802_v17, %v1802_v17  ;;  %v3172_v17 = vld [vmem:[%s4468_s10 + $0x1c] sm:$0xf] }
 0x2bc   :  { %v1462_v60 = vpack.c.bf16 %v1458_v57, %v1454_v46  ;;  %v1463_v35 = vpack.c.bf16 %v1459_v25, %v1455_v53  ;;  %v1456_v62 = vadd.f32 %v1407_v59, %v1296_v6  ;;  %v1457_v2 = vadd.f32 %v1421_v39, %v1297_v7  ;;  %v2021_v34 = vpop.permute.xlu1 %2020  ;;  %v2187_v53 = vld [vmem:[%s4466_s12] sm:$0xff] }
 0x2bd   :  { %v2024_v24 = vmul.f32 0.0, %v2021_v34  ;;  %v2180_v25 = vld [vmem:[%s4467_s11] sm:$0xff] }
 0x2be   :  { %v1460_v28 = vpack.c.bf16 %v1456_v62, %v1452_v58  ;;  %v1461_v43 = vpack.c.bf16 %v1457_v2, %v1453_v23  ;;  %1756 = vmatmul.bf16.vlgmr.msra.gmra.mxu2 %v1462_v60  ;;  %1770 = vmatmul.bf16.vlgmr.msrb.gmra.mxu3 %v1463_v35  ;;  %v3162_v35 = vld [vmem:[%s4468_s10 + $0x8] sm:$0xf] }
 0x2bf   :  { %v2028_v44 = vpack.c.bf16 %v2024_v24, %v2024_v24  ;;  %v4107_v24 = vld [vmem:[%s4469_s4 + $0x70] sm:$0xff] }
 0x2c0   :  { %1728 = vmatmul.bf16.vlgmr.msra.gmra.mxu0 %v1460_v28  ;;  %1742 = vmatmul.bf16.vlgmr.msrb.gmra.mxu1 %v1461_v43  ;;  %v1982_v29 = vpop.permute.xlu0 %1981 }
 0x2c1   :  { %v1985_v56 = vmul.f32 0.0, %v1982_v29 }
 0x2c3   :  { %v1989_v57 = vpack.c.bf16 %v1985_v56, %v1985_v56  ;;  %v4170_v56 = vld [vmem:[%s4469_s4 + $0x20] sm:$0xff] }
 0x2c4   :  { %v2101_v18 = vpop.permute.xlu1 %2100 }
 0x2c5   :  { %v2104_v42 = vmul.f32 0.0, %v2101_v18 }
 0x2c7   :  { %v2108_v46 = vpack.c.bf16 %v2104_v42, %v2104_v42 }
 0x30f   :  { %v1822_v58 = vpop.permute.xlu2 %1821 }
 0x327   :  { %v1889_v23 = vpop.permute.xlu1 %1888 }
 0x33d   :  { %v1729_v4 = vpop.f32.mrf.mxu0  ;;  %v1743_v30 = vpop.f32.mrf.mxu1 }
 0x33e   :  { %v1744_v54 = vadd.f32 %v1743_v30, %v1729_v4 }
 0x341   :  { %v1757_v16 = vpop.f32.mrf.mxu2  ;;  %v1771_v52 = vpop.f32.mrf.mxu3 }
 0x342   :  { %v1758_v5 = vadd.f32 %v1757_v16, %v1744_v54 }
 0x344   :  { %v1772_v12 = vadd.f32 %v1771_v52, %v1758_v5  ;;  %v3164_v5 = vld [vmem:[%s4468_s10 + $0xc] sm:$0xf] }
 0x346   :  { %v1782_v20 = vmul.f32 %v1780_v41, %v1772_v12 }
 0x348   :  { %v1789_v26 = vadd.f32 %v1787_v15, %v1782_v20  ;;  %v3170_v15 = vld [vmem:[%s4468_s10 + $0x18] sm:$0xf] }
 0x34a   :  { %v4012_v37 = vmax.f32 %v1789_v26, 0.0 }
 0x34c   :  { %v1921_v31 = vmul.f32 %v1918_v21, %v4012_v37  ;;  %v1881_v11 = vmul.f32 %v1878_v50, %v4012_v37  ;;  %v1814_v33 = vmul.f32 %v1811_v0, %v4012_v37  ;;  %v2023_v8 = vmul.f32 %v2021_v34, %v4012_v37  ;;  %v1804_v21 = vld [vmem:[%s4468_s10] sm:$0xf] }
 0x34d   :  { %v1803_v55 = vmul.f32 %v1800_v51, %v4012_v37  ;;  %v2103_v61 = vmul.f32 %v2101_v18, %v4012_v37  ;;  %v1984_v38 = vmul.f32 %v1982_v29, %v4012_v37  ;;  %v2063_v47 = vmul.f32 %v2061_v45, %v4012_v37  ;;  %v4097_v45 = vpop.f32.mrf.mxu2  ;;  %v4126_v18 = vld [vmem:[%s4469_s4 + $0x58] sm:$0xff]  ;;  %v4132_v29 = vld [vmem:[%s4469_s4 + $0x50] sm:$0xff] }
 0x34e   :  { %v1925_v32 = vpack.c.bf16 %v1921_v31, %v1921_v31  ;;  %v1885_v36 = vpack.c.bf16 %v1881_v11, %v1881_v11  ;;  %v1818_v9 = vpack.c.bf16 %v1814_v33, %v1814_v33  ;;  %v2027_v22 = vpack.c.bf16 %v2023_v8, %v2023_v8  ;;  %v3166_v31 = vld [vmem:[%s4468_s10 + $0x10] sm:$0xf] }
 0x34f   :  { %v1806_v19 = vpack.c.bf16 %v1803_v55, %v1803_v55  ;;  %v2107_v48 = vpack.c.bf16 %v2103_v61, %v2103_v61  ;;  %v1988_v6 = vpack.c.bf16 %v1984_v38, %v1984_v38  ;;  %v2067_v7 = vpack.c.bf16 %v2063_v47, %v2063_v47  ;;  %v4138_v61 = vld [vmem:[%s4469_s4 + $0x48] sm:$0xff]  ;;  %v4140_v38 = vpop.f32.mrf.mxu0  ;;  %v4146_v47 = vld [vmem:[%s4469_s4 + $0x40] sm:$0xff] }
 0x350   :  { %1930 = vrot.lane.b32.xlu1 %v1925_v32, %s3312_s20  ;;  %1890 = vrot.lane.b32.xlu2 %v1885_v36, %s3316_s5  ;;  %v1955_v28 = vpack.c.bf16 %v4012_v37, %v4012_v37 }
 0x351   :  { %1823 = vrot.lane.b32.xlu0 %v1818_v9, %s3319_s23 }
 0x352   :  { %v1960_v0 = vsel %vm100_vm0, %v1955_v28, 0  ;;  %v3280_v28 = vld [vmem:[%s4463_s2 + $0x7] ss:$0 sm:$0xff] }
 0x358   :  { %2031 = vrot.lane.b32.xlu1 %v2027_v22, %s3314_s22  ;;  %1849 = vrot.lane.b32.xlu2 %v1805_v10, %s3318_s24  ;;  %v3168_v22 = vld [vmem:[%s4468_s10 + $0x14] sm:$0xf] }
 0x359   :  { %1928 = vrot.lane.b32.xlu0 %v1924_v40, %s3312_s20  ;;  %v3174_v40 = vld [vmem:[%s4468_s10 + $0x20] sm:$0xf] }
 0x360   :  { %2073 = vrot.lane.b32.xlu1 %v2068_v27, %s3315_s3  ;;  %2033 = vrot.lane.b32.xlu2 %v2028_v44, %s3314_s22  ;;  %v4114_v27 = vld [vmem:[%s4469_s4 + $0x68] sm:$0xff]  ;;  %v4120_v44 = vld [vmem:[%s4469_s4 + $0x60] sm:$0xff] }
 0x361   :  { %1851 = vrot.lane.b32.xlu0 %v1806_v19, %s3318_s24 }
 0x368   :  { %2111 = vrot.lane.b32.xlu1 %v2107_v48, %s3317_s30  ;;  %1992 = vrot.lane.b32.xlu2 %v1988_v6, %s3307_s25  ;;  %v4151_v48 = vld [vmem:[%s4469_s4 + $0x38] sm:$0xff]  ;;  %v4157_v6 = vld [vmem:[%s4469_s4 + $0x30] sm:$0xff] }
 0x369   :  { %2071 = vrot.lane.b32.xlu0 %v2067_v7, %s3315_s3  ;;  %v4164_v7 = vld [vmem:[%s4469_s4 + $0x28] sm:$0xff] }
 0x370   :  { %2190 = vperm.xlu1 %3269, %v2187_v53   ;;  %2113 = vrot.lane.b32.xlu2 %v2108_v46, %s3317_s30  ;;  %v4176_v46 = vld [vmem:[%s4469_s4 + $0x18] sm:$0xff]  ;;  %v4182_v53 = vld [vmem:[%s4469_s4 + $0x10] sm:$0xff] }
 0x371   :  { %1994 = vrot.lane.b32.xlu0 %v1989_v57, %s3307_s25  ;;  %v4184_v57 = vpop.f32.mrf.mxu3 }
 0x379   :  { %2183 = vperm.xlu0 %3268, %v2180_v25   ;;  %v4190_v25 = vld [vmem:[%s4469_s4 + $0x8] sm:$0xff] }
 0x3aa   :  { %v1891_v59 = vpop.permute.xlu2 %1890 }
 0x3ab   :  { %v1893_v39 = vsel %vm1892_vm11, %v1889_v23, %v1891_v59  ;;  %v4196_v59 = vld [vmem:[%s4469_s4] sm:$0xff] }
 0x3ac   :  { %v1898_v60 = vsel %vm100_vm0, %v1893_v39, 0  ;;  %v3279_v39 = vld [vmem:[%s4463_s2] ss:$0 sm:$0xff] }
 0x3ad   :  { %1907 = vmatpush.bf16.msrb.mxu2 %v1898_v60  ;;  %v3281_v60 = vld [vmem:[%s4463_s2 + $0x3] ss:$0 sm:$0xff]  ;;  %2203 = vrot.lane.b32.xlu0 %v3279_v39, %s3317_s30 }
 0x3ae   :  { %2317 = vrot.lane.b32.xlu1 %v3281_v60, %s3307_s25 }
 0x3b0   :  { %3163 = vmatmul.msk.bf16.vlgmr.msrb.gmra.mxu2 %vm1825_vm12, %v3162_v35  ;;  %v3282_v35 = vld [vmem:[%s4463_s2 + $0x1] ss:$0 sm:$0xff] }
 0x3b1   :  { %2214 = vrot.lane.b32.xlu2 %v3282_v35, %s3315_s3 }
 0x3b2   :  { %v1850_v62 = vpop.permute.xlu2 %1849 }
 0x3b5   :  { %2459 = vrot.lane.b32.xlu0 %v3280_v28, %s3319_s23 }
 0x3ba   :  { %v2034_v3 = vpop.permute.xlu2 %2033 }
 0x3c2   :  { %v1931_v2 = vpop.permute.xlu1 %1930  ;;  %v1993_v52 = vpop.permute.xlu2 %1992 }
 0x3c3   :  { %v1824_v43 = vpop.permute.xlu0 %1823 }
 0x3c4   :  { %v1826_v41 = vsel %vm1825_vm12, %v1822_v58, %v1824_v43  ;;  %v1745_v58 = vpop.f32.mrf.mxu1  ;;  %v3284_v43 = vld [vmem:[%s4463_s2 + $0x5] ss:$0 sm:$0xff] }
 0x3c5   :  { %v1832_v50 = vsel %vm100_vm0, %v1826_v41, 0  ;;  %2381 = vrot.lane.b32.xlu1 %v3284_v43, %s3312_s20 }
 0x3c6   :  { %1841 = vmatpush.bf16.msrb.mxu0 %v1832_v50 }
 0x3c9   :  { %3160 = vmatmul.msk.bf16.vlgmr.msrb.gmra.mxu0 %vm1825_vm12, %v3159_v1 }
 0x3ca   :  { %1969 = vmatpush.bf16.msra.mxu0 %v1960_v0  ;;  %v2032_v49 = vpop.permute.xlu1 %2031  ;;  %v2114_v11 = vpop.permute.xlu2 %2113  ;;  %v3285_v0 = vld [vmem:[%s4463_s2 + $0x2] ss:$0 sm:$0xff] }
 0x3cb   :  { %v2036_v63 = vsel %vm2035_vm13, %v2032_v49, %v2034_v3  ;;  %v1929_v30 = vpop.permute.xlu0 %1928  ;;  %2278 = vrot.lane.b32.xlu2 %v3285_v0, %s3314_s22 }
 0x3cc   :  { %v2041_v4 = vsel %vm100_vm0, %v2036_v63, 0  ;;  %v1932_v54 = vsel %vm630_vm10, %v1929_v30, %v1931_v2 }
 0x3cd   :  { %2050 = vmatpush.bf16.msra.mxu2 %v2041_v4  ;;  %v1937_v16 = vsel %vm100_vm0, %v1932_v54, 0  ;;  %v3283_v4 = vld [vmem:[%s4463_s2 + $0x6] ss:$0 sm:$0xff] }
 0x3ce   :  { %1946 = vmatpush.bf16.msra.mxu3 %v1937_v16  ;;  %2420 = vrot.lane.b32.xlu0 %v3283_v4, %s3316_s5 }
 0x3d0   :  { %3171 = vmatmul.msk.bf16.vlgmr.msra.gmra.mxu2 %vm1825_vm12, %v3170_v15  ;;  %v3286_v15 = vld [vmem:[%s4463_s2 + $0x8] ss:$0 sm:$0xff] }
 0x3d1   :  { %3165 = vmatmul.msk.bf16.vlgmr.msra.gmra.mxu3 %vm1825_vm12, %v3164_v5 }
 0x3d2   :  { %v2074_v12 = vpop.permute.xlu1 %2073 }
 0x3d3   :  { %v1852_v20 = vpop.permute.xlu0 %1851  ;;  %2498 = vrot.lane.b32.xlu2 %v3286_v15, %s3318_s24 }
 0x3d4   :  { %v1854_v26 = vsel %vm1853_vm14, %v1850_v62, %v1852_v20 }
 0x3d5   :  { %v1859_v37 = vsel %vm100_vm0, %v1854_v26, 0 }
 0x3d6   :  { %1868 = vmatpush.bf16.msra.mxu1 %v1859_v37 }
 0x3d9   :  { %3161 = vmatmul.msk.bf16.vlgmr.msra.gmra.mxu1 %vm1825_vm12, %v1804_v21  ;;  %3167 = vmatmul.msk.bf16.vlgmr.msra.gmra.mxu0 %vm1825_vm12, %v3166_v31 }
 0x3da   :  { %v2112_v32 = vpop.permute.xlu1 %2111 }
 0x3db   :  { %v2116_v33 = vsel %vm2115_vm15, %v2112_v32, %v2114_v11  ;;  %v2072_v36 = vpop.permute.xlu0 %2071 }
 0x3dc   :  { %v2121_v51 = vsel %vm100_vm0, %v2116_v33, 0  ;;  %v2076_v9 = vsel %vm2075_vm1, %v2072_v36, %v2074_v12 }
 0x3dd   :  { %2130 = vmatpush.bf16.msrb.mxu0 %v2121_v51  ;;  %v2081_v34 = vsel %vm100_vm0, %v2076_v9, 0 }
 0x3de   :  { %2090 = vmatpush.bf16.msrb.mxu3 %v2081_v34 }
 0x3e1   :  { %3173 = vmatmul.msk.bf16.vlgmr.msrb.gmra.mxu3 %vm1825_vm12, %v3172_v17 }
 0x3e3   :  { %v1995_v8 = vpop.permute.xlu0 %1994 }
 0x3e4   :  { %v1996_v14 = vsel %vm574_vm4, %v1993_v52, %v1995_v8 }
 0x3e5   :  { %v2001_v10 = vsel %vm100_vm0, %v1996_v14, 0 }
 0x3e6   :  { %2010 = vmatpush.bf16.msrb.mxu1 %v2001_v10 }
 0x3e9   :  { %3169 = vmatmul.msk.bf16.vlgmr.msrb.gmra.mxu1 %vm1825_vm12, %v3168_v22  ;;  %3175 = vmatmul.msk.bf16.vlgmr.msrb.gmra.mxu0 %vm1825_vm12, %v3174_v40 }
 0x3ea   :  { %2153 = vmatpush.msra.mxu1 %v4102_v13 }
 0x3eb   :  { %v2184_v34 = vpop.permute.xlu0 %2183 }
 0x3ec   :  { %2154 = vmatpush.msra.mxu1 %v4107_v24 }
 0x3ee   :  { %2155 = vmatpush.msra.mxu1 %v4114_v27 }
 0x3f0   :  { %2156 = vmatpush.msra.mxu1 %v4120_v44 }
 0x3f2   :  { %2157 = vmatpush.msra.mxu1 %v4126_v18 }
 0x3f4   :  { %2158 = vmatpush.msra.mxu1 %v4132_v29 }
 0x3f6   :  { %2159 = vmatpush.msra.mxu1 %v4138_v61 }
 0x3f8   :  { %2160 = vmatpush.msra.mxu1 %v4146_v47 }
 0x3fa   :  { %2161 = vmatpush.msra.mxu1 %v4151_v48 }
 0x3fc   :  { %2162 = vmatpush.msra.mxu1 %v4157_v6 }
 0x3fe   :  { %2163 = vmatpush.msra.mxu1 %v4164_v7 }
 0x400   :  { %2164 = vmatpush.msra.mxu1 %v4170_v56 }
 0x402   :  { %2165 = vmatpush.msra.mxu1 %v4176_v46 }
 0x404   :  { %2166 = vmatpush.msra.mxu1 %v4182_v53 }
 0x406   :  { %2167 = vmatpush.msra.mxu1 %v4190_v25 }
 0x408   :  { %2168 = vmatpush.msra.mxu1 %v4196_v59 }
 0x40b   :  { %v2215_v36 = vpop.permute.xlu2 %2214 }
 0x40c   :  { %v2217_v51 = vmul.f32 0.0, %v2215_v36 }
 0x40e   :  { %v2221_v9 = vpack.c.bf16 %v2217_v51, %v2217_v51 }
 0x410   :  { %2225 = vrot.lane.b32.xlu1 %v2221_v9, %s3319_s23 }
 0x41f   :  { %v2204_v17 = vpop.permute.xlu0 %2203 }
 0x420   :  { %v2206_v8 = vmul.f32 0.0, %v2204_v17 }
 0x422   :  { %v2209_v14 = vpack.c.bf16 %v2206_v8, %v2206_v8 }
 0x424   :  { %2251 = vrot.lane.b32.xlu0 %v2209_v14, %s3318_s24 }
 0x433   :  { %v1909_v55 = vpop.f32.mrf.mxu2 }
 0x43b   :  { %v1911_v19 = vpop.f32.mrf.mxu2 }
 0x446   :  { %v1843_v42 = vpop.f32.mrf.mxu0 }
 0x44e   :  { %v1845_v23 = vpop.f32.mrf.mxu0 }
 0x44f   :  { %v2191_v23 = vpop.permute.xlu1 %2190 }
 0x453   :  { %v2052_v62 = vpop.f32.mrf.mxu2 }
 0x454   :  { %v1948_v2 = vpop.f32.mrf.mxu3 }
 0x456   :  { %v1870_v41 = vpop.f32.mrf.mxu1  ;;  %v1971_v50 = vpop.f32.mrf.mxu0 }
 0x457   :  { %v1871_v1 = vadd.f32 %v1870_v41, %v1843_v42  ;;  %v1746_v42 = vadd.f32 %v1745_v58, %v4140_v38  ;;  %v2318_v28 = vpop.permute.xlu1 %2317 }
 0x459   :  { %v1913_v63 = vadd.f32 %v1909_v55, %v1871_v1  ;;  %v1760_v39 = vadd.f32 %v4097_v45, %v1746_v42 }
 0x45b   :  { %v2054_v3 = vpop.f32.mrf.mxu2  ;;  %v1952_v16 = vadd.f32 %v1948_v2, %v1913_v63  ;;  %v1774_v35 = vadd.f32 %v4184_v57, %v1760_v39  ;;  %v2320_v57 = vmul.f32 0.0, %v2318_v28  ;;  %v2279_v63 = vpop.permute.xlu2 %2278  ;;  %v3176_v39 = vld [vmem:[%s4472_s13 + $0x4] sm:$0xf] }
 0x45c   :  { %v1950_v49 = vpop.f32.mrf.mxu3 }
 0x45d   :  { %v1975_v52 = vadd.f32 %v1971_v50, %v1952_v16  ;;  %v2460_v16 = vpop.permute.xlu0 %2459 }
 0x45e   :  { %v1872_v30 = vpop.f32.mrf.mxu1  ;;  %v1973_v54 = vpop.f32.mrf.mxu0 }
 0x45f   :  { %v2382_v49 = vpop.permute.xlu1 %2381  ;;  %v2281_v30 = vmul.f32 0.0, %v2279_v63  ;;  %v2324_v54 = vpack.c.bf16 %v2320_v57, %v2320_v57  ;;  %v3288_v57 = vld [vmem:[%s4463_s2 + $0x3] ss:$0 sm:$0xff] }
 0x460   :  { %v2385_v4 = vmul.f32 0.0, %v2382_v49 }
 0x462   :  { %v2389_v15 = vpack.c.bf16 %v2385_v4, %v2385_v4 }
 0x464   :  { %v2092_v5 = vpop.f32.mrf.mxu3 }
 0x466   :  { %v2012_v12 = vpop.f32.mrf.mxu1  ;;  %v2132_v20 = vpop.f32.mrf.mxu0 }
 0x467   :  { %v2016_v26 = vadd.f32 %v2012_v12, %v1975_v52  ;;  %v2463_v52 = vmul.f32 0.0, %v2460_v16 }
 0x469   :  { %v2056_v37 = vadd.f32 %v2052_v62, %v2016_v26  ;;  %v2467_v26 = vpack.c.bf16 %v2463_v52, %v2463_v52 }
 0x46b   :  { %v2096_v21 = vadd.f32 %v2092_v5, %v2056_v37  ;;  %v2285_v5 = vpack.c.bf16 %v2281_v30, %v2281_v30 }
 0x46c   :  { %v2094_v31 = vpop.f32.mrf.mxu3 }
 0x46d   :  { %v2136_v11 = vadd.f32 %v2132_v20, %v2096_v21  ;;  %v2421_v31 = vpop.permute.xlu0 %2420 }
 0x46e   :  { %v2014_v32 = vpop.f32.mrf.mxu1  ;;  %v2134_v33 = vpop.f32.mrf.mxu0 }
 0x46f   :  { %2169 = vmatmul.f32.vlgmr.msra.gmra.mxu1 %v2136_v11 }
 0x4ec   :  { %v2170_v10 = vpop.f32.mrf.mxu1 }
 0x4ed   :  { %v2173_v22 = vsub.f32 0.0, %v2170_v10  ;;  %v2541_v10 = vld [vmem:[%s4470_s15] sm:$0xff] }
 0x4ef   :  { %v2174_v40 = vmul.f32 1.442695, %v2173_v22 }
 0x4f1   :  { %3295 = vpow2.f32 %v2174_v40  ;;  %v2534_v40 = vld [vmem:[%s4471_s14] sm:$0xff] }
 0x4f7   :  { %v3296_v55 = vpop.eup %3295 }
 0x4f8   :  { %v2176_v19 = vadd.f32 1.0, %v3296_v55  ;;  %v2226_v55 = vpop.permute.xlu1 %2225 }
 0x4fa   :  { %3297 = vrcp.f32 %v2176_v19 }
 0x500   :  { %v3298_v60 = vpop.eup %3297 }
 0x501   :  { %v2178_v62 = vmul.f32 %v3298_v60, %v2136_v11  ;;  %v2499_v11 = vpop.permute.xlu2 %2498 }
 0x502   :  { %v2502_v8 = vmul.f32 0.0, %v2499_v11 }
 0x503   :  { %v4236_v2 = vadd.f32 %v2178_v62, %v1774_v35  ;;  %v2252_v35 = vpop.permute.xlu0 %2251 }
 0x504   :  { %v2506_v22 = vpack.c.bf16 %v2502_v8, %v2502_v8 }
 0x505   :  { %v2186_v43 = vmul.f32 %v2184_v34, %v4236_v2 }
 0x507   :  { %v2193_v41 = vadd.f32 %v2191_v23, %v2186_v43 }
 0x509   :  { %v4239_v50 = vmax.f32 %v2193_v41, 0.0 }
 0x50b   :  { %v2218_v0 = vmul.f32 %v2215_v36, %v4239_v50  ;;  %v2207_v1 = vmul.f32 %v2204_v17, %v4239_v50  ;;  %v2321_v38 = vmul.f32 %v2318_v28, %v4239_v50  ;;  %v2462_v12 = vmul.f32 %v2460_v16, %v4239_v50 }
 0x50c   :  { %v2282_v20 = vmul.f32 %v2279_v63, %v4239_v50  ;;  %v2423_v32 = vmul.f32 %v2421_v31, %v4239_v50  ;;  %v2384_v33 = vmul.f32 %v2382_v49, %v4239_v50  ;;  %v2501_v36 = vmul.f32 %v2499_v11, %v4239_v50  ;;  %v3287_v49 = vld [vmem:[%s4463_s2 + $0x1] ss:$0 sm:$0xff] }
 0x50d   :  { %v2222_v58 = vpack.c.bf16 %v2218_v0, %v2218_v0  ;;  %v2210_v45 = vpack.c.bf16 %v2207_v1, %v2207_v1  ;;  %v2325_v3 = vpack.c.bf16 %v2321_v38, %v2321_v38  ;;  %v2466_v37 = vpack.c.bf16 %v2462_v12, %v2462_v12  ;;  %v3185_v12 = vld [vmem:[%s4472_s13 + $0x14] sm:$0xf] }
 0x50e   :  { %v2286_v21 = vpack.c.bf16 %v2282_v20, %v2282_v20  ;;  %v2427_v51 = vpack.c.bf16 %v2423_v32, %v2423_v32  ;;  %v2388_v9 = vpack.c.bf16 %v2384_v33, %v2384_v33  ;;  %v2505_v34 = vpack.c.bf16 %v2501_v36, %v2501_v36  ;;  %v3179_v20 = vld [vmem:[%s4472_s13 + $0x8] sm:$0xf]  ;;  %v3183_v36 = vld [vmem:[%s4472_s13 + $0x10] sm:$0xf] }
 0x50f   :  { %2330 = vrot.lane.b32.xlu0 %v2325_v3, %s3312_s20  ;;  %2227 = vrot.lane.b32.xlu2 %v2222_v58, %s3319_s23  ;;  %v2424_v17 = vmul.f32 0.0, %v2421_v31  ;;  %v2355_v43 = vpack.c.bf16 %v4239_v50, %v4239_v50  ;;  %v2208_v50 = vld [vmem:[%s4472_s13] sm:$0xf] }
 0x510   :  { %2253 = vrot.lane.b32.xlu1 %v2210_v45, %s3318_s24  ;;  %v3181_v45 = vld [vmem:[%s4472_s13 + $0xc] sm:$0xf] }
 0x511   :  { %v2428_v14 = vpack.c.bf16 %v2424_v17, %v2424_v17  ;;  %v2360_v3 = vsel %vm100_vm0, %v2355_v43, 0 }
 0x517   :  { %2394 = vrot.lane.b32.xlu0 %v2389_v15, %s3307_s25  ;;  %2328 = vrot.lane.b32.xlu2 %v2324_v54, %s3312_s20  ;;  %v3292_v15 = vld [vmem:[%s4463_s2 + $0x2] ss:$0 sm:$0xff] }
 0x518   :  { %2289 = vrot.lane.b32.xlu1 %v2285_v5, %s3316_s5 }
 0x51f   :  { %2470 = vrot.lane.b32.xlu0 %v2466_v37, %s3315_s3  ;;  %2291 = vrot.lane.b32.xlu2 %v2286_v21, %s3316_s5  ;;  %v3290_v37 = vld [vmem:[%s4463_s2 + $0x7] ss:$0 sm:$0xff]  ;;  %v3293_v21 = vld [vmem:[%s4463_s2 + $0x6] ss:$0 sm:$0xff] }
 0x520   :  { %2472 = vrot.lane.b32.xlu1 %v2467_v26, %s3315_s3  ;;  %v3289_v26 = vld [vmem:[%s4463_s2] ss:$0 sm:$0xff] }
 0x527   :  { %2431 = vrot.lane.b32.xlu0 %v2427_v51, %s3314_s22  ;;  %2392 = vrot.lane.b32.xlu2 %v2388_v9, %s3307_s25  ;;  %v3189_v51 = vld [vmem:[%s4472_s13 + $0x1c] sm:$0xf]  ;;  %v3291_v9 = vld [vmem:[%s4463_s2 + $0x5] ss:$0 sm:$0xff] }
 0x528   :  { %2509 = vrot.lane.b32.xlu1 %v2505_v34, %s3317_s30  ;;  %v3294_v34 = vld [vmem:[%s4463_s2 + $0x8] ss:$0 sm:$0xff] }
 0x52f   :  { %2544 = vperm.xlu0 %3268, %v2541_v10   ;;  %2511 = vrot.lane.b32.xlu2 %v2506_v22, %s3317_s30 }
 0x530   :  { %2433 = vrot.lane.b32.xlu1 %v2428_v14, %s3314_s22 }
 0x537   :  { %2537 = vperm.xlu2 %3270, %v2534_v40   ;;  %2671 = vrot.lane.b32.xlu0 %v3288_v57, %s3307_s25 }
 0x538   :  { %2568 = vrot.lane.b32.xlu1 %v3287_v49, %s3315_s3 }
 0x53f   :  { %2632 = vrot.lane.b32.xlu2 %v3292_v15, %s3314_s22  ;;  %2813 = vrot.lane.b32.xlu0 %v3290_v37, %s3319_s23 }
 0x540   :  { %2557 = vrot.lane.b32.xlu1 %v3289_v26, %s3317_s30 }
 0x547   :  { %2774 = vrot.lane.b32.xlu2 %v3293_v21, %s3316_s5 }
 0x548   :  { %2735 = vrot.lane.b32.xlu1 %v3291_v9, %s3312_s20 }
 0x54f   :  { %2852 = vrot.lane.b32.xlu2 %v3294_v34, %s3318_s24 }
 0x569   :  { %v2228_v19 = vpop.permute.xlu2 %2227 }
 0x56a   :  { %v2229_v42 = vsel %vm1825_vm12, %v2226_v55, %v2228_v19 }
 0x56b   :  { %v2234_v23 = vsel %vm100_vm0, %v2229_v42, 0  ;;  %v3187_v42 = vld [vmem:[%s4472_s13 + $0x18] sm:$0xf] }
 0x56c   :  { %2243 = vmatpush.bf16.msrb.mxu2 %v2234_v23  ;;  %v3191_v23 = vld [vmem:[%s4472_s13 + $0x20] sm:$0xf] }
 0x56f   :  { %3177 = vmatmul.msk.bf16.vlgmr.msrb.gmra.mxu2 %vm1825_vm12, %v3176_v39 }
 0x571   :  { %v2329_v60 = vpop.permute.xlu2 %2328 }
 0x579   :  { %v2292_v62 = vpop.permute.xlu2 %2291 }
 0x581   :  { %v2331_v28 = vpop.permute.xlu0 %2330  ;;  %v2393_v63 = vpop.permute.xlu2 %2392 }
 0x582   :  { %v2332_v41 = vsel %vm630_vm10, %v2329_v60, %v2331_v28  ;;  %v2254_v0 = vpop.permute.xlu1 %2253 }
 0x583   :  { %v2337_v1 = vsel %vm100_vm0, %v2332_v41, 0  ;;  %v2255_v38 = vsel %vm1853_vm14, %v2252_v35, %v2254_v0 }
 0x584   :  { %v2260_v58 = vsel %vm100_vm0, %v2255_v38, 0  ;;  %2346 = vmatpush.bf16.msra.mxu2 %v2337_v1 }
 0x585   :  { %2269 = vmatpush.bf16.msra.mxu3 %v2260_v58 }
 0x587   :  { %3182 = vmatmul.msk.bf16.vlgmr.msra.gmra.mxu2 %vm1825_vm12, %v3181_v45 }
 0x588   :  { %3178 = vmatmul.msk.bf16.vlgmr.msra.gmra.mxu3 %vm1825_vm12, %v2208_v50 }
 0x589   :  { %2369 = vmatpush.bf16.msrb.mxu3 %v2360_v3  ;;  %v2395_v4 = vpop.permute.xlu0 %2394  ;;  %v2512_v17 = vpop.permute.xlu2 %2511 }
 0x58a   :  { %v2396_v30 = vsel %vm574_vm4, %v2393_v63, %v2395_v4  ;;  %v2290_v54 = vpop.permute.xlu1 %2289 }
 0x58b   :  { %v2401_v16 = vsel %vm100_vm0, %v2396_v30, 0  ;;  %v2293_v5 = vsel %vm1892_vm11, %v2290_v54, %v2292_v62 }
 0x58c   :  { %v2298_v52 = vsel %vm100_vm0, %v2293_v5, 0  ;;  %2410 = vmatpush.bf16.msrb.mxu1 %v2401_v16 }
 0x58d   :  { %2307 = vmatpush.bf16.msra.mxu0 %v2298_v52 }
 0x58f   :  { %3186 = vmatmul.msk.bf16.vlgmr.msrb.gmra.mxu1 %vm1825_vm12, %v3185_v12 }
 0x590   :  { %3180 = vmatmul.msk.bf16.vlgmr.msra.gmra.mxu0 %vm1825_vm12, %v3179_v20 }
 0x591   :  { %v2471_v31 = vpop.permute.xlu0 %2470  ;;  %v2538_v35 = vpop.permute.xlu2 %2537 }
 0x592   :  { %v2473_v11 = vpop.permute.xlu1 %2472 }
 0x593   :  { %v2474_v32 = vsel %vm2075_vm1, %v2471_v31, %v2473_v11 }
 0x594   :  { %v2479_v33 = vsel %vm100_vm0, %v2474_v32, 0 }
 0x595   :  { %2488 = vmatpush.bf16.msrb.mxu2 %v2479_v33 }
 0x598   :  { %3184 = vmatmul.msk.bf16.vlgmr.msrb.gmra.mxu3 %vm1825_vm12, %v3183_v36  ;;  %3190 = vmatmul.msk.bf16.vlgmr.msrb.gmra.mxu2 %vm1825_vm12, %v3189_v51 }
 0x599   :  { %v2432_v22 = vpop.permute.xlu0 %2431  ;;  %v2633_v28 = vpop.permute.xlu2 %2632 }
 0x59a   :  { %v2510_v8 = vpop.permute.xlu1 %2509  ;;  %v2635_v41 = vmul.f32 0.0, %v2633_v28 }
 0x59b   :  { %v2513_v14 = vsel %vm2115_vm15, %v2510_v8, %v2512_v17 }
 0x59c   :  { %v2518_v10 = vsel %vm100_vm0, %v2513_v14, 0  ;;  %v2639_v1 = vpack.c.bf16 %v2635_v41, %v2635_v41 }
 0x59d   :  { %2527 = vmatpush.bf16.msra.mxu3 %v2518_v10 }
 0x59e   :  { %2643 = vrot.lane.b32.xlu2 %v2639_v1, %s3316_s5 }
 0x5a1   :  { %v2545_v11 = vpop.permute.xlu0 %2544 }
 0x5a2   :  { %v2434_v40 = vpop.permute.xlu1 %2433 }
 0x5a3   :  { %v2435_v55 = vsel %vm2035_vm13, %v2432_v22, %v2434_v40 }
 0x5a4   :  { %v2440_v19 = vsel %vm100_vm0, %v2435_v55, 0 }
 0x5a5   :  { %2449 = vmatpush.bf16.msrb.mxu0 %v2440_v19 }
 0x5a8   :  { %3188 = vmatmul.msk.bf16.vlgmr.msrb.gmra.mxu0 %vm1825_vm12, %v3187_v42  ;;  %3192 = vmatmul.msk.bf16.vlgmr.msra.gmra.mxu3 %vm1825_vm12, %v3191_v23 }
 0x5a9   :  { %v2672_v17 = vpop.permute.xlu0 %2671 }
 0x5aa   :  { %v2569_v62 = vpop.permute.xlu1 %2568  ;;  %v2674_v42 = vmul.f32 0.0, %v2672_v17 }
 0x5ab   :  { %v2571_v43 = vmul.f32 0.0, %v2569_v62 }
 0x5ad   :  { %v2575_v0 = vpack.c.bf16 %v2571_v43, %v2571_v43 }
 0x5af   :  { %2579 = vrot.lane.b32.xlu0 %v2575_v0, %s3319_s23 }
 0x5b1   :  { %v2814_v41 = vpop.permute.xlu0 %2813 }
 0x5b2   :  { %v2558_v19 = vpop.permute.xlu1 %2557  ;;  %v2817_v0 = vmul.f32 0.0, %v2814_v41 }
 0x5b3   :  { %v2560_v23 = vmul.f32 0.0, %v2558_v19 }
 0x5f2   :  { %v2245_v39 = vpop.f32.mrf.mxu2 }
 0x5fa   :  { %v2247_v60 = vpop.f32.mrf.mxu2 }
 0x60a   :  { %v2348_v38 = vpop.f32.mrf.mxu2 }
 0x60b   :  { %v2271_v58 = vpop.f32.mrf.mxu3 }
 0x60c   :  { %v2412_v45 = vpop.f32.mrf.mxu1  ;;  %v2272_v4 = vadd.f32 %v2271_v58, %v2245_v39  ;;  %v2775_v39 = vpop.permute.xlu2 %2774  ;;  %v2821_v58 = vpack.c.bf16 %v2817_v0, %v2817_v0 }
 0x60d   :  { %v2309_v3 = vpop.f32.mrf.mxu0  ;;  %v2778_v43 = vmul.f32 0.0, %v2775_v39 }
 0x60e   :  { %v2313_v30 = vadd.f32 %v2309_v3, %v2272_v4  ;;  %v2736_v3 = vpop.permute.xlu1 %2735 }
 0x610   :  { %v2352_v16 = vadd.f32 %v2348_v38, %v2313_v30  ;;  %v2782_v38 = vpack.c.bf16 %v2778_v43, %v2778_v43 }
 0x612   :  { %v2350_v50 = vpop.f32.mrf.mxu2 }
 0x613   :  { %v2273_v49 = vpop.f32.mrf.mxu3 }
 0x614   :  { %v2414_v57 = vpop.f32.mrf.mxu1  ;;  %v2853_v50 = vpop.permute.xlu2 %2852 }
 0x615   :  { %v2311_v63 = vpop.f32.mrf.mxu0 }
 0x61b   :  { %v2371_v54 = vpop.f32.mrf.mxu3  ;;  %v2490_v15 = vpop.f32.mrf.mxu2 }
 0x61c   :  { %v2375_v5 = vadd.f32 %v2371_v54, %v2352_v16  ;;  %v2739_v16 = vmul.f32 0.0, %v2736_v3 }
 0x61e   :  { %v2416_v20 = vadd.f32 %v2412_v45, %v2375_v5 }
 0x623   :  { %v2373_v52 = vpop.f32.mrf.mxu3  ;;  %v2492_v12 = vpop.f32.mrf.mxu2 }
 0x624   :  { %v2743_v52 = vpack.c.bf16 %v2739_v16, %v2739_v16  ;;  %v2580_v12 = vpop.permute.xlu0 %2579 }
 0x625   :  { %v2451_v26 = vpop.f32.mrf.mxu0 }
 0x626   :  { %v2455_v37 = vadd.f32 %v2451_v26, %v2416_v20  ;;  %v2644_v20 = vpop.permute.xlu2 %2643 }
 0x628   :  { %v2494_v21 = vadd.f32 %v2490_v15, %v2455_v37  ;;  %v2856_v15 = vmul.f32 0.0, %v2853_v50 }
 0x62a   :  { %v2860_v5 = vpack.c.bf16 %v2856_v15, %v2856_v15 }
 0x62b   :  { %v2529_v31 = vpop.f32.mrf.mxu3 }
 0x62c   :  { %v2533_v32 = vadd.f32 %v2529_v31, %v2494_v21 }
 0x62d   :  { %v2453_v33 = vpop.f32.mrf.mxu0 }
 0x62e   :  { %v2540_v36 = vmul.f32 %v2538_v35, %v2533_v32  ;;  %v2678_v35 = vpack.c.bf16 %v2674_v42, %v2674_v42 }
 0x630   :  { %v2547_v51 = vadd.f32 %v2545_v11, %v2540_v36 }
 0x632   :  { %v4358_v9 = vmax.f32 %v2547_v51, 0.0 }
 0x633   :  { %v2531_v34 = vpop.f32.mrf.mxu3 }
 0x634   :  { %v2572_v8 = vmul.f32 %v2569_v62, %v4358_v9  ;;  %v2636_v14 = vmul.f32 %v2633_v28, %v4358_v9  ;;  %v2675_v10 = vmul.f32 %v2672_v17, %v4358_v9  ;;  %v2777_v60 = vmul.f32 %v2775_v39, %v4358_v9  ;;  %v3193_v34 = vld [vmem:[%s4473_s16 + $0x4] sm:$0xf] }
 0x635   :  { %v2563_v62 = vpack.c.bf16 %v2560_v23, %v2560_v23  ;;  %v2561_v1 = vmul.f32 %v2558_v19, %v4358_v9  ;;  %v2816_v49 = vmul.f32 %v2814_v41, %v4358_v9  ;;  %v2738_v57 = vmul.f32 %v2736_v3, %v4358_v9 }
 0x636   :  { %v2576_v22 = vpack.c.bf16 %v2572_v8, %v2572_v8  ;;  %v2640_v40 = vpack.c.bf16 %v2636_v14, %v2636_v14  ;;  %v2679_v55 = vpack.c.bf16 %v2675_v10, %v2675_v10  ;;  %v2781_v28 = vpack.c.bf16 %v2777_v60, %v2777_v60 }
 0x637   :  { %v2564_v45 = vpack.c.bf16 %v2561_v1, %v2561_v1  ;;  %v2855_v63 = vmul.f32 %v2853_v50, %v4358_v9  ;;  %v2820_v4 = vpack.c.bf16 %v2816_v49, %v2816_v49  ;;  %v2742_v30 = vpack.c.bf16 %v2738_v57, %v2738_v57 }
 0x638   :  { %2581 = vrot.lane.b32.xlu1 %v2576_v22, %s3319_s23  ;;  %2645 = vrot.lane.b32.xlu0 %v2640_v40, %s3316_s5  ;;  %v2709_v26 = vpack.c.bf16 %v4358_v9, %v4358_v9  ;;  %v3196_v9 = vld [vmem:[%s4473_s16 + $0x8] sm:$0xf]  ;;  %v3198_v40 = vld [vmem:[%s4473_s16 + $0xc] sm:$0xf] }
 0x639   :  { %2684 = vrot.lane.b32.xlu2 %v2679_v55, %s3312_s20  ;;  %v2859_v54 = vpack.c.bf16 %v2855_v63, %v2855_v63 }
 0x63a   :  { %v2714_v51 = vsel %vm100_vm0, %v2709_v26, 0 }
 0x640   :  { %2682 = vrot.lane.b32.xlu1 %v2678_v35, %s3312_s20  ;;  %2605 = vrot.lane.b32.xlu0 %v2563_v62, %s3318_s24  ;;  %v2562_v35 = vld [vmem:[%s4473_s16] sm:$0xf]  ;;  %v3200_v62 = vld [vmem:[%s4473_s16 + $0x10] sm:$0xf] }
 0x641   :  { %2785 = vrot.lane.b32.xlu2 %v2781_v28, %s3314_s22  ;;  %v3204_v28 = vld [vmem:[%s4473_s16 + $0x18] sm:$0xf] }
 0x648   :  { %2607 = vrot.lane.b32.xlu1 %v2564_v45, %s3318_s24  ;;  %2787 = vrot.lane.b32.xlu0 %v2782_v38, %s3314_s22 }
 0x649   :  { %2826 = vrot.lane.b32.xlu2 %v2821_v58, %s3315_s3  ;;  %v3206_v58 = vld [vmem:[%s4473_s16 + $0x1c] sm:$0xf] }
 0x650   :  { %2824 = vrot.lane.b32.xlu1 %v2820_v4, %s3315_s3  ;;  %2746 = vrot.lane.b32.xlu0 %v2742_v30, %s3307_s25  ;;  %v3202_v30 = vld [vmem:[%s4473_s16 + $0x14] sm:$0xf] }
 0x651   :  { %2863 = vrot.lane.b32.xlu2 %v2859_v54, %s3317_s30  ;;  %v3208_v54 = vld [vmem:[%s4473_s16 + $0x20] sm:$0xf] }
 0x658   :  { %2748 = vrot.lane.b32.xlu1 %v2743_v52, %s3307_s25  ;;  %2865 = vrot.lane.b32.xlu0 %v2860_v5, %s3317_s30 }
 0x693   :  { %v2685_v31 = vpop.permute.xlu2 %2684 }
 0x69b   :  { %v2786_v22 = vpop.permute.xlu2 %2785 }
 0x6a3   :  { %v2827_v43 = vpop.permute.xlu2 %2826 }
 0x6aa   :  { %v2582_v37 = vpop.permute.xlu1 %2581  ;;  %v2646_v21 = vpop.permute.xlu0 %2645 }
 0x6ab   :  { %v2583_v11 = vsel %vm1825_vm12, %v2580_v12, %v2582_v37  ;;  %v2647_v32 = vsel %vm1892_vm11, %v2644_v20, %v2646_v21  ;;  %v2864_v45 = vpop.permute.xlu2 %2863 }
 0x6ac   :  { %v2588_v33 = vsel %vm100_vm0, %v2583_v11, 0  ;;  %v2652_v36 = vsel %vm100_vm0, %v2647_v32, 0 }
 0x6ad   :  { %2597 = vmatpush.bf16.msra.mxu1 %v2588_v33  ;;  %2661 = vmatpush.bf16.msra.mxu2 %v2652_v36 }
 0x6b0   :  { %3194 = vmatmul.msk.bf16.vlgmr.msra.gmra.mxu1 %vm1825_vm12, %v3193_v34  ;;  %3197 = vmatmul.msk.bf16.vlgmr.msra.gmra.mxu2 %vm1825_vm12, %v3196_v9 }
 0x6b1   :  { %2723 = vmatpush.bf16.msrb.mxu1 %v2714_v51 }
 0x6b2   :  { %v2683_v17 = vpop.permute.xlu1 %2682  ;;  %v2606_v8 = vpop.permute.xlu0 %2605 }
 0x6b3   :  { %v2686_v14 = vsel %vm630_vm10, %v2683_v17, %v2685_v31 }
 0x6b4   :  { %v2691_v10 = vsel %vm100_vm0, %v2686_v14, 0 }
 0x6b5   :  { %2700 = vmatpush.bf16.msrb.mxu3 %v2691_v10 }
 0x6b8   :  { %3199 = vmatmul.msk.bf16.vlgmr.msrb.gmra.mxu3 %vm1825_vm12, %v3198_v40 }
 0x6ba   :  { %v2608_v55 = vpop.permute.xlu1 %2607  ;;  %v2788_v19 = vpop.permute.xlu0 %2787 }
 0x6bb   :  { %v2609_v42 = vsel %vm1853_vm14, %v2606_v8, %v2608_v55  ;;  %v2789_v23 = vsel %vm2035_vm13, %v2786_v22, %v2788_v19 }
 0x6bc   :  { %v2614_v39 = vsel %vm100_vm0, %v2609_v42, 0  ;;  %v2794_v60 = vsel %vm100_vm0, %v2789_v23, 0 }
 0x6bd   :  { %2623 = vmatpush.bf16.msra.mxu0 %v2614_v39  ;;  %2803 = vmatpush.bf16.msrb.mxu2 %v2794_v60 }
 0x6c0   :  { %3195 = vmatmul.msk.bf16.vlgmr.msra.gmra.mxu0 %vm1825_vm12, %v2562_v35  ;;  %3201 = vmatmul.msk.bf16.vlgmr.msrb.gmra.mxu1 %vm1825_vm12, %v3200_v62 }
 0x6c1   :  { %3205 = vmatmul.msk.bf16.vlgmr.msrb.gmra.mxu2 %vm1825_vm12, %v3204_v28 }
 0x6c2   :  { %v2825_v41 = vpop.permute.xlu1 %2824  ;;  %v2747_v0 = vpop.permute.xlu0 %2746 }
 0x6c3   :  { %v2828_v1 = vsel %vm2075_vm1, %v2825_v41, %v2827_v43 }
 0x6c4   :  { %v2833_v38 = vsel %vm100_vm0, %v2828_v1, 0 }
 0x6c5   :  { %2842 = vmatpush.bf16.msra.mxu3 %v2833_v38 }
 0x6c8   :  { %3207 = vmatmul.msk.bf16.vlgmr.msra.gmra.mxu3 %vm1825_vm12, %v3206_v58 }
 0x6ca   :  { %v2749_v3 = vpop.permute.xlu1 %2748  ;;  %v2866_v50 = vpop.permute.xlu0 %2865 }
 0x6cb   :  { %v2750_v49 = vsel %vm574_vm4, %v2747_v0, %v2749_v3  ;;  %v2867_v57 = vsel %vm2115_vm15, %v2864_v45, %v2866_v50 }
 0x6cc   :  { %v2755_v63 = vsel %vm100_vm0, %v2750_v49, 0  ;;  %v2872_v4 = vsel %vm100_vm0, %v2867_v57, 0 }
 0x6cd   :  { %2764 = vmatpush.bf16.msrb.mxu0 %v2755_v63  ;;  %2881 = vmatpush.bf16.msra.mxu1 %v2872_v4 }
 0x6d0   :  { %3203 = vmatmul.msk.bf16.vlgmr.msrb.gmra.mxu0 %vm1825_vm12, %v3202_v30  ;;  %3209 = vmatmul.msk.bf16.vlgmr.msra.gmra.mxu1 %vm1825_vm12, %v3208_v54 }
 0x6d1   :  { %2904 = vmatpush.msra.mxu0 %v4102_v13 }
 0x6d3   :  { %2905 = vmatpush.msra.mxu0 %v4107_v24 }
 0x6d5   :  { %2906 = vmatpush.msra.mxu0 %v4114_v27 }
 0x6d7   :  { %2907 = vmatpush.msra.mxu0 %v4120_v44 }
 0x6d9   :  { %2908 = vmatpush.msra.mxu0 %v4126_v18 }
 0x6db   :  { %2909 = vmatpush.msra.mxu0 %v4132_v29 }
 0x6dd   :  { %2910 = vmatpush.msra.mxu0 %v4138_v61 }
 0x6df   :  { %2911 = vmatpush.msra.mxu0 %v4146_v47 }
 0x6e1   :  { %2912 = vmatpush.msra.mxu0 %v4151_v48 }
 0x6e3   :  { %2913 = vmatpush.msra.mxu0 %v4157_v6 }
 0x6e5   :  { %2914 = vmatpush.msra.mxu0 %v4164_v7 }
 0x6e7   :  { %2915 = vmatpush.msra.mxu0 %v4170_v56 }
 0x6e9   :  { %2916 = vmatpush.msra.mxu0 %v4176_v46 }
 0x6eb   :  { %2917 = vmatpush.msra.mxu0 %v4182_v53 }
 0x6ed   :  { %2918 = vmatpush.msra.mxu0 %v4190_v25 }
 0x6ef   :  { %2919 = vmatpush.msra.mxu0 %v4196_v59 }
 0x72d   :  { %v2599_v13 = vpop.f32.mrf.mxu1 }
 0x733   :  { %v2663_v24 = vpop.f32.mrf.mxu2 }
 0x735   :  { %v2601_v27 = vpop.f32.mrf.mxu1 }
 0x73b   :  { %v2702_v44 = vpop.f32.mrf.mxu3  ;;  %v2665_v18 = vpop.f32.mrf.mxu2 }
 0x73d   :  { %v2625_v29 = vpop.f32.mrf.mxu0  ;;  %v2725_v61 = vpop.f32.mrf.mxu1 }
 0x73e   :  { %v2626_v47 = vadd.f32 %v2625_v29, %v2599_v13 }
 0x740   :  { %v2667_v6 = vadd.f32 %v2663_v24, %v2626_v47 }
 0x742   :  { %v2706_v46 = vadd.f32 %v2702_v44, %v2667_v6 }
 0x743   :  { %v2704_v48 = vpop.f32.mrf.mxu3 }
 0x744   :  { %v2805_v7 = vpop.f32.mrf.mxu2  ;;  %v2729_v53 = vadd.f32 %v2725_v61, %v2706_v46 }
 0x745   :  { %v2627_v56 = vpop.f32.mrf.mxu0  ;;  %v2727_v15 = vpop.f32.mrf.mxu1 }
 0x74b   :  { %v2844_v16 = vpop.f32.mrf.mxu3 }
 0x74c   :  { %v2807_v5 = vpop.f32.mrf.mxu2 }
 0x74d   :  { %v2766_v25 = vpop.f32.mrf.mxu0  ;;  %v2883_v52 = vpop.f32.mrf.mxu1 }
 0x74e   :  { %v2770_v59 = vadd.f32 %v2766_v25, %v2729_v53 }
 0x750   :  { %v2809_v12 = vadd.f32 %v2805_v7, %v2770_v59 }
 0x752   :  { %v2848_v20 = vadd.f32 %v2844_v16, %v2809_v12 }
 0x753   :  { %v2846_v26 = vpop.f32.mrf.mxu3 }
 0x754   :  { %v2887_v37 = vadd.f32 %v2883_v52, %v2848_v20 }
 0x755   :  { %v2768_v21 = vpop.f32.mrf.mxu0  ;;  %v2885_v31 = vpop.f32.mrf.mxu1 }
 0x756   :  { %2920 = vmatmul.f32.vlgmr.msra.gmra.mxu0 %v2887_v37 }
 0x7d3   :  { %v2921_v11 = vpop.f32.mrf.mxu0 }
 0x7d4   :  { %v2924_v32 = vsub.f32 0.0, %v2921_v11 }
 0x7d6   :  { %v2925_v33 = vmul.f32 1.442695, %v2924_v32 }
 0x7d8   :  { %3299 = vpow2.f32 %v2925_v33 }
 0x7de   :  { %v3300_v36 = vpop.eup %3299 }
 0x7df   :  { %v2927_v51 = vadd.f32 1.0, %v3300_v36 }
 0x7e1   :  { %3301 = vrcp.f32 %v2927_v51 }
 0x7e7   :  { %v3302_v34 = vpop.eup %3301 }
 0x7e8   :  { %v2929_v9 = vmul.f32 %v3302_v34, %v2887_v37 }
 0x7ea   :  { %v2930_v17 = vadd.f32 %v2929_v9, %v4236_v2 }
 0x7ec   :  { %2931 = vst [vmem:[%s4474_s17] sm:$0xff] %v2930_v17 }

</bundles_post_ra>
